<compile_context>
chip_gen: v6e
topology: v6e:2x2x1
jax: 0.10.0
libtpu: 0.0.40
codegen_flags: <defaults>
</compile_context>

<pallas_src>
import functools

import jax
import jax.numpy as jnp
from jax import lax
from jax.experimental import pallas as pl
from jax.experimental.pallas import tpu as pltpu


# ---------------------------------------------------------------------------
# Kernel A: per-batch source projection (MXU) + in-VMEM KNN gather-reduce +
#           fused GroupNorm moment accumulation.
# ---------------------------------------------------------------------------
def _edgeconv_stats_kernel(idx_ref, src_ref, xq_ref, wf_ref, wd_ref,
                           hi_ref, lo_ref, sum_ref, sq_ref,
                           yf_ref, gsum_ref, gsq_ref, *,
                           n_points, n_blk, k_nbrs):
    # idx_ref : SMEM int32 [B*N*K]   flattened KNN indices (scalar prefetch)
    # src_ref : VMEM bf16 [G, Cin]   source features of the current batch
    # xq_ref  : VMEM bf16 [n_blk, Cin] query/center features of this tile
    # wf_ref  : VMEM bf16 [Cin, Cout]  == W[:, :Cin].T
    # wd_ref  : VMEM bf16 [Cin, Cout]  == (W[:, Cin:] - W[:, :Cin]).T
    # hi/lo   : out f32 [n_blk, Cout]  per-point max / min over k of pre-norm y
    # sum/sq  : out f32 [1, Cout]      per-batch per-channel moments (accumulated)
    # yf_ref  : scratch f32 [G, Cout]  projected source rows (persist over N axis)
    b = pl.program_id(0)
    nb = pl.program_id(1)
    k = k_nbrs

    # Once per batch: project ALL G source rows through W[:, :Cin] on the MXU
    # (K-fold fewer flops than convolving the gathered edge tensor), and zero
    # the per-batch moment accumulators.
    @pl.when(nb == 0)
    def _():
        yf_ref[...] = jnp.dot(src_ref[...], wf_ref[...],
                              preferred_element_type=jnp.float32)
        sum_ref[...] = jnp.zeros_like(sum_ref)
        sq_ref[...] = jnp.zeros_like(sq_ref)

    # In-VMEM neighbor gather driven by scalar-prefetched indices.  Per query
    # point we only keep max/min/sum/sumsq over its k neighbors, so the
    # [N, K, C] edge tensor never exists anywhere.
    base0 = (b * n_points + nb * n_blk) * k

    def point_body(i, carry):
        base = base0 + i * k
        r = yf_ref[pl.ds(idx_ref[base], 1), :]               # [1, Cout]
        hi = r
        lo = r
        s = r
        q = r * r
        for j in range(1, k):                                 # static unroll
            rj = yf_ref[pl.ds(idx_ref[base + j], 1), :]
            hi = jnp.maximum(hi, rj)
            lo = jnp.minimum(lo, rj)
            s = s + rj
            q = q + rj * rj
        hi_ref[pl.ds(i, 1), :] = hi
        lo_ref[pl.ds(i, 1), :] = lo
        gsum_ref[pl.ds(i, 1), :] = s
        gsq_ref[pl.ds(i, 1), :] = q
        return carry

    lax.fori_loop(0, n_blk, point_body, 0)

    # Center-term contribution (constant over the k neighbors) and the GroupNorm
    # moments, fused in the same pass - no extra sweep over any [N*K, C] buffer.
    #   y_ij = Yf[idx[i,j]] + Yq[i]
    yq = jnp.dot(xq_ref[...], wd_ref[...],
                 preferred_element_type=jnp.float32)          # [n_blk, Cout]
    gs = gsum_ref[...]
    hi_ref[...] = hi_ref[...] + yq
    lo_ref[...] = lo_ref[...] + yq

    kf = float(k)
    s_tile = gs + kf * yq                                     # sum_j y_ij
    q_tile = gsq_ref[...] + 2.0 * yq * gs + kf * (yq * yq)    # sum_j y_ij^2
    sum_ref[...] += jnp.sum(s_tile, axis=0, keepdims=True)
    sq_ref[...] += jnp.sum(q_tile, axis=0, keepdims=True)


# ---------------------------------------------------------------------------
# Kernel B: apply GroupNorm affine + LeakyReLU; the K-max is recovered exactly
# from the pre-norm (hi, lo) pair via monotonicity of x -> leaky(a*x + b).
# ---------------------------------------------------------------------------
def _groupnorm_leaky_kernel(hi_ref, lo_ref, scale_ref, shift_ref, o_ref, *,
                            slope):
    scale = scale_ref[...]                                    # [1, Cout]
    shift = shift_ref[...]
    y = jnp.where(scale >= 0.0, hi_ref[...], lo_ref[...])     # [n_blk, Cout]
    v = y * scale + shift
    o_ref[...] = jnp.where(v > 0.0, v, slope * v).astype(o_ref.dtype)


def _pick_block(n, cap=256):
    """Largest N-block <= cap that tiles n and keeps sublane alignment."""
    if n <= cap:
        return n
    for d in range(cap, 0, -1):
        if n % d == 0 and d % 8 == 0:
            return d
    return n  # fall back to an untiled N axis


def edgeconv_block(src_t, xq_t, idx, w, gamma, beta, *, num_groups=4, eps=1e-5,
                   out_dtype=jnp.float32, n_blk_cap=256):
    """max_k(LeakyReLU(GroupNorm(W @ [gather(src)-xq ; xq]))) -> [B, N, Cout].

    src_t: [B, G, Cin] source features, xq_t: [B, N, Cin] centers,
    idx: [B, N, K] int KNN indices into the G axis, w: [Cout, 2*Cin].
    """
    B, G, Cin = src_t.shape
    N = xq_t.shape[1]
    K = idx.shape[-1]
    Cout = w.shape[0]
    assert w.shape[1] == 2 * Cin and Cout % num_groups == 0
    assert idx.shape == (B, N, K) and gamma.shape == (Cout,) == beta.shape

    # Split of the concat matmul: W @ [f - xq ; xq] = Wf @ f + Wd @ xq.
    w32 = w.astype(jnp.float32)
    wf_t = w32[:, :Cin].T.astype(jnp.bfloat16)                # [Cin, Cout]
    wd_t = (w32[:, Cin:] - w32[:, :Cin]).T.astype(jnp.bfloat16)

    src_bf = src_t.astype(jnp.bfloat16)
    xq_bf = xq_t.astype(jnp.bfloat16)
    idx_flat = idx.reshape(-1).astype(jnp.int32)              # 1-D for SMEM

    n_blk = _pick_block(N, n_blk_cap)
    nb = N // n_blk

    kern = functools.partial(_edgeconv_stats_kernel,
                             n_points=N, n_blk=n_blk, k_nbrs=K)
    flops = 2 * B * (G + N) * Cin * Cout + 6 * B * N * K * Cout
    bytes_accessed = (2 * (src_bf.size + xq_bf.size + wf_t.size + wd_t.size)
                      + 4 * idx_flat.size
                      + 4 * (2 * B * N * Cout + 2 * B * Cout))

    hi, lo, sum_pc, sq_pc = pl.pallas_call(
        kern,
        grid_spec=pltpu.PrefetchScalarGridSpec(
            num_scalar_prefetch=1,
            grid=(B, nb),
            in_specs=[
                # Source table: constant block over the N axis -> DMA'd once/batch.
                pl.BlockSpec((None, G, Cin), lambda b, n, _i: (b, 0, 0)),
                pl.BlockSpec((None, n_blk, Cin), lambda b, n, _i: (b, n, 0)),
                pl.BlockSpec((Cin, Cout), lambda b, n, _i: (0, 0)),
                pl.BlockSpec((Cin, Cout), lambda b, n, _i: (0, 0)),
            ],
            out_specs=[
                pl.BlockSpec((None, n_blk, Cout), lambda b, n, _i: (b, n, 0)),
                pl.BlockSpec((None, n_blk, Cout), lambda b, n, _i: (b, n, 0)),
                # Moment accumulators: same block across the N ("arbitrary") axis.
                pl.BlockSpec((None, 1, Cout), lambda b, n, _i: (b, 0, 0)),
                pl.BlockSpec((None, 1, Cout), lambda b, n, _i: (b, 0, 0)),
            ],
            scratch_shapes=[
                pltpu.VMEM((G, Cout), jnp.float32),       # projected source rows
                pltpu.VMEM((n_blk, Cout), jnp.float32),   # per-point sum
                pltpu.VMEM((n_blk, Cout), jnp.float32),   # per-point sumsq
            ],
        ),
        out_shape=(jax.ShapeDtypeStruct((B, N, Cout), jnp.float32),
                   jax.ShapeDtypeStruct((B, N, Cout), jnp.float32),
                   jax.ShapeDtypeStruct((B, 1, Cout), jnp.float32),
                   jax.ShapeDtypeStruct((B, 1, Cout), jnp.float32)),
        compiler_params=pltpu.CompilerParams(
            dimension_semantics=("parallel", "arbitrary"),
            vmem_limit_bytes=48 * 1024 * 1024),            # v7x: 64 MiB physical
        cost_estimate=pl.CostEstimate(flops=int(flops), transcendentals=0,
                                      bytes_accessed=int(bytes_accessed)),
    )(idx_flat, src_bf, xq_bf, wf_t, wd_t)

    # Tiny per-(batch, group) fold + affine: O(B*Cout) work, plain JAX.
    cg = Cout // num_groups
    cnt = float(cg * N * K)
    mean_g = sum_pc.reshape(B, num_groups, cg).sum(-1) / cnt          # [B, G_]
    var_g = jnp.maximum(
        sq_pc.reshape(B, num_groups, cg).sum(-1) / cnt - mean_g * mean_g, 0.0)
    inv_g = lax.rsqrt(var_g + eps)
    mean_c = jnp.repeat(mean_g, cg, axis=-1)                           # [B, Cout]
    inv_c = jnp.repeat(inv_g, cg, axis=-1)
    scale_c = gamma.astype(jnp.float32)[None, :] * inv_c
    shift_c = beta.astype(jnp.float32)[None, :] - mean_c * scale_c
    scale_c = scale_c.reshape(B, 1, Cout)
    shift_c = shift_c.reshape(B, 1, Cout)

    return pl.pallas_call(
        functools.partial(_groupnorm_leaky_kernel, slope=0.2),
        grid=(B, nb),
        in_specs=[
            pl.BlockSpec((None, n_blk, Cout), lambda b, n: (b, n, 0)),
            pl.BlockSpec((None, n_blk, Cout), lambda b, n: (b, n, 0)),
            pl.BlockSpec((None, 1, Cout), lambda b, n: (b, 0, 0)),
            pl.BlockSpec((None, 1, Cout), lambda b, n: (b, 0, 0)),
        ],
        out_specs=pl.BlockSpec((None, n_blk, Cout), lambda b, n: (b, n, 0)),
        out_shape=jax.ShapeDtypeStruct((B, N, Cout), out_dtype),
        compiler_params=pltpu.CompilerParams(
            dimension_semantics=("parallel", "parallel")),
    )(hi, lo, scale_c, shift_c)


# ---------------------------------------------------------------------------
# Plain-JAX glue: KNN indices (data-dependent top_k stays in XLA).
# ---------------------------------------------------------------------------
def _knn_indices(coor_k, coor_q, k):
    # coor_k: [B,3,G] support coords, coor_q: [B,3,N] query coords -> [B,N,k]
    assert k <= coor_k.shape[2], "k neighbors requested exceeds support set size"
    q2 = jnp.sum(coor_q * coor_q, axis=1)                       # [B,N]
    k2 = jnp.sum(coor_k * coor_k, axis=1)                       # [B,G]
    inner = jnp.einsum("bcn,bcg->bng", coor_q, coor_k)          # [B,N,G]
    dist = q2[:, :, None] + k2[:, None, :] - 2.0 * inner
    _, idx = lax.top_k(-dist, k)                                # k smallest dists
    return idx


@functools.partial(jax.jit, static_argnames=("k", "channels_first"))
def dgcnn_propagation(coor, f, coor_q, f_q, W1, g1, b1, W2, g2, b2, *, k=16,
                      channels_first=False):
    """coor [B,3,G], f [B,384,G], coor_q [B,3,N], f_q [B,384,N] -> [B,N,384]
    (channel-last, lane-dense; pass channels_first=True for the PyTorch layout)."""
    f_t = jnp.transpose(f, (0, 2, 1))                           # [B, G, 384]
    f_q_t = jnp.transpose(f_q, (0, 2, 1))                       # [B, N, 384]

    # Stage 1: neighbors taken from the coarse set (coor, f); bf16 hand-off.
    idx1 = _knn_indices(coor, coor_q, k)
    h_t = edgeconv_block(f_t, f_q_t, idx1, W1, g1, b1,
                         out_dtype=jnp.bfloat16)                # [B, N, 512] bf16

    # Stage 2: self-graph on the query set.
    idx2 = _knn_indices(coor_q, coor_q, k)
    out_t = edgeconv_block(h_t, h_t, idx2, W2, g2, b2,
                           out_dtype=jnp.float32)               # [B, N, 384]

    if channels_first:
        return jnp.transpose(out_t, (0, 2, 1))                  # [B, 384, N]
    return out_t


# ---------------------------------------------------------------------------
# Pure-JAX f32 reference (for a tolerance check of the kernel path).
# ---------------------------------------------------------------------------
def _edgeconv_ref(src_t, xq_t, idx, w, gamma, beta, num_groups=4, eps=1e-5):
    B, N, K = idx.shape
    Cout = w.shape[0]
    feat = jax.vmap(lambda xb, ib: xb[ib])(src_t, idx)          # [B,N,K,Cin]
    xq_e = xq_t[:, :, None, :]
    edge = jnp.concatenate([feat - xq_e, jnp.broadcast_to(xq_e, feat.shape)], -1)
    y = jnp.einsum("bnkc,oc->bnko", edge, w)                    # [B,N,K,Cout]
    yg = y.reshape(B, N, K, num_groups, Cout // num_groups)
    mean = yg.mean(axis=(1, 2, 4), keepdims=True)
    var = yg.var(axis=(1, 2, 4), keepdims=True)
    yn = ((yg - mean) / jnp.sqrt(var + eps)).reshape(B, N, K, Cout)
    yn = yn * gamma[None, None, None, :] + beta[None, None, None, :]
    yn = jnp.where(yn > 0, yn, 0.2 * yn)
    return yn.max(axis=2)                                       # [B,N,Cout]


def _dgcnn_propagation_ref(coor, f, coor_q, f_q, W1, g1, b1, W2, g2, b2, k=16):
    f_t = jnp.transpose(f, (0, 2, 1))
    f_q_t = jnp.transpose(f_q, (0, 2, 1))
    idx1 = _knn_indices(coor, coor_q, k)
    h = _edgeconv_ref(f_t, f_q_t, idx1, W1, g1, b1)
    idx2 = _knn_indices(coor_q, coor_q, k)
    return _edgeconv_ref(h, h, idx2, W2, g2, b2)


if __name__ == "__main__":
    key = jax.random.PRNGKey(0)
    ks = jax.random.split(key, 10)

    # Channels fixed by the module (384-ch features -> 768 into layer1, k=16);
    # N, G chosen >= k so both KNN graphs are well defined.
    B, C, G, N, K = 2, 384, 32, 16, 16

    coor = jax.random.normal(ks[0], (B, 3, G), jnp.float32)
    f = jax.random.normal(ks[1], (B, C, G), jnp.float32)
    coor_q = jax.random.normal(ks[2], (B, 3, N), jnp.float32)
    f_q = jax.random.normal(ks[3], (B, C, N), jnp.float32)

    # Deterministic synthetic parameters (no checkpoint load).
    W1 = 0.02 * jax.random.normal(ks[4], (512, 2 * C), jnp.float32)   # 768->512
    g1 = 1.0 + 0.01 * jax.random.normal(ks[5], (512,), jnp.float32)
    b1 = 0.01 * jax.random.normal(ks[6], (512,), jnp.float32)
    W2 = 0.02 * jax.random.normal(ks[7], (384, 1024), jnp.float32)    # 1024->384
    g2 = 1.0 + 0.01 * jax.random.normal(ks[8], (384,), jnp.float32)
    b2 = 0.01 * jax.random.normal(ks[9], (384,), jnp.float32)

    out = dgcnn_propagation(coor, f, coor_q, f_q, W1, g1, b1, W2, g2, b2, k=K)
    out = jax.block_until_ready(out)
    assert out.shape == (B, N, 384) and out.dtype == jnp.float32
    assert bool(jnp.all(jnp.isfinite(out)))

    # Tolerance check vs. a pure-f32 reference (bf16 MXU operands + bf16 stage-1
    # hand-off + one-pass variance -> compare to a loose absolute tolerance).
    ref = _dgcnn_propagation_ref(coor, f, coor_q, f_q, W1, g1, b1, W2, g2, b2, k=K)
    err = float(jnp.max(jnp.abs(out - ref)))
    assert err < 0.2, f"kernel vs reference mismatch: max|err|={err}"

    print("KERNEL_OK")
</pallas_src>

<mosaic_0001>
module attributes {stable_mosaic.version = 11 : i64} {
  func.func @_edgeconv_stats_kernel(%arg0: i32, %arg1: i32, %arg2: memref<512xi32, #tpu.memory_space<smem>>, %arg3: memref<1x32x384xbf16, #tpu.memory_space<vmem>>, %arg4: memref<1x16x384xbf16, #tpu.memory_space<vmem>>, %arg5: memref<384x512xbf16, #tpu.memory_space<vmem>>, %arg6: memref<384x512xbf16, #tpu.memory_space<vmem>>, %arg7: memref<1x16x512xf32, #tpu.memory_space<vmem>>, %arg8: memref<1x16x512xf32, #tpu.memory_space<vmem>>, %arg9: memref<1x1x512xf32, #tpu.memory_space<vmem>>, %arg10: memref<1x1x512xf32, #tpu.memory_space<vmem>>, %arg11: memref<32x512xf32, #tpu.memory_space<vmem>>, %arg12: memref<16x512xf32, #tpu.memory_space<vmem>>, %arg13: memref<16x512xf32, #tpu.memory_space<vmem>>) attributes {dimension_semantics = [#tpu.dimension_semantics<parallel>, #tpu.dimension_semantics<arbitrary>], iteration_bounds = array<i64: 2, 1>, scalar_prefetch = 1 : i64, scratch_operands = 3 : i64, tpu.core_type = #tpu.core_type<tc>, window_params = [{transform_indices = @transform_0, window_bounds = array<i64: 1, 32, 384>}, {transform_indices = @transform_1, window_bounds = array<i64: 1, 16, 384>}, {pipeline_mode = #tpu.pipeline_mode<synchronous>, transform_indices = @transform_2, window_bounds = array<i64: 384, 512>}, {pipeline_mode = #tpu.pipeline_mode<synchronous>, transform_indices = @transform_3, window_bounds = array<i64: 384, 512>}, {transform_indices = @transform_4, window_bounds = array<i64: 1, 16, 512>}, {transform_indices = @transform_5, window_bounds = array<i64: 1, 16, 512>}, {transform_indices = @transform_6, window_bounds = array<i64: 1, 1, 512>}, {transform_indices = @transform_7, window_bounds = array<i64: 1, 1, 512>}]} {
    %c0_i32 = arith.constant 0 : i32
    %0 = arith.cmpi eq, %arg1, %c0_i32 : i32
    %1 = arith.extui %0 : i1 to i32
    %c0_i32_0 = arith.constant 0 : i32
    %2 = arith.cmpi ne, %1, %c0_i32_0 : i32
    scf.if %2 {
      %c0_43 = arith.constant 0 : index
      %c0_44 = arith.constant 0 : index
      %c0_45 = arith.constant 0 : index
      %53 = vector.load %arg3[%c0_43, %c0_44, %c0_45] : memref<1x32x384xbf16, #tpu.memory_space<vmem>>, vector<1x32x384xbf16>
      %54 = vector.shape_cast %53 : vector<1x32x384xbf16> to vector<32x384xbf16>
      %c0_46 = arith.constant 0 : index
      %c0_47 = arith.constant 0 : index
      %55 = vector.load %arg5[%c0_46, %c0_47] : memref<384x512xbf16, #tpu.memory_space<vmem>>, vector<384x512xbf16>
      %cst_48 = arith.constant dense<0.000000e+00> : vector<32x512xf32>
      %56 = tpu.matmul %54, %55, %cst_48 {dimension_numbers = #tpu.dot_dimension_numbers<[1], [0], [0], [1], [0, 0, 1, 1], [], []>} : vector<32x384xbf16>, vector<384x512xbf16>, vector<32x512xf32> -> vector<32x512xf32>
      %c0_49 = arith.constant 0 : index
      %c0_50 = arith.constant 0 : index
      %57 = vector.load %arg11[%c0_49, %c0_50] : memref<32x512xf32, #tpu.memory_space<vmem>>, vector<32x512xf32>
      tpu.vector_store %arg11[%c0_49, %c0_50], %56 {strides = array<i32>} : memref<32x512xf32, #tpu.memory_space<vmem>>, vector<32x512xf32>,
      %cst_51 = arith.constant 0.000000e+00 : f32
      %58 = vector.broadcast %cst_51 : f32 to vector<1x512xf32>
      %c0_52 = arith.constant 0 : index
      %c0_53 = arith.constant 0 : index
      %c0_54 = arith.constant 0 : index
      %59 = vector.load %arg9[%c0_52, %c0_53, %c0_54] : memref<1x1x512xf32, #tpu.memory_space<vmem>>, vector<1x1x512xf32>
      %60 = vector.shape_cast %59 : vector<1x1x512xf32> to vector<1x512xf32>
      %61 = vector.shape_cast %58 : vector<1x512xf32> to vector<1x1x512xf32>
      tpu.vector_store %arg9[%c0_52, %c0_53, %c0_54], %61 {strides = array<i32>} : memref<1x1x512xf32, #tpu.memory_space<vmem>>, vector<1x1x512xf32>,
      %cst_55 = arith.constant 0.000000e+00 : f32
      %62 = vector.broadcast %cst_55 : f32 to vector<1x512xf32>
      %c0_56 = arith.constant 0 : index
      %c0_57 = arith.constant 0 : index
      %c0_58 = arith.constant 0 : index
      %63 = vector.load %arg10[%c0_56, %c0_57, %c0_58] : memref<1x1x512xf32, #tpu.memory_space<vmem>>, vector<1x1x512xf32>
      %64 = vector.shape_cast %63 : vector<1x1x512xf32> to vector<1x512xf32>
      %65 = vector.shape_cast %62 : vector<1x512xf32> to vector<1x1x512xf32>
      tpu.vector_store %arg10[%c0_56, %c0_57, %c0_58], %65 {strides = array<i32>} : memref<1x1x512xf32, #tpu.memory_space<vmem>>, vector<1x1x512xf32>,
    } else {
    }
    %c16_i32 = arith.constant 16 : i32
    %3 = arith.muli %arg0, %c16_i32 : i32
    %c16_i32_1 = arith.constant 16 : i32
    %4 = arith.muli %arg1, %c16_i32_1 : i32
    %5 = arith.addi %3, %4 : i32
    %c16_i32_2 = arith.constant 16 : i32
    %6 = arith.muli %5, %c16_i32_2 : i32
    %c0_i32_3 = arith.constant 0 : i32
    %c16_i32_4 = arith.constant 16 : i32
    %7 = arith.addi %c0_i32_3, %c16_i32_4 : i32
    %c1_i32 = arith.constant 1 : i32
    scf.for %arg14 = %c0_i32_3 to %7 step %c1_i32  : i32 {
      %c16_i32_43 = arith.constant 16 : i32
      %53 = arith.muli %arg14, %c16_i32_43 : i32
      %54 = arith.addi %6, %53 : i32
      %55 = arith.index_cast %54 : i32 to index
      %56 = memref.load %arg2[%55] : memref<512xi32, #tpu.memory_space<smem>>
      %57 = arith.index_cast %56 : i32 to index
      %c0_44 = arith.constant 0 : index
      %58 = vector.load %arg11[%57, %c0_44] : memref<32x512xf32, #tpu.memory_space<vmem>>, vector<1x512xf32>
      %59 = arith.mulf %58, %58 : vector<1x512xf32>
      %c1_i32_45 = arith.constant 1 : i32
      %60 = arith.addi %54, %c1_i32_45 : i32
      %61 = arith.index_cast %60 : i32 to index
      %62 = memref.load %arg2[%61] : memref<512xi32, #tpu.memory_space<smem>>
      %63 = arith.index_cast %62 : i32 to index
      %c0_46 = arith.constant 0 : index
      %64 = vector.load %arg11[%63, %c0_46] : memref<32x512xf32, #tpu.memory_space<vmem>>, vector<1x512xf32>
      %65 = arith.maximumf %58, %64 : vector<1x512xf32>
      %66 = arith.minimumf %58, %64 : vector<1x512xf32>
      %67 = arith.addf %58, %64 : vector<1x512xf32>
      %68 = arith.mulf %64, %64 : vector<1x512xf32>
      %69 = arith.addf %59, %68 : vector<1x512xf32>
      %c2_i32 = arith.constant 2 : i32
      %70 = arith.addi %54, %c2_i32 : i32
      %71 = arith.index_cast %70 : i32 to index
      %72 = memref.load %arg2[%71] : memref<512xi32, #tpu.memory_space<smem>>
      %73 = arith.index_cast %72 : i32 to index
      %c0_47 = arith.constant 0 : index
      %74 = vector.load %arg11[%73, %c0_47] : memref<32x512xf32, #tpu.memory_space<vmem>>, vector<1x512xf32>
      %75 = arith.maximumf %65, %74 : vector<1x512xf32>
      %76 = arith.minimumf %66, %74 : vector<1x512xf32>
      %77 = arith.addf %67, %74 : vector<1x512xf32>
      %78 = arith.mulf %74, %74 : vector<1x512xf32>
      %79 = arith.addf %69, %78 : vector<1x512xf32>
      %c3_i32 = arith.constant 3 : i32
      %80 = arith.addi %54, %c3_i32 : i32
      %81 = arith.index_cast %80 : i32 to index
      %82 = memref.load %arg2[%81] : memref<512xi32, #tpu.memory_space<smem>>
      %83 = arith.index_cast %82 : i32 to index
      %c0_48 = arith.constant 0 : index
      %84 = vector.load %arg11[%83, %c0_48] : memref<32x512xf32, #tpu.memory_space<vmem>>, vector<1x512xf32>
      %85 = arith.maximumf %75, %84 : vector<1x512xf32>
      %86 = arith.minimumf %76, %84 : vector<1x512xf32>
      %87 = arith.addf %77, %84 : vector<1x512xf32>
      %88 = arith.mulf %84, %84 : vector<1x512xf32>
      %89 = arith.addf %79, %88 : vector<1x512xf32>
      %c4_i32 = arith.constant 4 : i32
      %90 = arith.addi %54, %c4_i32 : i32
      %91 = arith.index_cast %90 : i32 to index
      %92 = memref.load %arg2[%91] : memref<512xi32, #tpu.memory_space<smem>>
      %93 = arith.index_cast %92 : i32 to index
      %c0_49 = arith.constant 0 : index
      %94 = vector.load %arg11[%93, %c0_49] : memref<32x512xf32, #tpu.memory_space<vmem>>, vector<1x512xf32>
      %95 = arith.maximumf %85, %94 : vector<1x512xf32>
      %96 = arith.minimumf %86, %94 : vector<1x512xf32>
      %97 = arith.addf %87, %94 : vector<1x512xf32>
      %98 = arith.mulf %94, %94 : vector<1x512xf32>
      %99 = arith.addf %89, %98 : vector<1x512xf32>
      %c5_i32 = arith.constant 5 : i32
      %100 = arith.addi %54, %c5_i32 : i32
      %101 = arith.index_cast %100 : i32 to index
      %102 = memref.load %arg2[%101] : memref<512xi32, #tpu.memory_space<smem>>
      %103 = arith.index_cast %102 : i32 to index
      %c0_50 = arith.constant 0 : index
      %104 = vector.load %arg11[%103, %c0_50] : memref<32x512xf32, #tpu.memory_space<vmem>>, vector<1x512xf32>
      %105 = arith.maximumf %95, %104 : vector<1x512xf32>
      %106 = arith.minimumf %96, %104 : vector<1x512xf32>
      %107 = arith.addf %97, %104 : vector<1x512xf32>
      %108 = arith.mulf %104, %104 : vector<1x512xf32>
      %109 = arith.addf %99, %108 : vector<1x512xf32>
      %c6_i32 = arith.constant 6 : i32
      %110 = arith.addi %54, %c6_i32 : i32
      %111 = arith.index_cast %110 : i32 to index
      %112 = memref.load %arg2[%111] : memref<512xi32, #tpu.memory_space<smem>>
      %113 = arith.index_cast %112 : i32 to index
      %c0_51 = arith.constant 0 : index
      %114 = vector.load %arg11[%113, %c0_51] : memref<32x512xf32, #tpu.memory_space<vmem>>, vector<1x512xf32>
      %115 = arith.maximumf %105, %114 : vector<1x512xf32>
      %116 = arith.minimumf %106, %114 : vector<1x512xf32>
      %117 = arith.addf %107, %114 : vector<1x512xf32>
      %118 = arith.mulf %114, %114 : vector<1x512xf32>
      %119 = arith.addf %109, %118 : vector<1x512xf32>
      %c7_i32 = arith.constant 7 : i32
      %120 = arith.addi %54, %c7_i32 : i32
      %121 = arith.index_cast %120 : i32 to index
      %122 = memref.load %arg2[%121] : memref<512xi32, #tpu.memory_space<smem>>
      %123 = arith.index_cast %122 : i32 to index
      %c0_52 = arith.constant 0 : index
      %124 = vector.load %arg11[%123, %c0_52] : memref<32x512xf32, #tpu.memory_space<vmem>>, vector<1x512xf32>
      %125 = arith.maximumf %115, %124 : vector<1x512xf32>
      %126 = arith.minimumf %116, %124 : vector<1x512xf32>
      %127 = arith.addf %117, %124 : vector<1x512xf32>
      %128 = arith.mulf %124, %124 : vector<1x512xf32>
      %129 = arith.addf %119, %128 : vector<1x512xf32>
      %c8_i32 = arith.constant 8 : i32
      %130 = arith.addi %54, %c8_i32 : i32
      %131 = arith.index_cast %130 : i32 to index
      %132 = memref.load %arg2[%131] : memref<512xi32, #tpu.memory_space<smem>>
      %133 = arith.index_cast %132 : i32 to index
      %c0_53 = arith.constant 0 : index
      %134 = vector.load %arg11[%133, %c0_53] : memref<32x512xf32, #tpu.memory_space<vmem>>, vector<1x512xf32>
      %135 = arith.maximumf %125, %134 : vector<1x512xf32>
      %136 = arith.minimumf %126, %134 : vector<1x512xf32>
      %137 = arith.addf %127, %134 : vector<1x512xf32>
      %138 = arith.mulf %134, %134 : vector<1x512xf32>
      %139 = arith.addf %129, %138 : vector<1x512xf32>
      %c9_i32 = arith.constant 9 : i32
      %140 = arith.addi %54, %c9_i32 : i32
      %141 = arith.index_cast %140 : i32 to index
      %142 = memref.load %arg2[%141] : memref<512xi32, #tpu.memory_space<smem>>
      %143 = arith.index_cast %142 : i32 to index
      %c0_54 = arith.constant 0 : index
      %144 = vector.load %arg11[%143, %c0_54] : memref<32x512xf32, #tpu.memory_space<vmem>>, vector<1x512xf32>
      %145 = arith.maximumf %135, %144 : vector<1x512xf32>
      %146 = arith.minimumf %136, %144 : vector<1x512xf32>
      %147 = arith.addf %137, %144 : vector<1x512xf32>
      %148 = arith.mulf %144, %144 : vector<1x512xf32>
      %149 = arith.addf %139, %148 : vector<1x512xf32>
      %c10_i32 = arith.constant 10 : i32
      %150 = arith.addi %54, %c10_i32 : i32
      %151 = arith.index_cast %150 : i32 to index
      %152 = memref.load %arg2[%151] : memref<512xi32, #tpu.memory_space<smem>>
      %153 = arith.index_cast %152 : i32 to index
      %c0_55 = arith.constant 0 : index
      %154 = vector.load %arg11[%153, %c0_55] : memref<32x512xf32, #tpu.memory_space<vmem>>, vector<1x512xf32>
      %155 = arith.maximumf %145, %154 : vector<1x512xf32>
      %156 = arith.minimumf %146, %154 : vector<1x512xf32>
      %157 = arith.addf %147, %154 : vector<1x512xf32>
      %158 = arith.mulf %154, %154 : vector<1x512xf32>
      %159 = arith.addf %149, %158 : vector<1x512xf32>
      %c11_i32 = arith.constant 11 : i32
      %160 = arith.addi %54, %c11_i32 : i32
      %161 = arith.index_cast %160 : i32 to index
      %162 = memref.load %arg2[%161] : memref<512xi32, #tpu.memory_space<smem>>
      %163 = arith.index_cast %162 : i32 to index
      %c0_56 = arith.constant 0 : index
      %164 = vector.load %arg11[%163, %c0_56] : memref<32x512xf32, #tpu.memory_space<vmem>>, vector<1x512xf32>
      %165 = arith.maximumf %155, %164 : vector<1x512xf32>
      %166 = arith.minimumf %156, %164 : vector<1x512xf32>
      %167 = arith.addf %157, %164 : vector<1x512xf32>
      %168 = arith.mulf %164, %164 : vector<1x512xf32>
      %169 = arith.addf %159, %168 : vector<1x512xf32>
      %c12_i32 = arith.constant 12 : i32
      %170 = arith.addi %54, %c12_i32 : i32
      %171 = arith.index_cast %170 : i32 to index
      %172 = memref.load %arg2[%171] : memref<512xi32, #tpu.memory_space<smem>>
      %173 = arith.index_cast %172 : i32 to index
      %c0_57 = arith.constant 0 : index
      %174 = vector.load %arg11[%173, %c0_57] : memref<32x512xf32, #tpu.memory_space<vmem>>, vector<1x512xf32>
      %175 = arith.maximumf %165, %174 : vector<1x512xf32>
      %176 = arith.minimumf %166, %174 : vector<1x512xf32>
      %177 = arith.addf %167, %174 : vector<1x512xf32>
      %178 = arith.mulf %174, %174 : vector<1x512xf32>
      %179 = arith.addf %169, %178 : vector<1x512xf32>
      %c13_i32 = arith.constant 13 : i32
      %180 = arith.addi %54, %c13_i32 : i32
      %181 = arith.index_cast %180 : i32 to index
      %182 = memref.load %arg2[%181] : memref<512xi32, #tpu.memory_space<smem>>
      %183 = arith.index_cast %182 : i32 to index
      %c0_58 = arith.constant 0 : index
      %184 = vector.load %arg11[%183, %c0_58] : memref<32x512xf32, #tpu.memory_space<vmem>>, vector<1x512xf32>
      %185 = arith.maximumf %175, %184 : vector<1x512xf32>
      %186 = arith.minimumf %176, %184 : vector<1x512xf32>
      %187 = arith.addf %177, %184 : vector<1x512xf32>
      %188 = arith.mulf %184, %184 : vector<1x512xf32>
      %189 = arith.addf %179, %188 : vector<1x512xf32>
      %c14_i32 = arith.constant 14 : i32
      %190 = arith.addi %54, %c14_i32 : i32
      %191 = arith.index_cast %190 : i32 to index
      %192 = memref.load %arg2[%191] : memref<512xi32, #tpu.memory_space<smem>>
      %193 = arith.index_cast %192 : i32 to index
      %c0_59 = arith.constant 0 : index
      %194 = vector.load %arg11[%193, %c0_59] : memref<32x512xf32, #tpu.memory_space<vmem>>, vector<1x512xf32>
      %195 = arith.maximumf %185, %194 : vector<1x512xf32>
      %196 = arith.minimumf %186, %194 : vector<1x512xf32>
      %197 = arith.addf %187, %194 : vector<1x512xf32>
      %198 = arith.mulf %194, %194 : vector<1x512xf32>
      %199 = arith.addf %189, %198 : vector<1x512xf32>
      %c15_i32 = arith.constant 15 : i32
      %200 = arith.addi %54, %c15_i32 : i32
      %201 = arith.index_cast %200 : i32 to index
      %202 = memref.load %arg2[%201] : memref<512xi32, #tpu.memory_space<smem>>
      %203 = arith.index_cast %202 : i32 to index
      %c0_60 = arith.constant 0 : index
      %204 = vector.load %arg11[%203, %c0_60] : memref<32x512xf32, #tpu.memory_space<vmem>>, vector<1x512xf32>
      %205 = arith.maximumf %195, %204 : vector<1x512xf32>
      %206 = arith.minimumf %196, %204 : vector<1x512xf32>
      %207 = arith.addf %197, %204 : vector<1x512xf32>
      %208 = arith.mulf %204, %204 : vector<1x512xf32>
      %209 = arith.addf %199, %208 : vector<1x512xf32>
      %c0_61 = arith.constant 0 : index
      %210 = arith.index_cast %arg14 : i32 to index
      %c0_62 = arith.constant 0 : index
      %211 = vector.load %arg7[%c0_61, %210, %c0_62] : memref<1x16x512xf32, #tpu.memory_space<vmem>>, vector<1x1x512xf32>
      %212 = vector.shape_cast %211 : vector<1x1x512xf32> to vector<1x512xf32>
      %213 = vector.shape_cast %205 : vector<1x512xf32> to vector<1x1x512xf32>
      tpu.vector_store %arg7[%c0_61, %210, %c0_62], %213 {strides = array<i32>} : memref<1x16x512xf32, #tpu.memory_space<vmem>>, vector<1x1x512xf32>,
      %c0_63 = arith.constant 0 : index
      %214 = arith.index_cast %arg14 : i32 to index
      %c0_64 = arith.constant 0 : index
      %215 = vector.load %arg8[%c0_63, %214, %c0_64] : memref<1x16x512xf32, #tpu.memory_space<vmem>>, vector<1x1x512xf32>
      %216 = vector.shape_cast %215 : vector<1x1x512xf32> to vector<1x512xf32>
      %217 = vector.shape_cast %206 : vector<1x512xf32> to vector<1x1x512xf32>
      tpu.vector_store %arg8[%c0_63, %214, %c0_64], %217 {strides = array<i32>} : memref<1x16x512xf32, #tpu.memory_space<vmem>>, vector<1x1x512xf32>,
      %218 = arith.index_cast %arg14 : i32 to index
      %c0_65 = arith.constant 0 : index
      %219 = vector.load %arg12[%218, %c0_65] : memref<16x512xf32, #tpu.memory_space<vmem>>, vector<1x512xf32>
      tpu.vector_store %arg12[%218, %c0_65], %207 {strides = array<i32>} : memref<16x512xf32, #tpu.memory_space<vmem>>, vector<1x512xf32>,
      %220 = arith.index_cast %arg14 : i32 to index
      %c0_66 = arith.constant 0 : index
      %221 = vector.load %arg13[%220, %c0_66] : memref<16x512xf32, #tpu.memory_space<vmem>>, vector<1x512xf32>
      tpu.vector_store %arg13[%220, %c0_66], %209 {strides = array<i32>} : memref<16x512xf32, #tpu.memory_space<vmem>>, vector<1x512xf32>,
    }
    %c16_i32_5 = arith.constant 16 : i32
    %c0 = arith.constant 0 : index
    %c0_6 = arith.constant 0 : index
    %c0_7 = arith.constant 0 : index
    %8 = vector.load %arg4[%c0, %c0_6, %c0_7] : memref<1x16x384xbf16, #tpu.memory_space<vmem>>, vector<1x16x384xbf16>
    %9 = vector.shape_cast %8 : vector<1x16x384xbf16> to vector<16x384xbf16>
    %c0_8 = arith.constant 0 : index
    %c0_9 = arith.constant 0 : index
    %10 = vector.load %arg6[%c0_8, %c0_9] : memref<384x512xbf16, #tpu.memory_space<vmem>>, vector<384x512xbf16>
    %cst = arith.constant dense<0.000000e+00> : vector<16x512xf32>
    %11 = tpu.matmul %9, %10, %cst {dimension_numbers = #tpu.dot_dimension_numbers<[1], [0], [0], [1], [0, 0, 1, 1], [], []>} : vector<16x384xbf16>, vector<384x512xbf16>, vector<16x512xf32> -> vector<16x512xf32>
    %c0_10 = arith.constant 0 : index
    %c0_11 = arith.constant 0 : index
    %12 = vector.load %arg12[%c0_10, %c0_11] : memref<16x512xf32, #tpu.memory_space<vmem>>, vector<16x512xf32>
    %c0_12 = arith.constant 0 : index
    %c0_13 = arith.constant 0 : index
    %c0_14 = arith.constant 0 : index
    %13 = vector.load %arg7[%c0_12, %c0_13, %c0_14] : memref<1x16x512xf32, #tpu.memory_space<vmem>>, vector<1x16x512xf32>
    %14 = vector.shape_cast %13 : vector<1x16x512xf32> to vector<16x512xf32>
    %15 = arith.addf %14, %11 : vector<16x512xf32>
    %c0_15 = arith.constant 0 : index
    %c0_16 = arith.constant 0 : index
    %c0_17 = arith.constant 0 : index
    %16 = vector.load %arg7[%c0_15, %c0_16, %c0_17] : memref<1x16x512xf32, #tpu.memory_space<vmem>>, vector<1x16x512xf32>
    %17 = vector.shape_cast %16 : vector<1x16x512xf32> to vector<16x512xf32>
    %18 = vector.shape_cast %15 : vector<16x512xf32> to vector<1x16x512xf32>
    tpu.vector_store %arg7[%c0_15, %c0_16, %c0_17], %18 {strides = array<i32>} : memref<1x16x512xf32, #tpu.memory_space<vmem>>, vector<1x16x512xf32>,
    %c0_18 = arith.constant 0 : index
    %c0_19 = arith.constant 0 : index
    %c0_20 = arith.constant 0 : index
    %19 = vector.load %arg8[%c0_18, %c0_19, %c0_20] : memref<1x16x512xf32, #tpu.memory_space<vmem>>, vector<1x16x512xf32>
    %20 = vector.shape_cast %19 : vector<1x16x512xf32> to vector<16x512xf32>
    %21 = arith.addf %20, %11 : vector<16x512xf32>
    %c0_21 = arith.constant 0 : index
    %c0_22 = arith.constant 0 : index
    %c0_23 = arith.constant 0 : index
    %22 = vector.load %arg8[%c0_21, %c0_22, %c0_23] : memref<1x16x512xf32, #tpu.memory_space<vmem>>, vector<1x16x512xf32>
    %23 = vector.shape_cast %22 : vector<1x16x512xf32> to vector<16x512xf32>
    %24 = vector.shape_cast %21 : vector<16x512xf32> to vector<1x16x512xf32>
    tpu.vector_store %arg8[%c0_21, %c0_22, %c0_23], %24 {strides = array<i32>} : memref<1x16x512xf32, #tpu.memory_space<vmem>>, vector<1x16x512xf32>,
    %cst_24 = arith.constant 1.600000e+01 : f32
    %25 = vector.broadcast %cst_24 : f32 to vector<16x512xf32>
    %26 = arith.mulf %25, %11 : vector<16x512xf32>
    %27 = arith.addf %12, %26 : vector<16x512xf32>
    %c0_25 = arith.constant 0 : index
    %c0_26 = arith.constant 0 : index
    %28 = vector.load %arg13[%c0_25, %c0_26] : memref<16x512xf32, #tpu.memory_space<vmem>>, vector<16x512xf32>
    %cst_27 = arith.constant 2.000000e+00 : f32
    %29 = vector.broadcast %cst_27 : f32 to vector<16x512xf32>
    %30 = arith.mulf %29, %11 : vector<16x512xf32>
    %31 = arith.mulf %30, %12 : vector<16x512xf32>
    %32 = arith.addf %28, %31 : vector<16x512xf32>
    %33 = arith.mulf %11, %11 : vector<16x512xf32>
    %cst_28 = arith.constant 1.600000e+01 : f32
    %34 = vector.broadcast %cst_28 : f32 to vector<16x512xf32>
    %35 = arith.mulf %34, %33 : vector<16x512xf32>
    %36 = arith.addf %32, %35 : vector<16x512xf32>
    %c0_29 = arith.constant 0 : index
    %c0_30 = arith.constant 0 : index
    %c0_31 = arith.constant 0 : index
    %37 = vector.load %arg9[%c0_29, %c0_30, %c0_31] : memref<1x1x512xf32, #tpu.memory_space<vmem>>, vector<1x1x512xf32>
    %38 = vector.shape_cast %37 : vector<1x1x512xf32> to vector<1x512xf32>
    %cst_32 = arith.constant dense<0.000000e+00> : vector<512xf32>
    %39 = vector.multi_reduction <add>, %27, %cst_32 [0] : vector<16x512xf32> to vector<512xf32>
    %40 = vector.shape_cast %39 : vector<512xf32> to vector<1x512xf32>
    %41 = arith.addf %38, %40 : vector<1x512xf32>
    %c0_33 = arith.constant 0 : index
    %c0_34 = arith.constant 0 : index
    %c0_35 = arith.constant 0 : index
    %42 = vector.load %arg9[%c0_33, %c0_34, %c0_35] : memref<1x1x512xf32, #tpu.memory_space<vmem>>, vector<1x1x512xf32>
    %43 = vector.shape_cast %42 : vector<1x1x512xf32> to vector<1x512xf32>
    %44 = vector.shape_cast %41 : vector<1x512xf32> to vector<1x1x512xf32>
    tpu.vector_store %arg9[%c0_33, %c0_34, %c0_35], %44 {strides = array<i32>} : memref<1x1x512xf32, #tpu.memory_space<vmem>>, vector<1x1x512xf32>,
    %c0_36 = arith.constant 0 : index
    %c0_37 = arith.constant 0 : index
    %c0_38 = arith.constant 0 : index
    %45 = vector.load %arg10[%c0_36, %c0_37, %c0_38] : memref<1x1x512xf32, #tpu.memory_space<vmem>>, vector<1x1x512xf32>
    %46 = vector.shape_cast %45 : vector<1x1x512xf32> to vector<1x512xf32>
    %cst_39 = arith.constant dense<0.000000e+00> : vector<512xf32>
    %47 = vector.multi_reduction <add>, %36, %cst_39 [0] : vector<16x512xf32> to vector<512xf32>
    %48 = vector.shape_cast %47 : vector<512xf32> to vector<1x512xf32>
    %49 = arith.addf %46, %48 : vector<1x512xf32>
    %c0_40 = arith.constant 0 : index
    %c0_41 = arith.constant 0 : index
    %c0_42 = arith.constant 0 : index
    %50 = vector.load %arg10[%c0_40, %c0_41, %c0_42] : memref<1x1x512xf32, #tpu.memory_space<vmem>>, vector<1x1x512xf32>
    %51 = vector.shape_cast %50 : vector<1x1x512xf32> to vector<1x512xf32>
    %52 = vector.shape_cast %49 : vector<1x512xf32> to vector<1x1x512xf32>
    tpu.vector_store %arg10[%c0_40, %c0_41, %c0_42], %52 {strides = array<i32>} : memref<1x1x512xf32, #tpu.memory_space<vmem>>, vector<1x1x512xf32>,
    return
  }
  func.func @transform_0(%arg0: i32, %arg1: i32, %arg2: memref<512xi32, #tpu.memory_space<smem>>) -> (i32, i32, i32) {
    %c0_i32 = arith.constant 0 : i32
    %c0_i32_0 = arith.constant 0 : i32
    %c0_i32_1 = arith.constant 0 : i32
    return %arg0, %c0_i32, %c0_i32_0 : i32, i32, i32
  }
  func.func @transform_1(%arg0: i32, %arg1: i32, %arg2: memref<512xi32, #tpu.memory_space<smem>>) -> (i32, i32, i32) {
    %c0_i32 = arith.constant 0 : i32
    %c0_i32_0 = arith.constant 0 : i32
    return %arg0, %arg1, %c0_i32 : i32, i32, i32
  }
  func.func @transform_2(%arg0: i32, %arg1: i32, %arg2: memref<512xi32, #tpu.memory_space<smem>>) -> (i32, i32) {
    %c0_i32 = arith.constant 0 : i32
    %c0_i32_0 = arith.constant 0 : i32
    %c0_i32_1 = arith.constant 0 : i32
    return %c0_i32, %c0_i32_0 : i32, i32
  }
  func.func @transform_3(%arg0: i32, %arg1: i32, %arg2: memref<512xi32, #tpu.memory_space<smem>>) -> (i32, i32) {
    %c0_i32 = arith.constant 0 : i32
    %c0_i32_0 = arith.constant 0 : i32
    %c0_i32_1 = arith.constant 0 : i32
    return %c0_i32, %c0_i32_0 : i32, i32
  }
  func.func @transform_4(%arg0: i32, %arg1: i32, %arg2: memref<512xi32, #tpu.memory_space<smem>>) -> (i32, i32, i32) {
    %c0_i32 = arith.constant 0 : i32
    %c0_i32_0 = arith.constant 0 : i32
    return %arg0, %arg1, %c0_i32 : i32, i32, i32
  }
  func.func @transform_5(%arg0: i32, %arg1: i32, %arg2: memref<512xi32, #tpu.memory_space<smem>>) -> (i32, i32, i32) {
    %c0_i32 = arith.constant 0 : i32
    %c0_i32_0 = arith.constant 0 : i32
    return %arg0, %arg1, %c0_i32 : i32, i32, i32
  }
  func.func @transform_6(%arg0: i32, %arg1: i32, %arg2: memref<512xi32, #tpu.memory_space<smem>>) -> (i32, i32, i32) {
    %c0_i32 = arith.constant 0 : i32
    %c0_i32_0 = arith.constant 0 : i32
    %c0_i32_1 = arith.constant 0 : i32
    return %arg0, %c0_i32, %c0_i32_0 : i32, i32, i32
  }
  func.func @transform_7(%arg0: i32, %arg1: i32, %arg2: memref<512xi32, #tpu.memory_space<smem>>) -> (i32, i32, i32) {
    %c0_i32 = arith.constant 0 : i32
    %c0_i32_0 = arith.constant 0 : i32
    %c0_i32_1 = arith.constant 0 : i32
    return %arg0, %c0_i32, %c0_i32_0 : i32, i32, i32
  }
}

module attributes {stable_mosaic.version = 11 : i64} {
  func.func @_groupnorm_leaky_kernel(%arg0: i32, %arg1: i32, %arg2: memref<1x16x512xf32, #tpu.memory_space<vmem>>, %arg3: memref<1x16x512xf32, #tpu.memory_space<vmem>>, %arg4: memref<1x1x512xf32, #tpu.memory_space<vmem>>, %arg5: memref<1x1x512xf32, #tpu.memory_space<vmem>>, %arg6: memref<1x16x512xbf16, #tpu.memory_space<vmem>>) attributes {dimension_semantics = [#tpu.dimension_semantics<parallel>, #tpu.dimension_semantics<parallel>], iteration_bounds = array<i64: 2, 1>, scalar_prefetch = 0 : i64, scratch_operands = 0 : i64, tpu.core_type = #tpu.core_type<tc>, window_params = [{transform_indices = @transform_0, window_bounds = array<i64: 1, 16, 512>}, {transform_indices = @transform_1, window_bounds = array<i64: 1, 16, 512>}, {transform_indices = @transform_2, window_bounds = array<i64: 1, 1, 512>}, {transform_indices = @transform_3, window_bounds = array<i64: 1, 1, 512>}, {transform_indices = @transform_4, window_bounds = array<i64: 1, 16, 512>}]} {
    %c0 = arith.constant 0 : index
    %c0_0 = arith.constant 0 : index
    %c0_1 = arith.constant 0 : index
    %0 = vector.load %arg4[%c0, %c0_0, %c0_1] : memref<1x1x512xf32, #tpu.memory_space<vmem>>, vector<1x1x512xf32>
    %1 = vector.shape_cast %0 : vector<1x1x512xf32> to vector<1x512xf32>
    %c0_2 = arith.constant 0 : index
    %c0_3 = arith.constant 0 : index
    %c0_4 = arith.constant 0 : index
    %2 = vector.load %arg5[%c0_2, %c0_3, %c0_4] : memref<1x1x512xf32, #tpu.memory_space<vmem>>, vector<1x1x512xf32>
    %3 = vector.shape_cast %2 : vector<1x1x512xf32> to vector<1x512xf32>
    %cst = arith.constant 0.000000e+00 : f32
    %4 = vector.broadcast %cst : f32 to vector<1x512xf32>
    %5 = arith.cmpf oge, %1, %4 : vector<1x512xf32>
    %c0_5 = arith.constant 0 : index
    %c0_6 = arith.constant 0 : index
    %c0_7 = arith.constant 0 : index
    %6 = vector.load %arg2[%c0_5, %c0_6, %c0_7] : memref<1x16x512xf32, #tpu.memory_space<vmem>>, vector<1x16x512xf32>
    %7 = vector.shape_cast %6 : vector<1x16x512xf32> to vector<16x512xf32>
    %c0_8 = arith.constant 0 : index
    %c0_9 = arith.constant 0 : index
    %c0_10 = arith.constant 0 : index
    %8 = vector.load %arg3[%c0_8, %c0_9, %c0_10] : memref<1x16x512xf32, #tpu.memory_space<vmem>>, vector<1x16x512xf32>
    %9 = vector.shape_cast %8 : vector<1x16x512xf32> to vector<16x512xf32>
    %10 = vector.shape_cast %5 : vector<1x512xi1> to vector<1x512xi1>
    %11 = vector.broadcast %10 : vector<1x512xi1> to vector<16x512xi1>
    %12 = arith.select %11, %7, %9 : vector<16x512xi1>, vector<16x512xf32>
    %13 = vector.broadcast %1 : vector<1x512xf32> to vector<16x512xf32>
    %14 = arith.mulf %12, %13 : vector<16x512xf32>
    %15 = vector.broadcast %3 : vector<1x512xf32> to vector<16x512xf32>
    %16 = arith.addf %14, %15 : vector<16x512xf32>
    %cst_11 = arith.constant 0.000000e+00 : f32
    %17 = vector.broadcast %cst_11 : f32 to vector<16x512xf32>
    %18 = arith.cmpf ogt, %16, %17 : vector<16x512xf32>
    %cst_12 = arith.constant 2.000000e-01 : f32
    %19 = vector.broadcast %cst_12 : f32 to vector<16x512xf32>
    %20 = arith.mulf %19, %16 : vector<16x512xf32>
    %21 = arith.select %18, %16, %20 : vector<16x512xi1>, vector<16x512xf32>
    %22 = arith.truncf %21 : vector<16x512xf32> to vector<16x512xbf16>
    %c0_13 = arith.constant 0 : index
    %c0_14 = arith.constant 0 : index
    %c0_15 = arith.constant 0 : index
    %23 = vector.load %arg6[%c0_13, %c0_14, %c0_15] : memref<1x16x512xbf16, #tpu.memory_space<vmem>>, vector<1x16x512xbf16>
    %24 = vector.shape_cast %23 : vector<1x16x512xbf16> to vector<16x512xbf16>
    %25 = vector.shape_cast %22 : vector<16x512xbf16> to vector<1x16x512xbf16>
    tpu.vector_store %arg6[%c0_13, %c0_14, %c0_15], %25 {strides = array<i32>} : memref<1x16x512xbf16, #tpu.memory_space<vmem>>, vector<1x16x512xbf16>,
    return
  }
  func.func @transform_0(%arg0: i32, %arg1: i32) -> (i32, i32, i32) {
    %c0_i32 = arith.constant 0 : i32
    %c0_i32_0 = arith.constant 0 : i32
    return %arg0, %arg1, %c0_i32 : i32, i32, i32
  }
  func.func @transform_1(%arg0: i32, %arg1: i32) -> (i32, i32, i32) {
    %c0_i32 = arith.constant 0 : i32
    %c0_i32_0 = arith.constant 0 : i32
    return %arg0, %arg1, %c0_i32 : i32, i32, i32
  }
  func.func @transform_2(%arg0: i32, %arg1: i32) -> (i32, i32, i32) {
    %c0_i32 = arith.constant 0 : i32
    %c0_i32_0 = arith.constant 0 : i32
    %c0_i32_1 = arith.constant 0 : i32
    return %arg0, %c0_i32, %c0_i32_0 : i32, i32, i32
  }
  func.func @transform_3(%arg0: i32, %arg1: i32) -> (i32, i32, i32) {
    %c0_i32 = arith.constant 0 : i32
    %c0_i32_0 = arith.constant 0 : i32
    %c0_i32_1 = arith.constant 0 : i32
    return %arg0, %c0_i32, %c0_i32_0 : i32, i32, i32
  }
  func.func @transform_4(%arg0: i32, %arg1: i32) -> (i32, i32, i32) {
    %c0_i32 = arith.constant 0 : i32
    %c0_i32_0 = arith.constant 0 : i32
    return %arg0, %arg1, %c0_i32 : i32, i32, i32
  }
}

module attributes {stable_mosaic.version = 11 : i64} {
  func.func @_edgeconv_stats_kernel(%arg0: i32, %arg1: i32, %arg2: memref<512xi32, #tpu.memory_space<smem>>, %arg3: memref<1x16x512xbf16, #tpu.memory_space<vmem>>, %arg4: memref<1x16x512xbf16, #tpu.memory_space<vmem>>, %arg5: memref<512x384xbf16, #tpu.memory_space<vmem>>, %arg6: memref<512x384xbf16, #tpu.memory_space<vmem>>, %arg7: memref<1x16x384xf32, #tpu.memory_space<vmem>>, %arg8: memref<1x16x384xf32, #tpu.memory_space<vmem>>, %arg9: memref<1x1x384xf32, #tpu.memory_space<vmem>>, %arg10: memref<1x1x384xf32, #tpu.memory_space<vmem>>, %arg11: memref<16x384xf32, #tpu.memory_space<vmem>>, %arg12: memref<16x384xf32, #tpu.memory_space<vmem>>, %arg13: memref<16x384xf32, #tpu.memory_space<vmem>>) attributes {dimension_semantics = [#tpu.dimension_semantics<parallel>, #tpu.dimension_semantics<arbitrary>], iteration_bounds = array<i64: 2, 1>, scalar_prefetch = 1 : i64, scratch_operands = 3 : i64, tpu.core_type = #tpu.core_type<tc>, window_params = [{transform_indices = @transform_0, window_bounds = array<i64: 1, 16, 512>}, {transform_indices = @transform_1, window_bounds = array<i64: 1, 16, 512>}, {pipeline_mode = #tpu.pipeline_mode<synchronous>, transform_indices = @transform_2, window_bounds = array<i64: 512, 384>}, {pipeline_mode = #tpu.pipeline_mode<synchronous>, transform_indices = @transform_3, window_bounds = array<i64: 512, 384>}, {transform_indices = @transform_4, window_bounds = array<i64: 1, 16, 384>}, {transform_indices = @transform_5, window_bounds = array<i64: 1, 16, 384>}, {transform_indices = @transform_6, window_bounds = array<i64: 1, 1, 384>}, {transform_indices = @transform_7, window_bounds = array<i64: 1, 1, 384>}]} {
    %c0_i32 = arith.constant 0 : i32
    %0 = arith.cmpi eq, %arg1, %c0_i32 : i32
    %1 = arith.extui %0 : i1 to i32
    %c0_i32_0 = arith.constant 0 : i32
    %2 = arith.cmpi ne, %1, %c0_i32_0 : i32
    scf.if %2 {
      %c0_43 = arith.constant 0 : index
      %c0_44 = arith.constant 0 : index
      %c0_45 = arith.constant 0 : index
      %53 = vector.load %arg3[%c0_43, %c0_44, %c0_45] : memref<1x16x512xbf16, #tpu.memory_space<vmem>>, vector<1x16x512xbf16>
      %54 = vector.shape_cast %53 : vector<1x16x512xbf16> to vector<16x512xbf16>
      %c0_46 = arith.constant 0 : index
      %c0_47 = arith.constant 0 : index
      %55 = vector.load %arg5[%c0_46, %c0_47] : memref<512x384xbf16, #tpu.memory_space<vmem>>, vector<512x384xbf16>
      %cst_48 = arith.constant dense<0.000000e+00> : vector<16x384xf32>
      %56 = tpu.matmul %54, %55, %cst_48 {dimension_numbers = #tpu.dot_dimension_numbers<[1], [0], [0], [1], [0, 0, 1, 1], [], []>} : vector<16x512xbf16>, vector<512x384xbf16>, vector<16x384xf32> -> vector<16x384xf32>
      %c0_49 = arith.constant 0 : index
      %c0_50 = arith.constant 0 : index
      %57 = vector.load %arg11[%c0_49, %c0_50] : memref<16x384xf32, #tpu.memory_space<vmem>>, vector<16x384xf32>
      tpu.vector_store %arg11[%c0_49, %c0_50], %56 {strides = array<i32>} : memref<16x384xf32, #tpu.memory_space<vmem>>, vector<16x384xf32>,
      %cst_51 = arith.constant 0.000000e+00 : f32
      %58 = vector.broadcast %cst_51 : f32 to vector<1x384xf32>
      %c0_52 = arith.constant 0 : index
      %c0_53 = arith.constant 0 : index
      %c0_54 = arith.constant 0 : index
      %59 = vector.load %arg9[%c0_52, %c0_53, %c0_54] : memref<1x1x384xf32, #tpu.memory_space<vmem>>, vector<1x1x384xf32>
      %60 = vector.shape_cast %59 : vector<1x1x384xf32> to vector<1x384xf32>
      %61 = vector.shape_cast %58 : vector<1x384xf32> to vector<1x1x384xf32>
      tpu.vector_store %arg9[%c0_52, %c0_53, %c0_54], %61 {strides = array<i32>} : memref<1x1x384xf32, #tpu.memory_space<vmem>>, vector<1x1x384xf32>,
      %cst_55 = arith.constant 0.000000e+00 : f32
      %62 = vector.broadcast %cst_55 : f32 to vector<1x384xf32>
      %c0_56 = arith.constant 0 : index
      %c0_57 = arith.constant 0 : index
      %c0_58 = arith.constant 0 : index
      %63 = vector.load %arg10[%c0_56, %c0_57, %c0_58] : memref<1x1x384xf32, #tpu.memory_space<vmem>>, vector<1x1x384xf32>
      %64 = vector.shape_cast %63 : vector<1x1x384xf32> to vector<1x384xf32>
      %65 = vector.shape_cast %62 : vector<1x384xf32> to vector<1x1x384xf32>
      tpu.vector_store %arg10[%c0_56, %c0_57, %c0_58], %65 {strides = array<i32>} : memref<1x1x384xf32, #tpu.memory_space<vmem>>, vector<1x1x384xf32>,
    } else {
    }
    %c16_i32 = arith.constant 16 : i32
    %3 = arith.muli %arg0, %c16_i32 : i32
    %c16_i32_1 = arith.constant 16 : i32
    %4 = arith.muli %arg1, %c16_i32_1 : i32
    %5 = arith.addi %3, %4 : i32
    %c16_i32_2 = arith.constant 16 : i32
    %6 = arith.muli %5, %c16_i32_2 : i32
    %c0_i32_3 = arith.constant 0 : i32
    %c16_i32_4 = arith.constant 16 : i32
    %7 = arith.addi %c0_i32_3, %c16_i32_4 : i32
    %c1_i32 = arith.constant 1 : i32
    scf.for %arg14 = %c0_i32_3 to %7 step %c1_i32  : i32 {
      %c16_i32_43 = arith.constant 16 : i32
      %53 = arith.muli %arg14, %c16_i32_43 : i32
      %54 = arith.addi %6, %53 : i32
      %55 = arith.index_cast %54 : i32 to index
      %56 = memref.load %arg2[%55] : memref<512xi32, #tpu.memory_space<smem>>
      %57 = arith.index_cast %56 : i32 to index
      %c0_44 = arith.constant 0 : index
      %58 = vector.load %arg11[%57, %c0_44] : memref<16x384xf32, #tpu.memory_space<vmem>>, vector<1x384xf32>
      %59 = arith.mulf %58, %58 : vector<1x384xf32>
      %c1_i32_45 = arith.constant 1 : i32
      %60 = arith.addi %54, %c1_i32_45 : i32
      %61 = arith.index_cast %60 : i32 to index
      %62 = memref.load %arg2[%61] : memref<512xi32, #tpu.memory_space<smem>>
      %63 = arith.index_cast %62 : i32 to index
      %c0_46 = arith.constant 0 : index
      %64 = vector.load %arg11[%63, %c0_46] : memref<16x384xf32, #tpu.memory_space<vmem>>, vector<1x384xf32>
      %65 = arith.maximumf %58, %64 : vector<1x384xf32>
      %66 = arith.minimumf %58, %64 : vector<1x384xf32>
      %67 = arith.addf %58, %64 : vector<1x384xf32>
      %68 = arith.mulf %64, %64 : vector<1x384xf32>
      %69 = arith.addf %59, %68 : vector<1x384xf32>
      %c2_i32 = arith.constant 2 : i32
      %70 = arith.addi %54, %c2_i32 : i32
      %71 = arith.index_cast %70 : i32 to index
      %72 = memref.load %arg2[%71] : memref<512xi32, #tpu.memory_space<smem>>
      %73 = arith.index_cast %72 : i32 to index
      %c0_47 = arith.constant 0 : index
      %74 = vector.load %arg11[%73, %c0_47] : memref<16x384xf32, #tpu.memory_space<vmem>>, vector<1x384xf32>
      %75 = arith.maximumf %65, %74 : vector<1x384xf32>
      %76 = arith.minimumf %66, %74 : vector<1x384xf32>
      %77 = arith.addf %67, %74 : vector<1x384xf32>
      %78 = arith.mulf %74, %74 : vector<1x384xf32>
      %79 = arith.addf %69, %78 : vector<1x384xf32>
      %c3_i32 = arith.constant 3 : i32
      %80 = arith.addi %54, %c3_i32 : i32
      %81 = arith.index_cast %80 : i32 to index
      %82 = memref.load %arg2[%81] : memref<512xi32, #tpu.memory_space<smem>>
      %83 = arith.index_cast %82 : i32 to index
      %c0_48 = arith.constant 0 : index
      %84 = vector.load %arg11[%83, %c0_48] : memref<16x384xf32, #tpu.memory_space<vmem>>, vector<1x384xf32>
      %85 = arith.maximumf %75, %84 : vector<1x384xf32>
      %86 = arith.minimumf %76, %84 : vector<1x384xf32>
      %87 = arith.addf %77, %84 : vector<1x384xf32>
      %88 = arith.mulf %84, %84 : vector<1x384xf32>
      %89 = arith.addf %79, %88 : vector<1x384xf32>
      %c4_i32 = arith.constant 4 : i32
      %90 = arith.addi %54, %c4_i32 : i32
      %91 = arith.index_cast %90 : i32 to index
      %92 = memref.load %arg2[%91] : memref<512xi32, #tpu.memory_space<smem>>
      %93 = arith.index_cast %92 : i32 to index
      %c0_49 = arith.constant 0 : index
      %94 = vector.load %arg11[%93, %c0_49] : memref<16x384xf32, #tpu.memory_space<vmem>>, vector<1x384xf32>
      %95 = arith.maximumf %85, %94 : vector<1x384xf32>
      %96 = arith.minimumf %86, %94 : vector<1x384xf32>
      %97 = arith.addf %87, %94 : vector<1x384xf32>
      %98 = arith.mulf %94, %94 : vector<1x384xf32>
      %99 = arith.addf %89, %98 : vector<1x384xf32>
      %c5_i32 = arith.constant 5 : i32
      %100 = arith.addi %54, %c5_i32 : i32
      %101 = arith.index_cast %100 : i32 to index
      %102 = memref.load %arg2[%101] : memref<512xi32, #tpu.memory_space<smem>>
      %103 = arith.index_cast %102 : i32 to index
      %c0_50 = arith.constant 0 : index
      %104 = vector.load %arg11[%103, %c0_50] : memref<16x384xf32, #tpu.memory_space<vmem>>, vector<1x384xf32>
      %105 = arith.maximumf %95, %104 : vector<1x384xf32>
      %106 = arith.minimumf %96, %104 : vector<1x384xf32>
      %107 = arith.addf %97, %104 : vector<1x384xf32>
      %108 = arith.mulf %104, %104 : vector<1x384xf32>
      %109 = arith.addf %99, %108 : vector<1x384xf32>
      %c6_i32 = arith.constant 6 : i32
      %110 = arith.addi %54, %c6_i32 : i32
      %111 = arith.index_cast %110 : i32 to index
      %112 = memref.load %arg2[%111] : memref<512xi32, #tpu.memory_space<smem>>
      %113 = arith.index_cast %112 : i32 to index
      %c0_51 = arith.constant 0 : index
      %114 = vector.load %arg11[%113, %c0_51] : memref<16x384xf32, #tpu.memory_space<vmem>>, vector<1x384xf32>
      %115 = arith.maximumf %105, %114 : vector<1x384xf32>
      %116 = arith.minimumf %106, %114 : vector<1x384xf32>
      %117 = arith.addf %107, %114 : vector<1x384xf32>
      %118 = arith.mulf %114, %114 : vector<1x384xf32>
      %119 = arith.addf %109, %118 : vector<1x384xf32>
      %c7_i32 = arith.constant 7 : i32
      %120 = arith.addi %54, %c7_i32 : i32
      %121 = arith.index_cast %120 : i32 to index
      %122 = memref.load %arg2[%121] : memref<512xi32, #tpu.memory_space<smem>>
      %123 = arith.index_cast %122 : i32 to index
      %c0_52 = arith.constant 0 : index
      %124 = vector.load %arg11[%123, %c0_52] : memref<16x384xf32, #tpu.memory_space<vmem>>, vector<1x384xf32>
      %125 = arith.maximumf %115, %124 : vector<1x384xf32>
      %126 = arith.minimumf %116, %124 : vector<1x384xf32>
      %127 = arith.addf %117, %124 : vector<1x384xf32>
      %128 = arith.mulf %124, %124 : vector<1x384xf32>
      %129 = arith.addf %119, %128 : vector<1x384xf32>
      %c8_i32 = arith.constant 8 : i32
      %130 = arith.addi %54, %c8_i32 : i32
      %131 = arith.index_cast %130 : i32 to index
      %132 = memref.load %arg2[%131] : memref<512xi32, #tpu.memory_space<smem>>
      %133 = arith.index_cast %132 : i32 to index
      %c0_53 = arith.constant 0 : index
      %134 = vector.load %arg11[%133, %c0_53] : memref<16x384xf32, #tpu.memory_space<vmem>>, vector<1x384xf32>
      %135 = arith.maximumf %125, %134 : vector<1x384xf32>
      %136 = arith.minimumf %126, %134 : vector<1x384xf32>
      %137 = arith.addf %127, %134 : vector<1x384xf32>
      %138 = arith.mulf %134, %134 : vector<1x384xf32>
      %139 = arith.addf %129, %138 : vector<1x384xf32>
      %c9_i32 = arith.constant 9 : i32
      %140 = arith.addi %54, %c9_i32 : i32
      %141 = arith.index_cast %140 : i32 to index
      %142 = memref.load %arg2[%141] : memref<512xi32, #tpu.memory_space<smem>>
      %143 = arith.index_cast %142 : i32 to index
      %c0_54 = arith.constant 0 : index
      %144 = vector.load %arg11[%143, %c0_54] : memref<16x384xf32, #tpu.memory_space<vmem>>, vector<1x384xf32>
      %145 = arith.maximumf %135, %144 : vector<1x384xf32>
      %146 = arith.minimumf %136, %144 : vector<1x384xf32>
      %147 = arith.addf %137, %144 : vector<1x384xf32>
      %148 = arith.mulf %144, %144 : vector<1x384xf32>
      %149 = arith.addf %139, %148 : vector<1x384xf32>
      %c10_i32 = arith.constant 10 : i32
      %150 = arith.addi %54, %c10_i32 : i32
      %151 = arith.index_cast %150 : i32 to index
      %152 = memref.load %arg2[%151] : memref<512xi32, #tpu.memory_space<smem>>
      %153 = arith.index_cast %152 : i32 to index
      %c0_55 = arith.constant 0 : index
      %154 = vector.load %arg11[%153, %c0_55] : memref<16x384xf32, #tpu.memory_space<vmem>>, vector<1x384xf32>
      %155 = arith.maximumf %145, %154 : vector<1x384xf32>
      %156 = arith.minimumf %146, %154 : vector<1x384xf32>
      %157 = arith.addf %147, %154 : vector<1x384xf32>
      %158 = arith.mulf %154, %154 : vector<1x384xf32>
      %159 = arith.addf %149, %158 : vector<1x384xf32>
      %c11_i32 = arith.constant 11 : i32
      %160 = arith.addi %54, %c11_i32 : i32
      %161 = arith.index_cast %160 : i32 to index
      %162 = memref.load %arg2[%161] : memref<512xi32, #tpu.memory_space<smem>>
      %163 = arith.index_cast %162 : i32 to index
      %c0_56 = arith.constant 0 : index
      %164 = vector.load %arg11[%163, %c0_56] : memref<16x384xf32, #tpu.memory_space<vmem>>, vector<1x384xf32>
      %165 = arith.maximumf %155, %164 : vector<1x384xf32>
      %166 = arith.minimumf %156, %164 : vector<1x384xf32>
      %167 = arith.addf %157, %164 : vector<1x384xf32>
      %168 = arith.mulf %164, %164 : vector<1x384xf32>
      %169 = arith.addf %159, %168 : vector<1x384xf32>
      %c12_i32 = arith.constant 12 : i32
      %170 = arith.addi %54, %c12_i32 : i32
      %171 = arith.index_cast %170 : i32 to index
      %172 = memref.load %arg2[%171] : memref<512xi32, #tpu.memory_space<smem>>
      %173 = arith.index_cast %172 : i32 to index
      %c0_57 = arith.constant 0 : index
      %174 = vector.load %arg11[%173, %c0_57] : memref<16x384xf32, #tpu.memory_space<vmem>>, vector<1x384xf32>
      %175 = arith.maximumf %165, %174 : vector<1x384xf32>
      %176 = arith.minimumf %166, %174 : vector<1x384xf32>
      %177 = arith.addf %167, %174 : vector<1x384xf32>
      %178 = arith.mulf %174, %174 : vector<1x384xf32>
      %179 = arith.addf %169, %178 : vector<1x384xf32>
      %c13_i32 = arith.constant 13 : i32
      %180 = arith.addi %54, %c13_i32 : i32
      %181 = arith.index_cast %180 : i32 to index
      %182 = memref.load %arg2[%181] : memref<512xi32, #tpu.memory_space<smem>>
      %183 = arith.index_cast %182 : i32 to index
      %c0_58 = arith.constant 0 : index
      %184 = vector.load %arg11[%183, %c0_58] : memref<16x384xf32, #tpu.memory_space<vmem>>, vector<1x384xf32>
      %185 = arith.maximumf %175, %184 : vector<1x384xf32>
      %186 = arith.minimumf %176, %184 : vector<1x384xf32>
      %187 = arith.addf %177, %184 : vector<1x384xf32>
      %188 = arith.mulf %184, %184 : vector<1x384xf32>
      %189 = arith.addf %179, %188 : vector<1x384xf32>
      %c14_i32 = arith.constant 14 : i32
      %190 = arith.addi %54, %c14_i32 : i32
      %191 = arith.index_cast %190 : i32 to index
      %192 = memref.load %arg2[%191] : memref<512xi32, #tpu.memory_space<smem>>
      %193 = arith.index_cast %192 : i32 to index
      %c0_59 = arith.constant 0 : index
      %194 = vector.load %arg11[%193, %c0_59] : memref<16x384xf32, #tpu.memory_space<vmem>>, vector<1x384xf32>
      %195 = arith.maximumf %185, %194 : vector<1x384xf32>
      %196 = arith.minimumf %186, %194 : vector<1x384xf32>
      %197 = arith.addf %187, %194 : vector<1x384xf32>
      %198 = arith.mulf %194, %194 : vector<1x384xf32>
      %199 = arith.addf %189, %198 : vector<1x384xf32>
      %c15_i32 = arith.constant 15 : i32
      %200 = arith.addi %54, %c15_i32 : i32
      %201 = arith.index_cast %200 : i32 to index
      %202 = memref.load %arg2[%201] : memref<512xi32, #tpu.memory_space<smem>>
      %203 = arith.index_cast %202 : i32 to index
      %c0_60 = arith.constant 0 : index
      %204 = vector.load %arg11[%203, %c0_60] : memref<16x384xf32, #tpu.memory_space<vmem>>, vector<1x384xf32>
      %205 = arith.maximumf %195, %204 : vector<1x384xf32>
      %206 = arith.minimumf %196, %204 : vector<1x384xf32>
      %207 = arith.addf %197, %204 : vector<1x384xf32>
      %208 = arith.mulf %204, %204 : vector<1x384xf32>
      %209 = arith.addf %199, %208 : vector<1x384xf32>
      %c0_61 = arith.constant 0 : index
      %210 = arith.index_cast %arg14 : i32 to index
      %c0_62 = arith.constant 0 : index
      %211 = vector.load %arg7[%c0_61, %210, %c0_62] : memref<1x16x384xf32, #tpu.memory_space<vmem>>, vector<1x1x384xf32>
      %212 = vector.shape_cast %211 : vector<1x1x384xf32> to vector<1x384xf32>
      %213 = vector.shape_cast %205 : vector<1x384xf32> to vector<1x1x384xf32>
      tpu.vector_store %arg7[%c0_61, %210, %c0_62], %213 {strides = array<i32>} : memref<1x16x384xf32, #tpu.memory_space<vmem>>, vector<1x1x384xf32>,
      %c0_63 = arith.constant 0 : index
      %214 = arith.index_cast %arg14 : i32 to index
      %c0_64 = arith.constant 0 : index
      %215 = vector.load %arg8[%c0_63, %214, %c0_64] : memref<1x16x384xf32, #tpu.memory_space<vmem>>, vector<1x1x384xf32>
      %216 = vector.shape_cast %215 : vector<1x1x384xf32> to vector<1x384xf32>
      %217 = vector.shape_cast %206 : vector<1x384xf32> to vector<1x1x384xf32>
      tpu.vector_store %arg8[%c0_63, %214, %c0_64], %217 {strides = array<i32>} : memref<1x16x384xf32, #tpu.memory_space<vmem>>, vector<1x1x384xf32>,
      %218 = arith.index_cast %arg14 : i32 to index
      %c0_65 = arith.constant 0 : index
      %219 = vector.load %arg12[%218, %c0_65] : memref<16x384xf32, #tpu.memory_space<vmem>>, vector<1x384xf32>
      tpu.vector_store %arg12[%218, %c0_65], %207 {strides = array<i32>} : memref<16x384xf32, #tpu.memory_space<vmem>>, vector<1x384xf32>,
      %220 = arith.index_cast %arg14 : i32 to index
      %c0_66 = arith.constant 0 : index
      %221 = vector.load %arg13[%220, %c0_66] : memref<16x384xf32, #tpu.memory_space<vmem>>, vector<1x384xf32>
      tpu.vector_store %arg13[%220, %c0_66], %209 {strides = array<i32>} : memref<16x384xf32, #tpu.memory_space<vmem>>, vector<1x384xf32>,
    }
    %c16_i32_5 = arith.constant 16 : i32
    %c0 = arith.constant 0 : index
    %c0_6 = arith.constant 0 : index
    %c0_7 = arith.constant 0 : index
    %8 = vector.load %arg4[%c0, %c0_6, %c0_7] : memref<1x16x512xbf16, #tpu.memory_space<vmem>>, vector<1x16x512xbf16>
    %9 = vector.shape_cast %8 : vector<1x16x512xbf16> to vector<16x512xbf16>
    %c0_8 = arith.constant 0 : index
    %c0_9 = arith.constant 0 : index
    %10 = vector.load %arg6[%c0_8, %c0_9] : memref<512x384xbf16, #tpu.memory_space<vmem>>, vector<512x384xbf16>
    %cst = arith.constant dense<0.000000e+00> : vector<16x384xf32>
    %11 = tpu.matmul %9, %10, %cst {dimension_numbers = #tpu.dot_dimension_numbers<[1], [0], [0], [1], [0, 0, 1, 1], [], []>} : vector<16x512xbf16>, vector<512x384xbf16>, vector<16x384xf32> -> vector<16x384xf32>
    %c0_10 = arith.constant 0 : index
    %c0_11 = arith.constant 0 : index
    %12 = vector.load %arg12[%c0_10, %c0_11] : memref<16x384xf32, #tpu.memory_space<vmem>>, vector<16x384xf32>
    %c0_12 = arith.constant 0 : index
    %c0_13 = arith.constant 0 : index
    %c0_14 = arith.constant 0 : index
    %13 = vector.load %arg7[%c0_12, %c0_13, %c0_14] : memref<1x16x384xf32, #tpu.memory_space<vmem>>, vector<1x16x384xf32>
    %14 = vector.shape_cast %13 : vector<1x16x384xf32> to vector<16x384xf32>
    %15 = arith.addf %14, %11 : vector<16x384xf32>
    %c0_15 = arith.constant 0 : index
    %c0_16 = arith.constant 0 : index
    %c0_17 = arith.constant 0 : index
    %16 = vector.load %arg7[%c0_15, %c0_16, %c0_17] : memref<1x16x384xf32, #tpu.memory_space<vmem>>, vector<1x16x384xf32>
    %17 = vector.shape_cast %16 : vector<1x16x384xf32> to vector<16x384xf32>
    %18 = vector.shape_cast %15 : vector<16x384xf32> to vector<1x16x384xf32>
    tpu.vector_store %arg7[%c0_15, %c0_16, %c0_17], %18 {strides = array<i32>} : memref<1x16x384xf32, #tpu.memory_space<vmem>>, vector<1x16x384xf32>,
    %c0_18 = arith.constant 0 : index
    %c0_19 = arith.constant 0 : index
    %c0_20 = arith.constant 0 : index
    %19 = vector.load %arg8[%c0_18, %c0_19, %c0_20] : memref<1x16x384xf32, #tpu.memory_space<vmem>>, vector<1x16x384xf32>
    %20 = vector.shape_cast %19 : vector<1x16x384xf32> to vector<16x384xf32>
    %21 = arith.addf %20, %11 : vector<16x384xf32>
    %c0_21 = arith.constant 0 : index
    %c0_22 = arith.constant 0 : index
    %c0_23 = arith.constant 0 : index
    %22 = vector.load %arg8[%c0_21, %c0_22, %c0_23] : memref<1x16x384xf32, #tpu.memory_space<vmem>>, vector<1x16x384xf32>
    %23 = vector.shape_cast %22 : vector<1x16x384xf32> to vector<16x384xf32>
    %24 = vector.shape_cast %21 : vector<16x384xf32> to vector<1x16x384xf32>
    tpu.vector_store %arg8[%c0_21, %c0_22, %c0_23], %24 {strides = array<i32>} : memref<1x16x384xf32, #tpu.memory_space<vmem>>, vector<1x16x384xf32>,
    %cst_24 = arith.constant 1.600000e+01 : f32
    %25 = vector.broadcast %cst_24 : f32 to vector<16x384xf32>
    %26 = arith.mulf %25, %11 : vector<16x384xf32>
    %27 = arith.addf %12, %26 : vector<16x384xf32>
    %c0_25 = arith.constant 0 : index
    %c0_26 = arith.constant 0 : index
    %28 = vector.load %arg13[%c0_25, %c0_26] : memref<16x384xf32, #tpu.memory_space<vmem>>, vector<16x384xf32>
    %cst_27 = arith.constant 2.000000e+00 : f32
    %29 = vector.broadcast %cst_27 : f32 to vector<16x384xf32>
    %30 = arith.mulf %29, %11 : vector<16x384xf32>
    %31 = arith.mulf %30, %12 : vector<16x384xf32>
    %32 = arith.addf %28, %31 : vector<16x384xf32>
    %33 = arith.mulf %11, %11 : vector<16x384xf32>
    %cst_28 = arith.constant 1.600000e+01 : f32
    %34 = vector.broadcast %cst_28 : f32 to vector<16x384xf32>
    %35 = arith.mulf %34, %33 : vector<16x384xf32>
    %36 = arith.addf %32, %35 : vector<16x384xf32>
    %c0_29 = arith.constant 0 : index
    %c0_30 = arith.constant 0 : index
    %c0_31 = arith.constant 0 : index
    %37 = vector.load %arg9[%c0_29, %c0_30, %c0_31] : memref<1x1x384xf32, #tpu.memory_space<vmem>>, vector<1x1x384xf32>
    %38 = vector.shape_cast %37 : vector<1x1x384xf32> to vector<1x384xf32>
    %cst_32 = arith.constant dense<0.000000e+00> : vector<384xf32>
    %39 = vector.multi_reduction <add>, %27, %cst_32 [0] : vector<16x384xf32> to vector<384xf32>
    %40 = vector.shape_cast %39 : vector<384xf32> to vector<1x384xf32>
    %41 = arith.addf %38, %40 : vector<1x384xf32>
    %c0_33 = arith.constant 0 : index
    %c0_34 = arith.constant 0 : index
    %c0_35 = arith.constant 0 : index
    %42 = vector.load %arg9[%c0_33, %c0_34, %c0_35] : memref<1x1x384xf32, #tpu.memory_space<vmem>>, vector<1x1x384xf32>
    %43 = vector.shape_cast %42 : vector<1x1x384xf32> to vector<1x384xf32>
    %44 = vector.shape_cast %41 : vector<1x384xf32> to vector<1x1x384xf32>
    tpu.vector_store %arg9[%c0_33, %c0_34, %c0_35], %44 {strides = array<i32>} : memref<1x1x384xf32, #tpu.memory_space<vmem>>, vector<1x1x384xf32>,
    %c0_36 = arith.constant 0 : index
    %c0_37 = arith.constant 0 : index
    %c0_38 = arith.constant 0 : index
    %45 = vector.load %arg10[%c0_36, %c0_37, %c0_38] : memref<1x1x384xf32, #tpu.memory_space<vmem>>, vector<1x1x384xf32>
    %46 = vector.shape_cast %45 : vector<1x1x384xf32> to vector<1x384xf32>
    %cst_39 = arith.constant dense<0.000000e+00> : vector<384xf32>
    %47 = vector.multi_reduction <add>, %36, %cst_39 [0] : vector<16x384xf32> to vector<384xf32>
    %48 = vector.shape_cast %47 : vector<384xf32> to vector<1x384xf32>
    %49 = arith.addf %46, %48 : vector<1x384xf32>
    %c0_40 = arith.constant 0 : index
    %c0_41 = arith.constant 0 : index
    %c0_42 = arith.constant 0 : index
    %50 = vector.load %arg10[%c0_40, %c0_41, %c0_42] : memref<1x1x384xf32, #tpu.memory_space<vmem>>, vector<1x1x384xf32>
    %51 = vector.shape_cast %50 : vector<1x1x384xf32> to vector<1x384xf32>
    %52 = vector.shape_cast %49 : vector<1x384xf32> to vector<1x1x384xf32>
    tpu.vector_store %arg10[%c0_40, %c0_41, %c0_42], %52 {strides = array<i32>} : memref<1x1x384xf32, #tpu.memory_space<vmem>>, vector<1x1x384xf32>,
    return
  }
  func.func @transform_0(%arg0: i32, %arg1: i32, %arg2: memref<512xi32, #tpu.memory_space<smem>>) -> (i32, i32, i32) {
    %c0_i32 = arith.constant 0 : i32
    %c0_i32_0 = arith.constant 0 : i32
    %c0_i32_1 = arith.constant 0 : i32
    return %arg0, %c0_i32, %c0_i32_0 : i32, i32, i32
  }
  func.func @transform_1(%arg0: i32, %arg1: i32, %arg2: memref<512xi32, #tpu.memory_space<smem>>) -> (i32, i32, i32) {
    %c0_i32 = arith.constant 0 : i32
    %c0_i32_0 = arith.constant 0 : i32
    return %arg0, %arg1, %c0_i32 : i32, i32, i32
  }
  func.func @transform_2(%arg0: i32, %arg1: i32, %arg2: memref<512xi32, #tpu.memory_space<smem>>) -> (i32, i32) {
    %c0_i32 = arith.constant 0 : i32
    %c0_i32_0 = arith.constant 0 : i32
    %c0_i32_1 = arith.constant 0 : i32
    return %c0_i32, %c0_i32_0 : i32, i32
  }
  func.func @transform_3(%arg0: i32, %arg1: i32, %arg2: memref<512xi32, #tpu.memory_space<smem>>) -> (i32, i32) {
    %c0_i32 = arith.constant 0 : i32
    %c0_i32_0 = arith.constant 0 : i32
    %c0_i32_1 = arith.constant 0 : i32
    return %c0_i32, %c0_i32_0 : i32, i32
  }
  func.func @transform_4(%arg0: i32, %arg1: i32, %arg2: memref<512xi32, #tpu.memory_space<smem>>) -> (i32, i32, i32) {
    %c0_i32 = arith.constant 0 : i32
    %c0_i32_0 = arith.constant 0 : i32
    return %arg0, %arg1, %c0_i32 : i32, i32, i32
  }
  func.func @transform_5(%arg0: i32, %arg1: i32, %arg2: memref<512xi32, #tpu.memory_space<smem>>) -> (i32, i32, i32) {
    %c0_i32 = arith.constant 0 : i32
    %c0_i32_0 = arith.constant 0 : i32
    return %arg0, %arg1, %c0_i32 : i32, i32, i32
  }
  func.func @transform_6(%arg0: i32, %arg1: i32, %arg2: memref<512xi32, #tpu.memory_space<smem>>) -> (i32, i32, i32) {
    %c0_i32 = arith.constant 0 : i32
    %c0_i32_0 = arith.constant 0 : i32
    %c0_i32_1 = arith.constant 0 : i32
    return %arg0, %c0_i32, %c0_i32_0 : i32, i32, i32
  }
  func.func @transform_7(%arg0: i32, %arg1: i32, %arg2: memref<512xi32, #tpu.memory_space<smem>>) -> (i32, i32, i32) {
    %c0_i32 = arith.constant 0 : i32
    %c0_i32_0 = arith.constant 0 : i32
    %c0_i32_1 = arith.constant 0 : i32
    return %arg0, %c0_i32, %c0_i32_0 : i32, i32, i32
  }
}

module attributes {stable_mosaic.version = 11 : i64} {
  func.func @_groupnorm_leaky_kernel(%arg0: i32, %arg1: i32, %arg2: memref<1x16x384xf32, #tpu.memory_space<vmem>>, %arg3: memref<1x16x384xf32, #tpu.memory_space<vmem>>, %arg4: memref<1x1x384xf32, #tpu.memory_space<vmem>>, %arg5: memref<1x1x384xf32, #tpu.memory_space<vmem>>, %arg6: memref<1x16x384xf32, #tpu.memory_space<vmem>>) attributes {dimension_semantics = [#tpu.dimension_semantics<parallel>, #tpu.dimension_semantics<parallel>], iteration_bounds = array<i64: 2, 1>, scalar_prefetch = 0 : i64, scratch_operands = 0 : i64, tpu.core_type = #tpu.core_type<tc>, window_params = [{transform_indices = @transform_0, window_bounds = array<i64: 1, 16, 384>}, {transform_indices = @transform_1, window_bounds = array<i64: 1, 16, 384>}, {transform_indices = @transform_2, window_bounds = array<i64: 1, 1, 384>}, {transform_indices = @transform_3, window_bounds = array<i64: 1, 1, 384>}, {transform_indices = @transform_4, window_bounds = array<i64: 1, 16, 384>}]} {
    %c0 = arith.constant 0 : index
    %c0_0 = arith.constant 0 : index
    %c0_1 = arith.constant 0 : index
    %0 = vector.load %arg4[%c0, %c0_0, %c0_1] : memref<1x1x384xf32, #tpu.memory_space<vmem>>, vector<1x1x384xf32>
    %1 = vector.shape_cast %0 : vector<1x1x384xf32> to vector<1x384xf32>
    %c0_2 = arith.constant 0 : index
    %c0_3 = arith.constant 0 : index
    %c0_4 = arith.constant 0 : index
    %2 = vector.load %arg5[%c0_2, %c0_3, %c0_4] : memref<1x1x384xf32, #tpu.memory_space<vmem>>, vector<1x1x384xf32>
    %3 = vector.shape_cast %2 : vector<1x1x384xf32> to vector<1x384xf32>
    %cst = arith.constant 0.000000e+00 : f32
    %4 = vector.broadcast %cst : f32 to vector<1x384xf32>
    %5 = arith.cmpf oge, %1, %4 : vector<1x384xf32>
    %c0_5 = arith.constant 0 : index
    %c0_6 = arith.constant 0 : index
    %c0_7 = arith.constant 0 : index
    %6 = vector.load %arg2[%c0_5, %c0_6, %c0_7] : memref<1x16x384xf32, #tpu.memory_space<vmem>>, vector<1x16x384xf32>
    %7 = vector.shape_cast %6 : vector<1x16x384xf32> to vector<16x384xf32>
    %c0_8 = arith.constant 0 : index
    %c0_9 = arith.constant 0 : index
    %c0_10 = arith.constant 0 : index
    %8 = vector.load %arg3[%c0_8, %c0_9, %c0_10] : memref<1x16x384xf32, #tpu.memory_space<vmem>>, vector<1x16x384xf32>
    %9 = vector.shape_cast %8 : vector<1x16x384xf32> to vector<16x384xf32>
    %10 = vector.shape_cast %5 : vector<1x384xi1> to vector<1x384xi1>
    %11 = vector.broadcast %10 : vector<1x384xi1> to vector<16x384xi1>
    %12 = arith.select %11, %7, %9 : vector<16x384xi1>, vector<16x384xf32>
    %13 = vector.broadcast %1 : vector<1x384xf32> to vector<16x384xf32>
    %14 = arith.mulf %12, %13 : vector<16x384xf32>
    %15 = vector.broadcast %3 : vector<1x384xf32> to vector<16x384xf32>
    %16 = arith.addf %14, %15 : vector<16x384xf32>
    %cst_11 = arith.constant 0.000000e+00 : f32
    %17 = vector.broadcast %cst_11 : f32 to vector<16x384xf32>
    %18 = arith.cmpf ogt, %16, %17 : vector<16x384xf32>
    %cst_12 = arith.constant 2.000000e-01 : f32
    %19 = vector.broadcast %cst_12 : f32 to vector<16x384xf32>
    %20 = arith.mulf %19, %16 : vector<16x384xf32>
    %21 = arith.select %18, %16, %20 : vector<16x384xi1>, vector<16x384xf32>
    %c0_13 = arith.constant 0 : index
    %c0_14 = arith.constant 0 : index
    %c0_15 = arith.constant 0 : index
    %22 = vector.load %arg6[%c0_13, %c0_14, %c0_15] : memref<1x16x384xf32, #tpu.memory_space<vmem>>, vector<1x16x384xf32>
    %23 = vector.shape_cast %22 : vector<1x16x384xf32> to vector<16x384xf32>
    %24 = vector.shape_cast %21 : vector<16x384xf32> to vector<1x16x384xf32>
    tpu.vector_store %arg6[%c0_13, %c0_14, %c0_15], %24 {strides = array<i32>} : memref<1x16x384xf32, #tpu.memory_space<vmem>>, vector<1x16x384xf32>,
    return
  }
  func.func @transform_0(%arg0: i32, %arg1: i32) -> (i32, i32, i32) {
    %c0_i32 = arith.constant 0 : i32
    %c0_i32_0 = arith.constant 0 : i32
    return %arg0, %arg1, %c0_i32 : i32, i32, i32
  }
  func.func @transform_1(%arg0: i32, %arg1: i32) -> (i32, i32, i32) {
    %c0_i32 = arith.constant 0 : i32
    %c0_i32_0 = arith.constant 0 : i32
    return %arg0, %arg1, %c0_i32 : i32, i32, i32
  }
  func.func @transform_2(%arg0: i32, %arg1: i32) -> (i32, i32, i32) {
    %c0_i32 = arith.constant 0 : i32
    %c0_i32_0 = arith.constant 0 : i32
    %c0_i32_1 = arith.constant 0 : i32
    return %arg0, %c0_i32, %c0_i32_0 : i32, i32, i32
  }
  func.func @transform_3(%arg0: i32, %arg1: i32) -> (i32, i32, i32) {
    %c0_i32 = arith.constant 0 : i32
    %c0_i32_0 = arith.constant 0 : i32
    %c0_i32_1 = arith.constant 0 : i32
    return %arg0, %c0_i32, %c0_i32_0 : i32, i32, i32
  }
  func.func @transform_4(%arg0: i32, %arg1: i32) -> (i32, i32, i32) {
    %c0_i32 = arith.constant 0 : i32
    %c0_i32_0 = arith.constant 0 : i32
    return %arg0, %arg1, %c0_i32 : i32, i32, i32
  }
}

</mosaic_0001>

<bundles_post_ra>
// kernel: dgcnn_propagation.5
= control target key start
LH: loop header
LB: loop body
LE: loop exit
PB: predicated region body
PF: predicated region fallthrough
CT: control target
= control target key end

     0   :  { %s715_s15 = smov 0   ;;  %s717_s16 = smov 0   ;;  %s814_s0 = inlined_call_operand.vmem [shape: f32[2,16,512], index: 0, kind: input, shape index: {}]   ;;  %s815_s1 = inlined_call_operand.vmem [shape: f32[2,16,512], index: 1, kind: input, shape index: {}]   ;;  %s816_s2 = inlined_call_operand.vmem [shape: f32[2,1,512], index: 2, kind: input, shape index: {}]   ;;  %s817_s3 = inlined_call_operand.vmem [shape: f32[2,1,512], index: 3, kind: input, shape index: {}]   ;;  %s818_s4 = inlined_call_operand.vmem [shape: bf16[2,16,512], index: 4, kind: output, shape index: {}]  }
   0x1   :  { %s719_s17 = smov 0  }
   0x2 LB: > { %s26_s18 = sadd.s32 1, %s683_s16  ;;  %p618_p0 = scmp.ge.s32.totalorder %s687_s17, 1  ;;  %s687_s17 = sphi %s719_s17, %s14_s17   ;;  %s683_s16 = sphi %s717_s16, %s828_s16   ;;  %s679_s15 = sphi %s715_s15, %s827_s15  }
   0x3   : > { %p28_p1 = scmp.ge.s32.totalorder %s26_s18, 2  ;;  %p220_p2 = scmp.lt.s32.totalorder %s687_s17, 3 }
   0x5   : > { %s830_s18 = smov (%p28_p1, %s26_s18), 0  ;;  %p221_p3 = pnand %p618_p0, %p220_p2 }
   0x6   : > { %p275_p4 = scmp.lt.s32.totalorder (!%p221_p3), %s679_s15, 1 }
   0x7   : > { %224 = sbr.rel (%p221_p3) target bundleno = 39 (0x27), region = 36 }
   0xc   : > { %v335_v0 = vlaneseq  ;;  %s832_s15 = smov (!%p275_p4, %s679_s15), 1  ;;  %v689_v14 = vmov 0  }
   0xd   : > { %s633_s19 = sshll.u32 %s832_s15, 6  ;;  %s623_s20 = sshll.u32 %s832_s15, 2 }
   0xe   : > { %v336_v1 = vshrl.u32 %v335_v0, 7  ;;  %s740_s23 = scalar_lea.vmem %s814_s0, %s633_s19  ;;  %s745_s26 = scalar_lea.vmem %s815_s1, %s633_s19 }
   0xf   : > { %s299_s29 = scalar_lea.vmem %s816_s2, %s623_s20  ;;  %s303_s6 = scalar_lea.vmem %s817_s3, %s623_s20  ;;  %v318_v8 = vld [vmem:[%s740_s23] sm:$0xff]  ;;  %v319_v9 = vld [vmem:[%s740_s23 + $0x8] sm:$0xff]  ;;  %v320_v13 = vld [vmem:[%s740_s23 + $0x10] sm:$0xff] }
  0x10   : > { %v337_v2 = vsub.s32 0, %v336_v1  ;;  %v341_v3 = vsub.s32 1, %v336_v1  ;;  %v345_v4 = vsub.s32 2, %v336_v1  ;;  %v349_v5 = vsub.s32 3, %v336_v1  ;;  %v315_v6 = vld [vmem:[%s299_s29] sm:$0xf] }
  0x11   : > { %v316_v7 = vld [vmem:[%s303_s6] sm:$0xf]  ;;  %vm317_vm0 = vcmp.ge.f32.partialorder %v315_v6, 0.0  ;;  %v327_v11 = vld [vmem:[%s745_s26 + $0x8] sm:$0xff]  ;;  %v321_v17 = vld [vmem:[%s740_s23 + $0x18] sm:$0xff]  ;;  %s635_s7 = sshll.u32 %s832_s15, 5 }
  0x12   : > { %v326_v10 = vld [vmem:[%s745_s26] sm:$0xff]  ;;  %v367_v12 = vrot.slane %v315_v6, %v337_v2  ;;  %v334_v15 = vsel %vm317_vm0, 1, %v689_v14  ;;  %v371_v16 = vrot.slane %v315_v6, %v341_v3  ;;  %v328_v18 = vld [vmem:[%s745_s26 + $0x10] sm:$0xff]  ;;  %v329_v19 = vld [vmem:[%s745_s26 + $0x18] sm:$0xff]  ;;  %v375_v20 = vrot.slane %v315_v6, %v345_v4  ;;  %s313_s10 = scalar_lea.vmem %s818_s4, %s635_s7 }
  0x13   : > { %v379_v21 = vrot.slane %v315_v6, %v349_v5  ;;  %v338_v22 = vrot.slane %v334_v15, %v337_v2  ;;  %v342_v23 = vrot.slane %v334_v15, %v341_v3  ;;  %v346_v24 = vrot.slane %v334_v15, %v345_v4  ;;  %v322_v26 = vld [vmem:[%s740_s23 + $0x20] sm:$0xff]  ;;  %v323_v27 = vld [vmem:[%s740_s23 + $0x28] sm:$0xff]  ;;  %v324_v34 = vld [vmem:[%s740_s23 + $0x30] sm:$0xff] }
  0x14   : > { %v350_v25 = vrot.slane %v334_v15, %v349_v5  ;;  %v330_v28 = vld [vmem:[%s745_s26 + $0x20] sm:$0xff]  ;;  %v396_v29 = vrot.slane %v316_v7, %v337_v2  ;;  %v400_v30 = vrot.slane %v316_v7, %v341_v3  ;;  %v404_v31 = vrot.slane %v316_v7, %v345_v4  ;;  %v331_v33 = vld [vmem:[%s745_s26 + $0x28] sm:$0xff]  ;;  %v325_v35 = vld [vmem:[%s740_s23 + $0x38] sm:$0xff] }
  0x15   : > { %v408_v32 = vrot.slane %v316_v7, %v349_v5  ;;  %vm767_vm1 = vcmp.eq.s32.totalorder %v338_v22, 1  ;;  %vm771_vm2 = vcmp.eq.s32.totalorder %v342_v23, 1  ;;  %vm775_vm3 = vcmp.eq.s32.totalorder %v346_v24, 1  ;;  %v332_v40 = vld [vmem:[%s745_s26 + $0x30] sm:$0xff]  ;;  %v333_v41 = vld [vmem:[%s745_s26 + $0x38] sm:$0xff] }
  0x16   : > { %vm779_vm4 = vcmp.eq.s32.totalorder %v350_v25, 1  ;;  %v355_v42 = vsel %vm767_vm1, %v318_v8, %v326_v10  ;;  %v356_v43 = vsel %vm771_vm2, %v319_v9, %v327_v11  ;;  %v357_v44 = vsel %vm775_vm3, %v320_v13, %v328_v18 }
  0x17   : > { %v358_v45 = vsel %vm779_vm4, %v321_v17, %v329_v19  ;;  %v384_v46 = vmul.f32 %v367_v12, %v355_v42  ;;  %v385_v47 = vmul.f32 %v371_v16, %v356_v43  ;;  %v386_v48 = vmul.f32 %v375_v20, %v357_v44 }
  0x18   : > { %v387_v49 = vmul.f32 %v379_v21, %v358_v45  ;;  %v359_v50 = vsel %vm767_vm1, %v322_v26, %v330_v28  ;;  %v360_v51 = vsel %vm771_vm2, %v323_v27, %v331_v33  ;;  %v361_v52 = vsel %vm775_vm3, %v324_v34, %v332_v40 }
  0x19   : > { %v362_v53 = vsel %vm779_vm4, %v325_v35, %v333_v41  ;;  %v413_v54 = vadd.f32 %v396_v29, %v384_v46  ;;  %v414_v55 = vadd.f32 %v400_v30, %v385_v47  ;;  %v415_v56 = vadd.f32 %v404_v31, %v386_v48 }
  0x1a   : > { %v416_v57 = vadd.f32 %v408_v32, %v387_v49  ;;  %v388_v58 = vmul.f32 %v367_v12, %v359_v50  ;;  %v389_v59 = vmul.f32 %v371_v16, %v360_v51  ;;  %v390_v60 = vmul.f32 %v375_v20, %v361_v52 }
  0x1b   : > { %v391_v61 = vmul.f32 %v379_v21, %v362_v53  ;;  %vm421_vm5 = vcmp.gt.f32.partialorder %v413_v54, 0.0  ;;  %vm422_vm6 = vcmp.gt.f32.partialorder %v414_v55, 0.0  ;;  %v429_v62 = vmul.f32 0.2, %v413_v54 }
  0x1c   : > { %v430_v63 = vmul.f32 0.2, %v414_v55  ;;  %vm423_vm7 = vcmp.gt.f32.partialorder %v415_v56, 0.0  ;;  %vm424_vm8 = vcmp.gt.f32.partialorder %v416_v57, 0.0  ;;  %v431_v0 = vmul.f32 0.2, %v415_v56 }
  0x1d   : > { %v432_v1 = vmul.f32 0.2, %v416_v57  ;;  %v437_v2 = vsel %vm421_vm5, %v413_v54, %v429_v62  ;;  %v417_v4 = vadd.f32 %v396_v29, %v388_v58  ;;  %v418_v5 = vadd.f32 %v400_v30, %v389_v59 }
  0x1e   : > { %v438_v3 = vsel %vm422_vm6, %v414_v55, %v430_v63  ;;  %v439_v7 = vsel %vm423_vm7, %v415_v56, %v431_v0  ;;  %v419_v9 = vadd.f32 %v404_v31, %v390_v60  ;;  %v420_v13 = vadd.f32 %v408_v32, %v391_v61 }
  0x1f   : > { %v636_v6 = vpack.c.bf16 %v438_v3, %v437_v2  ;;  %v440_v8 = vsel %vm424_vm8, %v416_v57, %v432_v1  ;;  %vm425_vm9 = vcmp.gt.f32.partialorder %v417_v4, 0.0  ;;  %vm426_vm10 = vcmp.gt.f32.partialorder %v418_v5, 0.0 }
  0x20   : > { %v637_v10 = vpack.c.bf16 %v440_v8, %v439_v7  ;;  %v433_v11 = vmul.f32 0.2, %v417_v4  ;;  %v434_v12 = vmul.f32 0.2, %v418_v5  ;;  %vm427_vm11 = vcmp.gt.f32.partialorder %v419_v9, 0.0 }
  0x21   : > { %469 = vst [vmem:[%s313_s10] sm:$0xff] %v636_v6  ;;  %v435_v14 = vmul.f32 0.2, %v419_v9  ;;  %vm428_vm12 = vcmp.gt.f32.partialorder %v420_v13, 0.0  ;;  %v436_v17 = vmul.f32 0.2, %v420_v13 }
  0x22   : > { %470 = vst [vmem:[%s313_s10 + $0x8] sm:$0xff] %v637_v10  ;;  %v441_v15 = vsel %vm425_vm9, %v417_v4, %v433_v11  ;;  %v442_v16 = vsel %vm426_vm10, %v418_v5, %v434_v12 }
  0x23   : > { %v443_v18 = vsel %vm427_vm11, %v419_v9, %v435_v14  ;;  %v638_v19 = vpack.c.bf16 %v442_v16, %v441_v15  ;;  %v444_v20 = vsel %vm428_vm12, %v420_v13, %v436_v17 }
  0x24   : > { %v639_v21 = vpack.c.bf16 %v444_v20, %v443_v18 }
  0x25   : > { %471 = vst [vmem:[%s313_s10 + $0x10] sm:$0xff] %v638_v19 }
  0x26   : > { %472 = vst [vmem:[%s313_s10 + $0x18] sm:$0xff] %v639_v21 }
  0x27 PF: > { %s14_s17 = sadd.s32 1, %s687_s17   ;;  %s827_s15 = smov %s683_s16 }
  0x28   : > { %p11_p5 = scmp.ge.s32.totalorder %s14_s17, 4   ;;  %s828_s16 = smov %s830_s18 }
  0x2a   :  { %13 = sbr.rel (!%p11_p5) target bundleno = 2 (0x2), region = 75 }

// kernel: dgcnn_propagation.4
= control target key start
LH: loop header
LB: loop body
LE: loop exit
PB: predicated region body
PF: predicated region fallthrough
CT: control target
= control target key end

     0   :  { %s4408_s0 = inlined_call_operand.vmem [shape: s32[512], index: 0, kind: input, shape index: {}]   ;;  %s4409_s1 = inlined_call_operand.vmem [shape: bf16[2,32,384], index: 1, kind: input, shape index: {}]   ;;  %s4410_s2 = inlined_call_operand.vmem [shape: bf16[2,16,384], index: 2, kind: input, shape index: {}]   ;;  %s4411_s3 = inlined_call_operand.vmem [shape: bf16[384,512], index: 3, kind: input, shape index: {}]   ;;  %s4412_s4 = inlined_call_operand.vmem [shape: bf16[384,512], index: 4, kind: input, shape index: {}]   ;;  %s4413_s5 = inlined_call_operand.vmem [shape: f32[2,16,512], index: 5, kind: output, shape index: {0}]   ;;  %s4414_s6 = inlined_call_operand.vmem [shape: f32[2,16,512], index: 6, kind: output, shape index: {1}]   ;;  %s4415_s7 = inlined_call_operand.vmem [shape: f32[2,1,512], index: 7, kind: output, shape index: {2}]   ;;  %s4416_s8 = inlined_call_operand.vmem [shape: f32[2,1,512], index: 8, kind: output, shape index: {3}]  }
   0x1   :  { %4417 = sst [smem:[#allocation8_spill]] %s4409_s1  ;;  %s14_s29 = sshll.u32 %s4408_s0, 4  ;;  %s15_s29 = int_to_ptr.vmem [resolvable:$true] %s14_s29 }
   0x2   :  { %4418 = sst [smem:[#allocation9_spill]] %s4410_s2  ;;  %s3458_s30 = scalar_lea.vmem %s15_s29, 64 }
   0x3   :  { %4419 = sst [smem:[#allocation10_spill]] %s4411_s3  ;;  %p3459_p0 = scmp.ne.s32.totalorder %s15_s29, %s3458_s30 }
   0x4   :  { %4420 = sst [smem:[#allocation11_spill]] %s4413_s5  ;;  %p3463_p1 = scmp.lt.s32.totalorder %s15_s29, %s15_s29 }
   0x5   :  { %4421 = sst [smem:[#allocation12_spill]] %s4414_s6  ;;  %p3464_p2 = scmp.lt.s32.totalorder %s3458_s30, %s3458_s30 }
   0x6   :  { %4422 = sst [smem:[#allocation13_spill]] %s4415_s7 }
   0x7   :  { %4423 = sst [smem:[#allocation14_spill]] %s4416_s8  ;;  %p3465_p3 = por %p3464_p2, %p3463_p1 }
   0x9   :  { %p3466_p4 = pnand %p3465_p3, %p3459_p0 }
   0xb   :  { %3469 = shalt.err (!%p3466_p4)  }
   0xc   :  { %s3504_s9 = smov [#allocation6]  }
   0xd   :  { %17 = dma.vmem_to_smem %s15_s29, 64, %s3504_s9, [#allocation5] }
   0xe   :  { %3486 = dma.done.wait [#allocation5], 64 }
   0xf   :  { %3487 = vsyncadd [#allocation5], 4294967232 }
  0x10   :  { %19 = sfence }
  0x11   :  { %s3556_s10 = smov 0   ;;  %s3558_s11 = smov 0  }
  0x12   :  { %s3560_s12 = smov 0  }
  0x13 LB: > { %s37_s0 = sadd.s32 1, %s3494_s11  ;;  %p2852_p5 = scmp.ge.s32.totalorder %s3498_s12, 1  ;;  %s3498_s12 = sphi %s3560_s12, %s25_s12   ;;  %s3494_s11 = sphi %s3558_s11, %s4435_s11   ;;  %s3490_s10 = sphi %s3556_s10, %s4434_s10  }
  0x14   : > { %p39_p6 = scmp.ge.s32.totalorder %s37_s0, 2  ;;  %p285_p7 = scmp.lt.s32.totalorder %s3498_s12, 3 }
  0x16   : > { %s4437_s0 = smov (%p39_p6, %s37_s0), 0  ;;  %p286_p8 = pnand %p2852_p5, %p285_p7 }
  0x17   : > { %s4424_s3 = sld [smem:[#allocation10_spill]] (!%p286_p8)  ;;  %p350_p9 = scmp.lt.s32.totalorder (!%p286_p8), %s3490_s10, 1 }
  0x18   : > { %289 = sbr.rel (%p286_p8) target bundleno = 735 (0x2df), region = 36  ;;  %s4425_s5 = sld [smem:[#allocation11_spill]] (!%p286_p8) }
  0x19   : > { %s4428_s2 = sld [smem:[#allocation9_spill]] (!%p286_p8) }
  0x1a   : > { %s4429_s6 = sld [smem:[#allocation12_spill]] (!%p286_p8) }
  0x1b   : > { %s4430_s7 = sld [smem:[#allocation13_spill]] (!%p286_p8) }
  0x1c   : > { %s4431_s8 = sld [smem:[#allocation14_spill]] (!%p286_p8) }
  0x1d   : > { %v3159_v0 = vld [vmem:[%s4424_s3 + $0xe4] ss:$16 sps:$4 sm:$0xff]   ;;  %v3505_v2 = vmov 0   ;;  %v3163_v3 = vld [vmem:[%s4424_s3 + $0xe0] ss:$16 sps:$4 sm:$0xff]   ;;  %v1245_v5 = vlaneseq  ;;  %s3594_s23 = scalar_select %p350_p9, %s3490_s10, 1 }
  0x1e   : > { %v3161_v1 = vld [vmem:[%s4424_s3 + $0x2e4] ss:$16 sps:$4 sm:$0xff]   ;;  %1102 = vmatprep.mubr.bf16.mxu1 %v3505_v2  ;;  %1017 = vmatprep.subr.bf16.mxu0 %v3159_v0  ;;  %v3164_v4 = vld [vmem:[%s4424_s3 + $0x2e0] ss:$16 sps:$4 sm:$0xff]   ;;  %v3506_v17 = vmov 0.0   ;;  %s4432_s1 = sld [smem:[#allocation8_spill]] }
  0x1f   : > { %1070 = vmatprep.subr.bf16.mxu1 %v3161_v1  ;;  %v3165_v6 = vld [vmem:[%s4424_s3 + $0xc4] ss:$16 sps:$4 sm:$0xff]   ;;  %1018 = vmatpush1.bf16.msra.mxu0 %v3163_v3  ;;  %v3169_v8 = vld [vmem:[%s4424_s3 + $0xc0] ss:$16 sps:$4 sm:$0xff]   ;;  %s3122_s30 = smul.u32 24, %s3594_s23  ;;  %s3101_s9 = sshll.u32 %s3594_s23, 6 }
  0x20   : > { %1071 = vmatpush1.bf16.msra.mxu1 %v3164_v4  ;;  %v3167_v7 = vld [vmem:[%s4424_s3 + $0x2c4] ss:$16 sps:$4 sm:$0xff]   ;;  %1019 = vmatprep.subr.bf16.mxu0 %v3165_v6  ;;  %v3170_v9 = vld [vmem:[%s4424_s3 + $0x2c0] ss:$16 sps:$4 sm:$0xff]   ;;  %s3613_s17 = scalar_lea.vmem %s4425_s5, %s3101_s9  ;;  %vm3616_vm0 = vcmp.lt.s32.totalorder %v1245_v5, 512  ;;  %s3637_s13 = scalar_lea.vmem %s4429_s6, %s3101_s9 }
  0x21   : > { %1072 = vmatprep.subr.bf16.mxu1 %v3167_v7  ;;  %v3171_v10 = vld [vmem:[%s4424_s3 + $0xa4] ss:$16 sps:$4 sm:$0xff]   ;;  %v3175_v13 = vld [vmem:[%s4424_s3 + $0xa0] ss:$16 sps:$4 sm:$0xff]   ;;  %s3632_s27 = scalar_lea.vmem %s4428_s2, %s3122_s30  ;;  %s2859_s16 = sshll.u32 %s3594_s23, 2 }
  0x22   : > { %v3173_v12 = vld [vmem:[%s4424_s3 + $0x2a4] ss:$16 sps:$4 sm:$0xff]   ;;  %v3176_v14 = vld [vmem:[%s4424_s3 + $0x2a0] ss:$16 sps:$4 sm:$0xff]   ;;  %s3649_s21 = scalar_lea.vmem %s4430_s7, %s2859_s16  ;;  %s3654_s24 = scalar_lea.vmem %s4431_s8, %s2859_s16  ;;  %v3212_v39 = vld [vmem:[%s4424_s3 + $0xec] ss:$16 sps:$4 sm:$0xff]  }
  0x23   : > { %1020 = vmatpush1.bf16.msra.mxu0 %v3169_v8  ;;  %v3177_v15 = vld [vmem:[%s4424_s3 + $0x84] ss:$16 sps:$4 sm:$0xff]   ;;  %1249 = vst.msk [vmem:[%s3649_s21] sm:$0xf] %vm3616_vm0, %v3506_v17  ;;  %1250 = vst.msk [vmem:[%s3654_s24] sm:$0xf] %vm3616_vm0, %v3506_v17 }
  0x24   : > { %1073 = vmatpush1.bf16.msra.mxu1 %v3170_v9  ;;  %1021 = vmatprep.subr.bf16.mxu0 %v3171_v10  ;;  %v3179_v16 = vld [vmem:[%s4424_s3 + $0x284] ss:$16 sps:$4 sm:$0xff]   ;;  %v3181_v18 = vld [vmem:[%s4424_s3 + $0x80] ss:$16 sps:$4 sm:$0xff]   ;;  %s3121_s29 = smul.u32 48, %s3594_s23  ;;  %s3943_s9 = smov 0  }
  0x25   : > { %1074 = vmatprep.subr.bf16.mxu1 %v3173_v12  ;;  %v3182_v19 = vld [vmem:[%s4424_s3 + $0x280] ss:$16 sps:$4 sm:$0xff]   ;;  %v3183_v20 = vld [vmem:[%s4424_s3 + $0x64] ss:$16 sps:$4 sm:$0xff]   ;;  %v3210_v41 = vld [vmem:[%s4424_s3 + $0xe8] ss:$16 sps:$4 sm:$0xff]  }
  0x26   : > { %v3185_v21 = vld [vmem:[%s4424_s3 + $0x264] ss:$16 sps:$4 sm:$0xff]   ;;  %v3187_v22 = vld [vmem:[%s4424_s3 + $0x60] ss:$16 sps:$4 sm:$0xff]   ;;  %s3702_s25 = scalar_lea.vmem %s4432_s1, %s3121_s29  ;;  %v3217_v44 = vld [vmem:[%s4424_s3 + $0xcc] ss:$16 sps:$4 sm:$0xff]  }
  0x27   : > { %1022 = vmatpush1.bf16.msra.mxu0 %v3175_v13  ;;  %v3188_v23 = vld [vmem:[%s4424_s3 + $0x260] ss:$16 sps:$4 sm:$0xff]   ;;  %v3189_v24 = vld [vmem:[%s4424_s3 + $0x44] ss:$16 sps:$4 sm:$0xff]   ;;  %v3215_v45 = vld [vmem:[%s4424_s3 + $0xc8] ss:$16 sps:$4 sm:$0xff]  }
  0x28   : > { %1075 = vmatpush1.bf16.msra.mxu1 %v3176_v14  ;;  %1023 = vmatprep.subr.bf16.mxu0 %v3177_v15  ;;  %v3191_v25 = vld [vmem:[%s4424_s3 + $0x244] ss:$16 sps:$4 sm:$0xff]   ;;  %v3193_v26 = vld [vmem:[%s4424_s3 + $0x40] ss:$16 sps:$4 sm:$0xff]   ;;  %v3223_v48 = vld [vmem:[%s4424_s3 + $0xac] ss:$16 sps:$4 sm:$0xff]  }
  0x29   : > { %1076 = vmatprep.subr.bf16.mxu1 %v3179_v16  ;;  %v3194_v27 = vld [vmem:[%s4424_s3 + $0x240] ss:$16 sps:$4 sm:$0xff]   ;;  %v3195_v28 = vld [vmem:[%s4424_s3 + $0x24] ss:$16 sps:$4 sm:$0xff]   ;;  %v3221_v49 = vld [vmem:[%s4424_s3 + $0xa8] ss:$16 sps:$4 sm:$0xff]  }
  0x2a   : > { %v3197_v29 = vld [vmem:[%s4424_s3 + $0x224] ss:$16 sps:$4 sm:$0xff]   ;;  %v3199_v30 = vld [vmem:[%s4424_s3 + $0x20] ss:$16 sps:$4 sm:$0xff]   ;;  %v3229_v52 = vld [vmem:[%s4424_s3 + $0x8c] ss:$16 sps:$4 sm:$0xff]  }
  0x2b   : > { %1024 = vmatpush1.bf16.msra.mxu0 %v3181_v18  ;;  %v3200_v31 = vld [vmem:[%s4424_s3 + $0x220] ss:$16 sps:$4 sm:$0xff]   ;;  %v3201_v32 = vld [vmem:[%s4424_s3 + $0x4] ss:$16 sps:$4 sm:$0xff]   ;;  %v3227_v53 = vld [vmem:[%s4424_s3 + $0x88] ss:$16 sps:$4 sm:$0xff]  }
  0x2c   : > { %1077 = vmatpush1.bf16.msra.mxu1 %v3182_v19  ;;  %1025 = vmatprep.subr.bf16.mxu0 %v3183_v20  ;;  %v3203_v33 = vld [vmem:[%s4424_s3 + $0x204] ss:$16 sps:$4 sm:$0xff]   ;;  %v3205_v34 = vld [vmem:[%s4424_s3] ss:$16 sps:$4 sm:$0xff]   ;;  %v3235_v57 = vld [vmem:[%s4424_s3 + $0x6c] ss:$16 sps:$4 sm:$0xff]  }
  0x2d   : > { %1078 = vmatprep.subr.bf16.mxu1 %v3185_v21  ;;  %v3206_v35 = vld [vmem:[%s4424_s3 + $0x200] ss:$16 sps:$4 sm:$0xff]   ;;  %v3207_v38 = vld [vmem:[%s4424_s3 + $0x1e4] ss:$16 sps:$4 sm:$0xff]   ;;  %v3233_v58 = vld [vmem:[%s4424_s3 + $0x68] ss:$16 sps:$4 sm:$0xff]  }
  0x2e   : > { %v469_v36 = vld [vmem:[%s4424_s3 + $0x1e0] sm:$0xff]  ;;  %v471_v37 = vld [vmem:[%s4424_s3 + $0x1f0] sm:$0xff]  ;;  %v3241_v61 = vld [vmem:[%s4424_s3 + $0x4c] ss:$16 sps:$4 sm:$0xff]  }
  0x2f   : > { %1026 = vmatpush1.bf16.msra.mxu0 %v3187_v22  ;;  %v3735_v40 = vld [vmem:[%s3702_s25 + $0x8] ss:$12 sps:$4 sm:$0xff]   ;;  %v2927_v42 = vcombine.low %v469_v36, %v471_v37  ;;  %v3218_v46 = vld [vmem:[%s4424_s3 + $0x1c0] ss:$16 sps:$4 sm:$0xff]   ;;  %v3247_v1 = vld [vmem:[%s4424_s3 + $0x2c] ss:$16 sps:$4 sm:$0xff]  }
  0x30   : > { %1079 = vmatpush1.bf16.msra.mxu1 %v3188_v23  ;;  %1027 = vmatprep.subr.bf16.mxu0 %v3189_v24  ;;  %v3213_v43 = vld [vmem:[%s4424_s3 + $0x1c4] ss:$16 sps:$4 sm:$0xff]   ;;  %v3224_v50 = vld [vmem:[%s4424_s3 + $0x1a0] ss:$16 sps:$4 sm:$0xff]   ;;  %v3239_v62 = vld [vmem:[%s4424_s3 + $0x48] ss:$16 sps:$4 sm:$0xff]  }
  0x31   : > { %1080 = vmatprep.subr.bf16.mxu1 %v3191_v25  ;;  %v3219_v47 = vld [vmem:[%s4424_s3 + $0x1a4] ss:$16 sps:$4 sm:$0xff]   ;;  %v3230_v54 = vld [vmem:[%s4424_s3 + $0x180] ss:$16 sps:$4 sm:$0xff]   ;;  %v3245_v3 = vld [vmem:[%s4424_s3 + $0x28] ss:$16 sps:$4 sm:$0xff]  }
  0x32   : > { %v3225_v51 = vld [vmem:[%s4424_s3 + $0x184] ss:$16 sps:$4 sm:$0xff]   ;;  %v3236_v59 = vld [vmem:[%s4424_s3 + $0x160] ss:$16 sps:$4 sm:$0xff]   ;;  %v3253_v7 = vld [vmem:[%s4424_s3 + $0xc] ss:$16 sps:$4 sm:$0xff]  }
  0x33   : > { %1028 = vmatpush1.bf16.msra.mxu0 %v3193_v26  ;;  %v3257_v55 = vld [vmem:[%s3702_s25 + $0x4] ss:$12 sps:$4 sm:$0xff]   ;;  %v3251_v8 = vld [vmem:[%s4424_s3 + $0x8] ss:$16 sps:$4 sm:$0xff]   ;;  %v3828_v10 = vld [vmem:[%s3702_s25 + $0x20] ss:$12 sps:$4 sm:$0xff]  }
  0x34   : > { %1081 = vmatpush1.bf16.msra.mxu1 %v3194_v27  ;;  %1029 = vmatprep.subr.bf16.mxu0 %v3195_v28  ;;  %v3231_v56 = vld [vmem:[%s4424_s3 + $0x164] ss:$16 sps:$4 sm:$0xff]   ;;  %v3242_v63 = vld [vmem:[%s4424_s3 + $0x140] ss:$16 sps:$4 sm:$0xff]   ;;  %v3260_v12 = vld [vmem:[%s4424_s3 + $0x1ec] ss:$16 sps:$4 sm:$0xff]  }
  0x35   : > { %1082 = vmatprep.subr.bf16.mxu1 %v3197_v29  ;;  %1049 = vmatprep.mubr.bf16.mxu0 %v3257_v55  ;;  %v3237_v60 = vld [vmem:[%s4424_s3 + $0x144] ss:$16 sps:$4 sm:$0xff]   ;;  %v3248_v4 = vld [vmem:[%s4424_s3 + $0x120] ss:$16 sps:$4 sm:$0xff]   ;;  %v3263_v13 = vld [vmem:[%s4424_s3 + $0x2ec] ss:$16 sps:$4 sm:$0xff]  }
  0x36   : > { %v3243_v0 = vld [vmem:[%s4424_s3 + $0x124] ss:$16 sps:$4 sm:$0xff]   ;;  %v3254_v9 = vld [vmem:[%s4424_s3 + $0x100] ss:$16 sps:$4 sm:$0xff]   ;;  %v3258_v15 = vld [vmem:[%s4424_s3 + $0x1e8] ss:$16 sps:$4 sm:$0xff]  }
  0x37   : > { %1030 = vmatpush1.bf16.msra.mxu0 %v3199_v30  ;;  %v3249_v6 = vld [vmem:[%s4424_s3 + $0x104] ss:$16 sps:$4 sm:$0xff]   ;;  %v3837_v14 = vld [vmem:[%s3702_s25] ss:$12 sps:$4 sm:$0xff]   ;;  %v3261_v16 = vld [vmem:[%s4424_s3 + $0x2e8] ss:$16 sps:$4 sm:$0xff]  }
  0x38   : > { %1083 = vmatpush1.bf16.msra.mxu1 %v3200_v31  ;;  %1031 = vmatprep.subr.bf16.mxu0 %v3201_v32  ;;  %v3266_v17 = vld [vmem:[%s4424_s3 + $0x1cc] ss:$16 sps:$4 sm:$0xff]   ;;  %v3264_v20 = vld [vmem:[%s4424_s3 + $0x1c8] ss:$16 sps:$4 sm:$0xff]  }
  0x39   : > { %1084 = vmatprep.subr.bf16.mxu1 %v3203_v33  ;;  %v3269_v18 = vld [vmem:[%s4424_s3 + $0x2cc] ss:$16 sps:$4 sm:$0xff]   ;;  %v3267_v21 = vld [vmem:[%s4424_s3 + $0x2c8] ss:$16 sps:$4 sm:$0xff]  }
  0x3a   : > { %v3853_v19 = vld [vmem:[%s3702_s25 + $0x1c] ss:$12 sps:$4 sm:$0xff]   ;;  %v3290_v24 = vld [vmem:[%s3702_s25 + $0x18] ss:$12 sps:$4 sm:$0xff]  }
  0x3b   : > { %1032 = vmatpush1.bf16.msra.mxu0 %v3205_v34  ;;  %v3272_v22 = vld [vmem:[%s4424_s3 + $0x1ac] ss:$16 sps:$4 sm:$0xff]   ;;  %v3270_v25 = vld [vmem:[%s4424_s3 + $0x1a8] ss:$16 sps:$4 sm:$0xff]  }
  0x3c   : > { %1085 = vmatpush1.bf16.msra.mxu1 %v3206_v35  ;;  %1033 = vmatprep.subr.bf16.mxu0 %v3207_v38  ;;  %v3275_v23 = vld [vmem:[%s4424_s3 + $0x2ac] ss:$16 sps:$4 sm:$0xff]   ;;  %v3273_v26 = vld [vmem:[%s4424_s3 + $0x2a8] ss:$16 sps:$4 sm:$0xff]  }
  0x3d   : > { %1123 = vmatprep.subr.bf16.mxu1 %v3212_v39  ;;  %v3278_v27 = vld [vmem:[%s4424_s3 + $0x18c] ss:$16 sps:$4 sm:$0xff]   ;;  %v3276_v29 = vld [vmem:[%s4424_s3 + $0x188] ss:$16 sps:$4 sm:$0xff]  }
  0x3e   : > { %v3281_v28 = vld [vmem:[%s4424_s3 + $0x28c] ss:$16 sps:$4 sm:$0xff]   ;;  %v3279_v30 = vld [vmem:[%s4424_s3 + $0x288] ss:$16 sps:$4 sm:$0xff]  }
  0x3f   : > { %1103 = vmatmul.mubr.bf16.vlgmr.msra.gmra.mxu1 %v3735_v40  ;;  %1034 = vmatpush2.bf16.msra.mxu0 %v2927_v42  ;;  %v3284_v31 = vld [vmem:[%s4424_s3 + $0x16c] ss:$16 sps:$4 sm:$0xff]   ;;  %v3282_v33 = vld [vmem:[%s4424_s3 + $0x168] ss:$16 sps:$4 sm:$0xff]  }
  0x40   : > { %1124 = vmatpush1.bf16.msra.mxu1 %v3210_v41  ;;  %1035 = vmatprep.subr.bf16.mxu0 %v3213_v43  ;;  %v3287_v32 = vld [vmem:[%s4424_s3 + $0x26c] ss:$16 sps:$4 sm:$0xff]   ;;  %v3285_v34 = vld [vmem:[%s4424_s3 + $0x268] ss:$16 sps:$4 sm:$0xff]  }
  0x41   : > { %1125 = vmatprep.subr.bf16.mxu1 %v3217_v44  ;;  %1112 = vmatprep.mubr.bf16.mxu1 %v3505_v2  ;;  %v3294_v35 = vld [vmem:[%s4424_s3 + $0x14c] ss:$16 sps:$4 sm:$0xff]   ;;  %v3292_v37 = vld [vmem:[%s4424_s3 + $0x148] ss:$16 sps:$4 sm:$0xff]  }
  0x42   : > { %v3297_v36 = vld [vmem:[%s4424_s3 + $0x24c] ss:$16 sps:$4 sm:$0xff]   ;;  %v3295_v38 = vld [vmem:[%s4424_s3 + $0x248] ss:$16 sps:$4 sm:$0xff]  }
  0x43   : > { %1036 = vmatpush2.bf16.msra.mxu0 %v3218_v46  ;;  %v3300_v39 = vld [vmem:[%s4424_s3 + $0x12c] ss:$16 sps:$4 sm:$0xff]   ;;  %v3298_v42 = vld [vmem:[%s4424_s3 + $0x128] ss:$16 sps:$4 sm:$0xff]  }
  0x44   : > { %1126 = vmatpush1.bf16.msra.mxu1 %v3215_v45  ;;  %1037 = vmatprep.subr.bf16.mxu0 %v3219_v47  ;;  %v3303_v41 = vld [vmem:[%s4424_s3 + $0x22c] ss:$16 sps:$4 sm:$0xff]   ;;  %v3301_v43 = vld [vmem:[%s4424_s3 + $0x228] ss:$16 sps:$4 sm:$0xff]  }
  0x45   : > { %1127 = vmatprep.subr.bf16.mxu1 %v3223_v48  ;;  %v3306_v44 = vld [vmem:[%s4424_s3 + $0x10c] ss:$16 sps:$4 sm:$0xff]   ;;  %v3304_v46 = vld [vmem:[%s4424_s3 + $0x108] ss:$16 sps:$4 sm:$0xff]  }
  0x46   : > { %v3309_v45 = vld [vmem:[%s4424_s3 + $0x20c] ss:$16 sps:$4 sm:$0xff]   ;;  %v3307_v47 = vld [vmem:[%s4424_s3 + $0x208] ss:$16 sps:$4 sm:$0xff]  }
  0x47   : > { %1038 = vmatpush2.bf16.msra.mxu0 %v3224_v50  ;;  %1113 = vmatmul.mubr.bf16.gmra.mxu1 %v3828_v10 }
  0x48   : > { %1128 = vmatpush1.bf16.msra.mxu1 %v3221_v49  ;;  %1039 = vmatprep.subr.bf16.mxu0 %v3225_v51 }
  0x49   : > { %1129 = vmatprep.subr.bf16.mxu1 %v3229_v52  ;;  %1155 = vmatprep.mubr.bf16.mxu1 %v3257_v55 }
  0x4b   : > { %1040 = vmatpush2.bf16.msra.mxu0 %v3230_v54 }
  0x4c   : > { %1130 = vmatpush1.bf16.msra.mxu1 %v3227_v53  ;;  %1041 = vmatprep.subr.bf16.mxu0 %v3231_v56 }
  0x4d   : > { %1131 = vmatprep.subr.bf16.mxu1 %v3235_v57 }
  0x4f   : > { %1042 = vmatpush2.bf16.msra.mxu0 %v3236_v59 }
  0x50   : > { %1132 = vmatpush1.bf16.msra.mxu1 %v3233_v58  ;;  %1043 = vmatprep.subr.bf16.mxu0 %v3237_v60 }
  0x51   : > { %1133 = vmatprep.subr.bf16.mxu1 %v3241_v61 }
  0x53   : > { %1044 = vmatpush2.bf16.msra.mxu0 %v3242_v63 }
  0x54   : > { %1134 = vmatpush1.bf16.msra.mxu1 %v3239_v62  ;;  %1045 = vmatprep.subr.bf16.mxu0 %v3243_v0 }
  0x55   : > { %1135 = vmatprep.subr.bf16.mxu1 %v3247_v1 }
  0x57   : > { %1046 = vmatpush2.bf16.msra.mxu0 %v3248_v4 }
  0x58   : > { %1136 = vmatpush1.bf16.msra.mxu1 %v3245_v3  ;;  %1047 = vmatprep.subr.bf16.mxu0 %v3249_v6 }
  0x59   : > { %1137 = vmatprep.subr.bf16.mxu1 %v3253_v7 }
  0x5b   : > { %1048 = vmatpush2.bf16.msra.mxu0 %v3254_v9 }
  0x5c   : > { %1138 = vmatpush1.bf16.msra.mxu1 %v3251_v8  ;;  %1176 = vmatprep.subr.bf16.mxu0 %v3263_v13 }
  0x5d   : > { %1139 = vmatprep.subr.bf16.mxu1 %v3260_v12 }
  0x5e   : > { %1050 = vmatmul.mubr.bf16.vlgmr.msra.gmra.mxu0 %v3837_v14 }
  0x5f   : > { %1177 = vmatpush1.bf16.msra.mxu0 %v3261_v16  ;;  %1059 = vmatprep.mubr.bf16.mxu0 %v3853_v19 }
  0x60   : > { %1140 = vmatpush2.bf16.msra.mxu1 %v3258_v15  ;;  %1178 = vmatprep.subr.bf16.mxu0 %v3269_v18 }
  0x61   : > { %1141 = vmatprep.subr.bf16.mxu1 %v3266_v17 }
  0x63   : > { %1179 = vmatpush1.bf16.msra.mxu0 %v3267_v21 }
  0x64   : > { %1142 = vmatpush2.bf16.msra.mxu1 %v3264_v20  ;;  %1180 = vmatprep.subr.bf16.mxu0 %v3275_v23 }
  0x65   : > { %1143 = vmatprep.subr.bf16.mxu1 %v3272_v22 }
  0x66   : > { %1060 = vmatmul.mubr.bf16.gmra.mxu0 %v3290_v24 }
  0x67   : > { %1181 = vmatpush1.bf16.msra.mxu0 %v3273_v26  ;;  %1208 = vmatprep.mubr.bf16.mxu0 %v3505_v2 }
  0x68   : > { %1144 = vmatpush2.bf16.msra.mxu1 %v3270_v25  ;;  %1182 = vmatprep.subr.bf16.mxu0 %v3281_v28 }
  0x69   : > { %1145 = vmatprep.subr.bf16.mxu1 %v3278_v27 }
  0x6b   : > { %1183 = vmatpush1.bf16.msra.mxu0 %v3279_v30 }
  0x6c   : > { %1146 = vmatpush2.bf16.msra.mxu1 %v3276_v29  ;;  %1184 = vmatprep.subr.bf16.mxu0 %v3287_v32 }
  0x6d   : > { %1147 = vmatprep.subr.bf16.mxu1 %v3284_v31 }
  0x6f   : > { %1185 = vmatpush1.bf16.msra.mxu0 %v3285_v34 }
  0x70   : > { %1148 = vmatpush2.bf16.msra.mxu1 %v3282_v33  ;;  %1186 = vmatprep.subr.bf16.mxu0 %v3297_v36 }
  0x71   : > { %1149 = vmatprep.subr.bf16.mxu1 %v3294_v35 }
  0x73   : > { %1187 = vmatpush1.bf16.msra.mxu0 %v3295_v38 }
  0x74   : > { %1150 = vmatpush2.bf16.msra.mxu1 %v3292_v37  ;;  %1188 = vmatprep.subr.bf16.mxu0 %v3303_v41 }
  0x75   : > { %1151 = vmatprep.subr.bf16.mxu1 %v3300_v39 }
  0x77   : > { %1189 = vmatpush1.bf16.msra.mxu0 %v3301_v43 }
  0x78   : > { %1152 = vmatpush2.bf16.msra.mxu1 %v3298_v42  ;;  %1190 = vmatprep.subr.bf16.mxu0 %v3309_v45 }
  0x79   : > { %1153 = vmatprep.subr.bf16.mxu1 %v3306_v44 }
  0x7b   : > { %1191 = vmatpush1.bf16.msra.mxu0 %v3307_v47 }
  0x7c   : > { %1154 = vmatpush2.bf16.msra.mxu1 %v3304_v46 }
  0x7e   : > { %1209 = vmatmul.mubr.bf16.vlgmr.msra.gmra.mxu0 %v3735_v40 }
  0x7f   : > { %1156 = vmatmul.mubr.bf16.vlgmr.msra.gmra.mxu1 %v3837_v14  ;;  %1218 = vmatprep.mubr.bf16.mxu0 %v3505_v2 }
  0x80   : > { %1165 = vmatprep.mubr.bf16.mxu1 %v3853_v19 }
  0x86   : > { %1219 = vmatmul.mubr.bf16.gmra.mxu0 %v3828_v10 }
  0x87   : > { %1166 = vmatmul.mubr.bf16.gmra.mxu1 %v3290_v24 }
  0xff   : > { %v1104_v48 = vpop.f32.mrf.mxu1 }
 0x101   : > { %v1106_v49 = vpop.f32.mrf.mxu1 }
 0x103   : > { %v1108_v50 = vpop.f32.mrf.mxu1 }
 0x105   : > { %v1110_v51 = vpop.f32.mrf.mxu1 }
 0x107   : > { %v1114_v53 = vpop.f32.mrf.mxu1 }
 0x109   : > { %v1116_v40 = vpop.f32.mrf.mxu1 }
 0x10b   : > { %v1118_v62 = vpop.f32.mrf.mxu1 }
 0x10d   : > { %v1120_v4 = vpop.f32.mrf.mxu1 }
 0x11e   : > { %v1051_v52 = vpop.f32.mrf.mxu0 }
 0x11f   : > { %v1105_v54 = vadd.f32 %v1104_v48, %v1051_v52 }
 0x120   : > { %v1053_v55 = vpop.f32.mrf.mxu0 }
 0x121   : > { %1229 = vst [vmem:[#allocation2] sm:$0xff] %v1105_v54  ;;  %v1107_v56 = vadd.f32 %v1106_v49, %v1053_v55 }
 0x122   : > { %v1055_v57 = vpop.f32.mrf.mxu0 }
 0x123   : > { %1230 = vst [vmem:[#allocation2 + $0x8] sm:$0xff] %v1107_v56  ;;  %v1109_v58 = vadd.f32 %v1108_v50, %v1055_v57 }
 0x124   : > { %v1057_v59 = vpop.f32.mrf.mxu0 }
 0x125   : > { %1233 = vst [vmem:[#allocation2 + $0x20] sm:$0xff] %v1109_v58  ;;  %v1111_v60 = vadd.f32 %v1110_v51, %v1057_v59 }
 0x126   : > { %v1061_v61 = vpop.f32.mrf.mxu0 }
 0x127   : > { %1234 = vst [vmem:[#allocation2 + $0x28] sm:$0xff] %v1111_v60  ;;  %v1115_v63 = vadd.f32 %v1114_v53, %v1061_v61 }
 0x128   : > { %v1063_v0 = vpop.f32.mrf.mxu0 }
 0x129   : > { %1237 = vst [vmem:[#allocation2 + $0x40] sm:$0xff] %v1115_v63  ;;  %v1117_v1 = vadd.f32 %v1116_v40, %v1063_v0 }
 0x12a   : > { %v1065_v3 = vpop.f32.mrf.mxu0 }
 0x12b   : > { %1238 = vst [vmem:[#allocation2 + $0x48] sm:$0xff] %v1117_v1  ;;  %v1119_v6 = vadd.f32 %v1118_v62, %v1065_v3 }
 0x12c   : > { %v1067_v7 = vpop.f32.mrf.mxu0 }
 0x12d   : > { %1241 = vst [vmem:[#allocation2 + $0x60] sm:$0xff] %v1119_v6  ;;  %v1121_v8 = vadd.f32 %v1120_v4, %v1067_v7 }
 0x12f   : > { %1242 = vst [vmem:[#allocation2 + $0x68] sm:$0xff] %v1121_v8 }
 0x13e   : > { %v1210_v10 = vpop.f32.mrf.mxu0 }
 0x13f   : > { %v1157_v9 = vpop.f32.mrf.mxu1 }
 0x140   : > { %v1211_v12 = vadd.f32 %v1210_v10, %v1157_v9  ;;  %v1212_v14 = vpop.f32.mrf.mxu0 }
 0x141   : > { %v1159_v13 = vpop.f32.mrf.mxu1 }
 0x142   : > { %1231 = vst [vmem:[#allocation2 + $0x10] sm:$0xff] %v1211_v12  ;;  %v1213_v15 = vadd.f32 %v1212_v14, %v1159_v13  ;;  %v1214_v17 = vpop.f32.mrf.mxu0 }
 0x143   : > { %v1161_v16 = vpop.f32.mrf.mxu1 }
 0x144   : > { %1232 = vst [vmem:[#allocation2 + $0x18] sm:$0xff] %v1213_v15  ;;  %v1215_v18 = vadd.f32 %v1214_v17, %v1161_v16  ;;  %v1216_v20 = vpop.f32.mrf.mxu0 }
 0x145   : > { %v1163_v19 = vpop.f32.mrf.mxu1 }
 0x146   : > { %1235 = vst [vmem:[#allocation2 + $0x30] sm:$0xff] %v1215_v18  ;;  %v1217_v21 = vadd.f32 %v1216_v20, %v1163_v19  ;;  %v1220_v23 = vpop.f32.mrf.mxu0 }
 0x147   : > { %v1167_v22 = vpop.f32.mrf.mxu1 }
 0x148   : > { %1236 = vst [vmem:[#allocation2 + $0x38] sm:$0xff] %v1217_v21  ;;  %v1221_v24 = vadd.f32 %v1220_v23, %v1167_v22  ;;  %v1222_v26 = vpop.f32.mrf.mxu0 }
 0x149   : > { %v1169_v25 = vpop.f32.mrf.mxu1 }
 0x14a   : > { %1239 = vst [vmem:[#allocation2 + $0x50] sm:$0xff] %v1221_v24  ;;  %v1223_v27 = vadd.f32 %v1222_v26, %v1169_v25  ;;  %v1224_v29 = vpop.f32.mrf.mxu0 }
 0x14b   : > { %v1171_v28 = vpop.f32.mrf.mxu1 }
 0x14c   : > { %1240 = vst [vmem:[#allocation2 + $0x58] sm:$0xff] %v1223_v27  ;;  %v1225_v30 = vadd.f32 %v1224_v29, %v1171_v28  ;;  %v1226_v32 = vpop.f32.mrf.mxu0 }
 0x14d   : > { %v1173_v31 = vpop.f32.mrf.mxu1 }
 0x14e   : > { %1243 = vst [vmem:[#allocation2 + $0x70] sm:$0xff] %v1225_v30  ;;  %v1227_v33 = vadd.f32 %v1226_v32, %v1173_v31 }
 0x150   : > { %1244 = vst [vmem:[#allocation2 + $0x78] sm:$0xff] %v1227_v33 }
 0x151 LB: >> { %s2965_s23 = sshll.u32 %s3502_s9, 4  ;;  %s4433_s20 = sshll.u32 %s3490_s10, 8  ;;  %s3502_s9 = sphi %s3943_s9, %s1260_s9  }
 0x152   : >> { %s3951_s22 = sadd.s32 %s4433_s20, %s2965_s23 }
 0x153   : >> { %s1263_s26 = sld [smem:[#allocation6 + %s3951_s22]]  ;;  %s1274_s28 = sadd.s32 1, %s3951_s22 }
 0x154   : >> { %s1275_s25 = sld [smem:[#allocation6 + %s1274_s28]]  ;;  %s1290_s14 = sadd.s32 2, %s3951_s22 }
 0x155   : >> { %s1291_s15 = sld [smem:[#allocation6 + %s1290_s14]]  ;;  %s1306_s16 = sadd.s32 3, %s3951_s22 }
 0x156   : >> { %s3957_s18 = sld [smem:[#allocation6 + %s1306_s16]]  ;;  %s1322_s19 = sadd.s32 4, %s3951_s22 }
 0x157   : >> { %s3960_s29 = sld [smem:[#allocation6 + %s1322_s19]]  ;;  %s1338_s30 = sadd.s32 5, %s3951_s22 }
 0x158   : >> { %s3963_s23 = sld [smem:[#allocation6 + %s1338_s30]]  ;;  %s1354_s20 = sadd.s32 6, %s3951_s22 }
 0x159   : >> { %s1264_s1 = sshra.s32 %s1263_s26, 3  ;;  %s1267_s2 = sand.u32 7, %s1263_s26 }
 0x15a   : >> { %s3104_s3 = sshll.u32 %s1264_s1, 5  ;;  %s1276_s5 = sshra.s32 %s1275_s25, 3 }
 0x15b   : >> { %s1270_s6 = sadd.s32 %s3104_s3, %s1267_s2  ;;  %s1279_s28 = sand.u32 7, %s1275_s25 }
 0x15c   : >> { %s3105_s7 = sshll.u32 %s1276_s5, 5  ;;  %s1271_s14 = scalar_lea.vmem [#allocation2], %s1270_s6 }
 0x15d   : >> { %v3966_v34 = vld [vmem:[%s1271_s14] ss:$8 sm:$0xf]  ;;  %s1282_s16 = sadd.s32 %s3105_s7, %s1279_s28  ;;  %s1292_s8 = sshra.s32 %s1291_s15, 3 }
 0x15e   : >> { %s1295_s19 = sand.u32 7, %s1291_s15  ;;  %v1273_v35 = vmul.f32 %v3966_v34, %v3966_v34  ;;  %s1283_s30 = scalar_lea.vmem [#allocation2], %s1282_s16 }
 0x15f   : >> { %v3970_v36 = vld [vmem:[%s1283_s30] ss:$8 sm:$0xf]  ;;  %s3106_s1 = sshll.u32 %s1292_s8, 5  ;;  %s1308_s26 = sshra.s32 %s3957_s18, 3 }
 0x160   : >> { %v1285_v37 = vmax.f32 %v3966_v34, %v3970_v36  ;;  %s1298_s2 = sadd.s32 %s3106_s1, %s1295_s19  ;;  %s1311_s3 = sand.u32 7, %s3957_s18  ;;  %v1287_v38 = vadd.f32 %v3970_v36, %v3966_v34  ;;  %v1288_v39 = vmul.f32 %v3970_v36, %v3970_v36 }
 0x161   : >> { %s3107_s5 = sshll.u32 %s1308_s26, 5  ;;  %s1299_s6 = scalar_lea.vmem [#allocation2], %s1298_s2 }
 0x162   : >> { %v1300_v41 = vld [vmem:[%s1299_s6] ss:$8 sm:$0xf]  ;;  %s1314_s7 = sadd.s32 %s3107_s5, %s1311_s3  ;;  %s1324_s25 = sshra.s32 %s3960_s29, 3  ;;  %v1289_v42 = vadd.f32 %v1288_v39, %v1273_v35 }
 0x163   : >> { %v1301_v43 = vmax.f32 %v1285_v37, %v1300_v41  ;;  %s1327_s8 = sand.u32 7, %s3960_s29  ;;  %v1303_v44 = vadd.f32 %v1300_v41, %v1287_v38  ;;  %v1304_v45 = vmul.f32 %v1300_v41, %v1300_v41  ;;  %s1315_s15 = scalar_lea.vmem [#allocation2], %s1314_s7 }
 0x164   : >> { %v1316_v46 = vld [vmem:[%s1315_s15] ss:$8 sm:$0xf]  ;;  %s3108_s18 = sshll.u32 %s1324_s25, 5  ;;  %s1340_s28 = sshra.s32 %s3963_s23, 3 }
 0x165   : >> { %s1330_s14 = sadd.s32 %s3108_s18, %s1327_s8  ;;  %s1343_s16 = sand.u32 7, %s3963_s23  ;;  %v1305_v47 = vadd.f32 %v1304_v45, %v1289_v42  ;;  %v1302_v48 = vmin.f32 %v1316_v46, %v1300_v41  ;;  %v1317_v49 = vmax.f32 %v1301_v43, %v1316_v46  ;;  %v1319_v50 = vadd.f32 %v1316_v46, %v1303_v44 }
 0x166   : >> { %s3109_s19 = sshll.u32 %s1340_s28, 5  ;;  %v1320_v51 = vmul.f32 %v1316_v46, %v1316_v46  ;;  %s1331_s30 = scalar_lea.vmem [#allocation2], %s1330_s14 }
 0x167   : >> { %v1332_v52 = vld [vmem:[%s1331_s30] ss:$8 sm:$0xf]  ;;  %s1346_s29 = sadd.s32 %s3109_s19, %s1343_s16  ;;  %s1355_s1 = sld [smem:[#allocation6 + %s1354_s20]] }
 0x168   : >> { %s1370_s26 = sadd.s32 7, %s3951_s22  ;;  %v1321_v53 = vadd.f32 %v1320_v51, %v1305_v47  ;;  %s1347_s2 = scalar_lea.vmem [#allocation2], %s1346_s29  ;;  %v1336_v55 = vmul.f32 %v1332_v52, %v1332_v52  ;;  %v1318_v56 = vmin.f32 %v1302_v48, %v1332_v52  ;;  %v1333_v57 = vmax.f32 %v1317_v49, %v1332_v52 }
 0x169   : >> { %v1348_v54 = vld [vmem:[%s1347_s2] ss:$8 sm:$0xf]  ;;  %s3987_s23 = sld [smem:[#allocation6 + %s1370_s26]]  ;;  %s1386_s3 = sadd.s32 8, %s3951_s22  ;;  %v1335_v40 = vadd.f32 %v1332_v52, %v1319_v50 }
 0x16a   : >> { %s3990_s5 = sld [smem:[#allocation6 + %s1386_s3]]  ;;  %s1402_s6 = sadd.s32 9, %s3951_s22  ;;  %v1337_v58 = vadd.f32 %v1336_v55, %v1321_v53  ;;  %v1352_v59 = vmul.f32 %v1348_v54, %v1348_v54  ;;  %v1334_v60 = vmin.f32 %v1318_v56, %v1348_v54  ;;  %v1349_v61 = vmax.f32 %v1333_v57, %v1348_v54 }
 0x16b   : >> { %s3993_s7 = sld [smem:[#allocation6 + %s1402_s6]]  ;;  %s1418_s20 = sadd.s32 10, %s3951_s22  ;;  %v1351_v62 = vadd.f32 %v1348_v54, %v1335_v40  ;;  %v1286_v40 = vmin.f32 %v3966_v34, %v3970_v36 }
 0x16c   : >> { %s3996_s25 = sld [smem:[#allocation6 + %s1418_s20]]  ;;  %s1434_s8 = sadd.s32 11, %s3951_s22  ;;  %v1353_v63 = vadd.f32 %v1352_v59, %v1337_v58 }
 0x16d   : >> { %s1356_s15 = sshra.s32 %s1355_s1, 3  ;;  %s1359_s18 = sand.u32 7, %s1355_s1 }
 0x16e   : >> { %s3110_s28 = sshll.u32 %s1356_s15, 5  ;;  %s3999_s14 = sld [smem:[#allocation6 + %s1434_s8]] }
 0x16f   : >> { %s1362_s16 = sadd.s32 %s3110_s28, %s1359_s18  ;;  %s1372_s19 = sshra.s32 %s3987_s23, 3 }
 0x170   : >> { %s1375_s30 = sand.u32 7, %s3987_s23  ;;  %s1363_s29 = scalar_lea.vmem [#allocation2], %s1362_s16 }
 0x171   : >> { %v1364_v0 = vld [vmem:[%s1363_s29] ss:$8 sm:$0xf]  ;;  %s3111_s26 = sshll.u32 %s1372_s19, 5  ;;  %s1388_s2 = sshra.s32 %s3990_s5, 3 }
 0x172   : >> { %v1350_v1 = vmin.f32 %v1334_v60, %v1364_v0  ;;  %v1365_v3 = vmax.f32 %v1349_v61, %v1364_v0  ;;  %s1378_s1 = sadd.s32 %s3111_s26, %s1375_s30  ;;  %s1391_s3 = sand.u32 7, %s3990_s5  ;;  %v1367_v4 = vadd.f32 %v1364_v0, %v1351_v62  ;;  %v1368_v6 = vmul.f32 %v1364_v0, %v1364_v0 }
 0x173   : >> { %s3112_s6 = sshll.u32 %s1388_s2, 5  ;;  %s1379_s20 = scalar_lea.vmem [#allocation2], %s1378_s1 }
 0x174   : >> { %v1380_v7 = vld [vmem:[%s1379_s20] ss:$8 sm:$0xf]  ;;  %s1394_s8 = sadd.s32 %s3112_s6, %s1391_s3  ;;  %s1404_s23 = sshra.s32 %s3993_s7, 3  ;;  %v1369_v8 = vadd.f32 %v1368_v6, %v1353_v63 }
 0x175   : >> { %v1366_v9 = vmin.f32 %v1350_v1, %v1380_v7  ;;  %v1381_v10 = vmax.f32 %v1365_v3, %v1380_v7  ;;  %s1407_s15 = sand.u32 7, %s3993_s7  ;;  %v1383_v12 = vadd.f32 %v1380_v7, %v1367_v4  ;;  %v1384_v13 = vmul.f32 %v1380_v7, %v1380_v7  ;;  %s1395_s18 = scalar_lea.vmem [#allocation2], %s1394_s8 }
 0x176   : >> { %v1396_v14 = vld [vmem:[%s1395_s18] ss:$8 sm:$0xf]  ;;  %s3113_s5 = sshll.u32 %s1404_s23, 5  ;;  %s1420_s28 = sshra.s32 %s3996_s25, 3 }
 0x177   : >> { %v1382_v15 = vmin.f32 %v1366_v9, %v1396_v14  ;;  %v1397_v16 = vmax.f32 %v1381_v10, %v1396_v14  ;;  %s1410_s16 = sadd.s32 %s3113_s5, %s1407_s15  ;;  %s1423_s19 = sand.u32 7, %s3996_s25  ;;  %v1399_v17 = vadd.f32 %v1396_v14, %v1383_v12  ;;  %v1385_v18 = vadd.f32 %v1384_v13, %v1369_v8 }
 0x178   : >> { %s3114_s30 = sshll.u32 %s1420_s28, 5  ;;  %v1400_v19 = vmul.f32 %v1396_v14, %v1396_v14  ;;  %s1411_s29 = scalar_lea.vmem [#allocation2], %s1410_s16 }
 0x179   : >> { %v1412_v20 = vld [vmem:[%s1411_s29] ss:$8 sm:$0xf]  ;;  %s1426_s7 = sadd.s32 %s3114_s30, %s1423_s19  ;;  %s1436_s26 = sshra.s32 %s3999_s14, 3 }
 0x17a   : >> { %s1439_s2 = sand.u32 7, %s3999_s14  ;;  %v1401_v21 = vadd.f32 %v1400_v19, %v1385_v18  ;;  %v1398_v22 = vmin.f32 %v1382_v15, %v1412_v20  ;;  %v1413_v23 = vmax.f32 %v1397_v16, %v1412_v20  ;;  %s1427_s1 = scalar_lea.vmem [#allocation2], %s1426_s7  ;;  %v1415_v25 = vadd.f32 %v1412_v20, %v1399_v17 }
 0x17b   : >> { %v1428_v24 = vld [vmem:[%s1427_s1] ss:$8 sm:$0xf]  ;;  %s3115_s3 = sshll.u32 %s1436_s26, 5  ;;  %s1450_s25 = sadd.s32 12, %s3951_s22  ;;  %v1416_v26 = vmul.f32 %v1412_v20, %v1412_v20 }
 0x17c   : >> { %s1442_s6 = sadd.s32 %s3115_s3, %s1439_s2  ;;  %s1451_s20 = sld [smem:[#allocation6 + %s1450_s25]]  ;;  %v1432_v28 = vmul.f32 %v1428_v24, %v1428_v24  ;;  %v1414_v30 = vmin.f32 %v1398_v22, %v1428_v24  ;;  %v1429_v31 = vmax.f32 %v1413_v23, %v1428_v24  ;;  %v1431_v32 = vadd.f32 %v1428_v24, %v1415_v25 }
 0x17d   : >> { %s1466_s8 = sadd.s32 13, %s3951_s22  ;;  %v1417_v27 = vadd.f32 %v1416_v26, %v1401_v21  ;;  %s1443_s23 = scalar_lea.vmem [#allocation2], %s1442_s6 }
 0x17e   : >> { %v1444_v29 = vld [vmem:[%s1443_s23] ss:$8 sm:$0xf]  ;;  %s4013_s14 = sld [smem:[#allocation6 + %s1466_s8]]  ;;  %s1482_s15 = sadd.s32 14, %s3951_s22 }
 0x17f   : >> { %s4016_s18 = sld [smem:[#allocation6 + %s1482_s15]]  ;;  %s1498_s5 = sadd.s32 15, %s3951_s22  ;;  %v1433_v33 = vadd.f32 %v1432_v28, %v1417_v27  ;;  %v1448_v35 = vmul.f32 %v1444_v29, %v1444_v29  ;;  %v1430_v37 = vmin.f32 %v1414_v30, %v1444_v29  ;;  %v1445_v38 = vmax.f32 %v1429_v31, %v1444_v29 }
 0x180   : >> { %s1518_s28 = sshra.s32 %s3502_s9, 3  ;;  %s4020_s16 = sld [smem:[#allocation6 + %s1498_s5]]  ;;  %v1447_v39 = vadd.f32 %v1444_v29, %v1431_v32 }
 0x181   : >> { %s1521_s19 = sand.u32 7, %s3502_s9  ;;  %s4023_s26 = sshll.u32 %s1518_s28, 5  ;;  %v1449_v41 = vadd.f32 %v1448_v35, %v1433_v33 }
 0x182   : >> { %s1452_s30 = sshra.s32 %s1451_s20, 3  ;;  %s1455_s29 = sand.u32 7, %s1451_s20 }
 0x183   : >> { %s3116_s7 = sshll.u32 %s1452_s30, 5  ;;  %s1260_s9 = sadd.s32 1, %s3502_s9  }
 0x184   : >> { %s1458_s2 = sadd.s32 %s3116_s7, %s1455_s29  ;;  %s1468_s22 = sshra.s32 %s4013_s14, 3 }
 0x185   : >> { %s1471_s1 = sand.u32 7, %s4013_s14  ;;  %s1459_s3 = scalar_lea.vmem [#allocation2], %s1458_s2 }
 0x186   : >> { %v1460_v42 = vld [vmem:[%s1459_s3] ss:$8 sm:$0xf]  ;;  %s3117_s25 = sshll.u32 %s1468_s22, 5  ;;  %s1484_s6 = sshra.s32 %s4016_s18, 3 }
 0x187   : >> { %v1446_v43 = vmin.f32 %v1430_v37, %v1460_v42  ;;  %v1461_v44 = vmax.f32 %v1445_v38, %v1460_v42  ;;  %s1474_s20 = sadd.s32 %s3117_s25, %s1471_s1  ;;  %s1487_s8 = sand.u32 7, %s4016_s18  ;;  %v1463_v45 = vadd.f32 %v1460_v42, %v1447_v39  ;;  %v1464_v46 = vmul.f32 %v1460_v42, %v1460_v42 }
 0x188   : >> { %s3118_s23 = sshll.u32 %s1484_s6, 5  ;;  %s1475_s15 = scalar_lea.vmem [#allocation2], %s1474_s20 }
 0x189   : >> { %v1476_v47 = vld [vmem:[%s1475_s15] ss:$8 sm:$0xf]  ;;  %s1490_s5 = sadd.s32 %s3118_s23, %s1487_s8  ;;  %s1500_s14 = sshra.s32 %s4020_s16, 3  ;;  %v1465_v48 = vadd.f32 %v1464_v46, %v1449_v41 }
 0x18a   : >> { %v1462_v49 = vmin.f32 %v1446_v43, %v1476_v47  ;;  %v1477_v50 = vmax.f32 %v1461_v44, %v1476_v47  ;;  %s1503_s28 = sand.u32 7, %s4020_s16  ;;  %v1479_v51 = vadd.f32 %v1476_v47, %v1463_v45  ;;  %v1480_v52 = vmul.f32 %v1476_v47, %v1476_v47  ;;  %s1491_s30 = scalar_lea.vmem [#allocation2], %s1490_s5 }
 0x18b   : >> { %v1492_v53 = vld [vmem:[%s1491_s30] ss:$8 sm:$0xf]  ;;  %s3119_s29 = sshll.u32 %s1500_s14, 5  ;;  %s1524_s18 = sadd.s32 %s4023_s26, %s1521_s19 }
 0x18c   : >> { %v1478_v54 = vmin.f32 %v1462_v49, %v1492_v53  ;;  %v1493_v55 = vmax.f32 %v1477_v50, %v1492_v53  ;;  %s1506_s7 = sadd.s32 %s3119_s29, %s1503_s28  ;;  %v1495_v56 = vadd.f32 %v1492_v53, %v1479_v51  ;;  %v1481_v57 = vadd.f32 %v1480_v52, %v1465_v48  ;;  %s1525_s16 = scalar_lea.vmem %s3613_s17, %s1524_s18 }
 0x18d   : >> { %v1496_v58 = vmul.f32 %v1492_v53, %v1492_v53  ;;  %s1507_s2 = scalar_lea.vmem [#allocation2], %s1506_s7  ;;  %s1528_s22 = scalar_lea.vmem %s3637_s13, %s1524_s18 }
 0x18e   : >> { %v1508_v59 = vld [vmem:[%s1507_s2] ss:$8 sm:$0xf]  ;;  %s1531_s19 = scalar_lea.vmem [#allocation3], %s1524_s18  ;;  %s1534_s26 = scalar_lea.vmem [#allocation4], %s1524_s18 }
 0x18f   : >> { %v1494_v60 = vmin.f32 %v1478_v54, %v1508_v59  ;;  %v1509_v61 = vmax.f32 %v1493_v55, %v1508_v59  ;;  %v1511_v62 = vadd.f32 %v1508_v59, %v1495_v56  ;;  %v1497_v63 = vadd.f32 %v1496_v58, %v1481_v57  ;;  %p1257_p10 = scmp.ge.s32.totalorder %s1260_s9, 16  }
 0x190   : >> { %v1512_v0 = vmul.f32 %v1508_v59, %v1508_v59  ;;  %v3310_v34 = vld [vmem:[%s4412_s4 + $0xe4] ss:$16 sps:$4 sm:$0xff] (%p1257_p10)   ;;  %2208 = vmatprep.mubr.bf16.mxu1 (%p1257_p10), %v3505_v2  ;;  %v3314_v4 = vld [vmem:[%s4412_s4 + $0xe0] ss:$16 sps:$4 sm:$0xff] (%p1257_p10)   ;;  %v3363_v39 = vld [vmem:[%s4412_s4 + $0xec] ss:$16 sps:$4 sm:$0xff] (%p1257_p10)  }
 0x191   : >> { %1526 = vst.msk [vmem:[%s1525_s16] ss:$8 sm:$0xf] %vm3616_vm0, %v1509_v61  ;;  %v1510_v1 = vmin.f32 %v1494_v60, %v1286_v40  ;;  %1532 = vst.msk [vmem:[%s1531_s19] ss:$8 sm:$0xf] %vm3616_vm0, %v1511_v62  ;;  %2133 = vmatprep.subr.bf16.mxu0 (%p1257_p10), %v3310_v34 }
 0x192   : >> { %v1513_v3 = vadd.f32 %v1512_v0, %v1497_v63  ;;  %1259 = sbr.rel (!%p1257_p10) target bundleno = 337 (0x151), region = 136  ;;  %v3312_v36 = vld [vmem:[%s4412_s4 + $0x2e4] ss:$16 sps:$4 sm:$0xff] (%p1257_p10)   ;;  %v3315_v6 = vld [vmem:[%s4412_s4 + $0x2e0] ss:$16 sps:$4 sm:$0xff] (%p1257_p10)   ;;  %2134 = vmatpush1.bf16.msra.mxu0 (%p1257_p10), %v3314_v4 }
 0x193   : >> { %1529 = vst.msk [vmem:[%s1528_s22] ss:$8 sm:$0xf] %vm3616_vm0, %v1510_v1  ;;  %2176 = vmatprep.subr.bf16.mxu1 (%p1257_p10), %v3312_v36  ;;  %v3316_v7 = vld [vmem:[%s4412_s4 + $0xc4] ss:$16 sps:$4 sm:$0xff] (%p1257_p10)  }
 0x194   : >> { %1535 = vst.msk [vmem:[%s1534_s26] ss:$8 sm:$0xf] %vm3616_vm0, %v1513_v3  ;;  %2177 = vmatpush1.bf16.msra.mxu1 (%p1257_p10), %v3315_v6  ;;  %v3318_v8 = vld [vmem:[%s4412_s4 + $0x2c4] ss:$16 sps:$4 sm:$0xff] (%p1257_p10)   ;;  %2135 = vmatprep.subr.bf16.mxu0 (%p1257_p10), %v3316_v7 }
 0x195   : > { %v3320_v9 = vld [vmem:[%s4412_s4 + $0xc0] ss:$16 sps:$4 sm:$0xff] (%p1257_p10)   ;;  %2178 = vmatprep.subr.bf16.mxu1 (%p1257_p10), %v3318_v8  ;;  %v3322_v12 = vld [vmem:[%s4412_s4 + $0xa4] ss:$16 sps:$4 sm:$0xff] (%p1257_p10)   ;;  %v3361_v42 = vld [vmem:[%s4412_s4 + $0xe8] ss:$16 sps:$4 sm:$0xff] (%p1257_p10)  }
 0x196   : > { %v3321_v10 = vld [vmem:[%s4412_s4 + $0x2c0] ss:$16 sps:$4 sm:$0xff] (%p1257_p10)   ;;  %v3324_v13 = vld [vmem:[%s4412_s4 + $0x2a4] ss:$16 sps:$4 sm:$0xff] (%p1257_p10)   ;;  %2136 = vmatpush1.bf16.msra.mxu0 (%p1257_p10), %v3320_v9  ;;  %v3369_v45 = vld [vmem:[%s4412_s4 + $0xcc] ss:$16 sps:$4 sm:$0xff] (%p1257_p10)  }
 0x197   : > { %v3326_v14 = vld [vmem:[%s4412_s4 + $0xa0] ss:$16 sps:$4 sm:$0xff]   ;;  %v3328_v16 = vld [vmem:[%s4412_s4 + $0x84] ss:$16 sps:$4 sm:$0xff]   ;;  %2137 = vmatprep.subr.bf16.mxu0 %v3322_v12  ;;  %v3367_v46 = vld [vmem:[%s4412_s4 + $0xc8] ss:$16 sps:$4 sm:$0xff]  }
 0x198   : > { %v3327_v15 = vld [vmem:[%s4412_s4 + $0x2a0] ss:$16 sps:$4 sm:$0xff]   ;;  %2179 = vmatpush1.bf16.msra.mxu1 %v3321_v10  ;;  %v3330_v17 = vld [vmem:[%s4412_s4 + $0x284] ss:$16 sps:$4 sm:$0xff]   ;;  %v3375_v49 = vld [vmem:[%s4412_s4 + $0xac] ss:$16 sps:$4 sm:$0xff]  }
 0x199   : > { %2180 = vmatprep.subr.bf16.mxu1 %v3324_v13  ;;  %v3332_v18 = vld [vmem:[%s4412_s4 + $0x80] ss:$16 sps:$4 sm:$0xff]   ;;  %v3334_v20 = vld [vmem:[%s4412_s4 + $0x64] ss:$16 sps:$4 sm:$0xff]   ;;  %v3373_v50 = vld [vmem:[%s4412_s4 + $0xa8] ss:$16 sps:$4 sm:$0xff]  }
 0x19a   : > { %2138 = vmatpush1.bf16.msra.mxu0 %v3326_v14  ;;  %v3333_v19 = vld [vmem:[%s4412_s4 + $0x280] ss:$16 sps:$4 sm:$0xff]   ;;  %v3336_v21 = vld [vmem:[%s4412_s4 + $0x264] ss:$16 sps:$4 sm:$0xff]   ;;  %v3381_v53 = vld [vmem:[%s4412_s4 + $0x8c] ss:$16 sps:$4 sm:$0xff]  }
 0x19b   : > { %2139 = vmatprep.subr.bf16.mxu0 %v3328_v16  ;;  %v3338_v22 = vld [vmem:[%s4412_s4 + $0x60] ss:$16 sps:$4 sm:$0xff]   ;;  %v3340_v24 = vld [vmem:[%s4412_s4 + $0x44] ss:$16 sps:$4 sm:$0xff]   ;;  %v3379_v54 = vld [vmem:[%s4412_s4 + $0x88] ss:$16 sps:$4 sm:$0xff]  }
 0x19c   : > { %2181 = vmatpush1.bf16.msra.mxu1 %v3327_v15  ;;  %v3339_v23 = vld [vmem:[%s4412_s4 + $0x260] ss:$16 sps:$4 sm:$0xff]   ;;  %v3342_v25 = vld [vmem:[%s4412_s4 + $0x244] ss:$16 sps:$4 sm:$0xff]   ;;  %v3387_v40 = vld [vmem:[%s4412_s4 + $0x6c] ss:$16 sps:$4 sm:$0xff]  }
 0x19d   : > { %2182 = vmatprep.subr.bf16.mxu1 %v3330_v17  ;;  %v3344_v26 = vld [vmem:[%s4412_s4 + $0x40] ss:$16 sps:$4 sm:$0xff]   ;;  %v3346_v28 = vld [vmem:[%s4412_s4 + $0x24] ss:$16 sps:$4 sm:$0xff]   ;;  %v3385_v58 = vld [vmem:[%s4412_s4 + $0x68] ss:$16 sps:$4 sm:$0xff]  }
 0x19e   : > { %2140 = vmatpush1.bf16.msra.mxu0 %v3332_v18  ;;  %v3345_v27 = vld [vmem:[%s4412_s4 + $0x240] ss:$16 sps:$4 sm:$0xff]   ;;  %v3348_v29 = vld [vmem:[%s4412_s4 + $0x224] ss:$16 sps:$4 sm:$0xff]   ;;  %v3393_v61 = vld [vmem:[%s4412_s4 + $0x4c] ss:$16 sps:$4 sm:$0xff]  }
 0x19f   : > { %2141 = vmatprep.subr.bf16.mxu0 %v3334_v20  ;;  %v3350_v30 = vld [vmem:[%s4412_s4 + $0x20] ss:$16 sps:$4 sm:$0xff]   ;;  %v3352_v32 = vld [vmem:[%s4412_s4 + $0x4] ss:$16 sps:$4 sm:$0xff]   ;;  %v3391_v62 = vld [vmem:[%s4412_s4 + $0x48] ss:$16 sps:$4 sm:$0xff]  }
 0x1a0   : > { %2183 = vmatpush1.bf16.msra.mxu1 %v3333_v19  ;;  %v3351_v31 = vld [vmem:[%s4412_s4 + $0x220] ss:$16 sps:$4 sm:$0xff]   ;;  %v3354_v33 = vld [vmem:[%s4412_s4 + $0x204] ss:$16 sps:$4 sm:$0xff]   ;;  %v3399_v1 = vld [vmem:[%s4412_s4 + $0x2c] ss:$16 sps:$4 sm:$0xff]  }
 0x1a1   : > { %2184 = vmatprep.subr.bf16.mxu1 %v3336_v21  ;;  %v3356_v35 = vld [vmem:[%s4412_s4] ss:$16 sps:$4 sm:$0xff]   ;;  %v3358_v38 = vld [vmem:[%s4412_s4 + $0x1e4] ss:$16 sps:$4 sm:$0xff]   ;;  %v3397_v3 = vld [vmem:[%s4412_s4 + $0x28] ss:$16 sps:$4 sm:$0xff]  }
 0x1a2   : > { %2142 = vmatpush1.bf16.msra.mxu0 %v3338_v22  ;;  %v3357_v37 = vld [vmem:[%s4412_s4 + $0x200] ss:$16 sps:$4 sm:$0xff]   ;;  %v4153_v41 = vld [vmem:[%s3632_s27 + $0x8] ss:$12 sps:$4 sm:$0xff]   ;;  %v3405_v4 = vld [vmem:[%s4412_s4 + $0xc] ss:$16 sps:$4 sm:$0xff]  }
 0x1a3   : > { %2143 = vmatprep.subr.bf16.mxu0 %v3340_v24  ;;  %v3364_v43 = vld [vmem:[%s4412_s4 + $0x1e0] ss:$16 sps:$4 sm:$0xff]   ;;  %v3365_v44 = vld [vmem:[%s4412_s4 + $0x1c4] ss:$16 sps:$4 sm:$0xff]   ;;  %v3403_v6 = vld [vmem:[%s4412_s4 + $0x8] ss:$16 sps:$4 sm:$0xff]  }
 0x1a4   : > { %2185 = vmatpush1.bf16.msra.mxu1 %v3339_v23  ;;  %v3370_v47 = vld [vmem:[%s4412_s4 + $0x1c0] ss:$16 sps:$4 sm:$0xff]   ;;  %v3371_v48 = vld [vmem:[%s4412_s4 + $0x1a4] ss:$16 sps:$4 sm:$0xff]   ;;  %v3412_v8 = vld [vmem:[%s4412_s4 + $0x1ec] ss:$16 sps:$4 sm:$0xff]  }
 0x1a5   : > { %2186 = vmatprep.subr.bf16.mxu1 %v3342_v25  ;;  %v3376_v51 = vld [vmem:[%s4412_s4 + $0x1a0] ss:$16 sps:$4 sm:$0xff]   ;;  %v3377_v52 = vld [vmem:[%s4412_s4 + $0x184] ss:$16 sps:$4 sm:$0xff]   ;;  %v3415_v9 = vld [vmem:[%s4412_s4 + $0x2ec] ss:$16 sps:$4 sm:$0xff]  }
 0x1a6   : > { %2144 = vmatpush1.bf16.msra.mxu0 %v3344_v26  ;;  %v3382_v55 = vld [vmem:[%s4412_s4 + $0x180] ss:$16 sps:$4 sm:$0xff]   ;;  %v3383_v56 = vld [vmem:[%s4412_s4 + $0x164] ss:$16 sps:$4 sm:$0xff]   ;;  %v3410_v12 = vld [vmem:[%s4412_s4 + $0x1e8] ss:$16 sps:$4 sm:$0xff]  }
 0x1a7   : > { %2145 = vmatprep.subr.bf16.mxu0 %v3346_v28  ;;  %v3409_v57 = vld [vmem:[%s3632_s27 + $0x4] ss:$12 sps:$4 sm:$0xff]   ;;  %v4254_v10 = vld [vmem:[%s3632_s27] ss:$12 sps:$4 sm:$0xff]   ;;  %v3413_v13 = vld [vmem:[%s4412_s4 + $0x2e8] ss:$16 sps:$4 sm:$0xff]  }
 0x1a8   : > { %2187 = vmatpush1.bf16.msra.mxu1 %v3345_v27  ;;  %2165 = vmatprep.mubr.bf16.mxu0 %v3409_v57  ;;  %v3388_v59 = vld [vmem:[%s4412_s4 + $0x160] ss:$16 sps:$4 sm:$0xff]   ;;  %v3389_v60 = vld [vmem:[%s4412_s4 + $0x144] ss:$16 sps:$4 sm:$0xff]   ;;  %v3418_v14 = vld [vmem:[%s4412_s4 + $0x1cc] ss:$16 sps:$4 sm:$0xff]  }
 0x1a9   : > { %2188 = vmatprep.subr.bf16.mxu1 %v3348_v29  ;;  %v3394_v63 = vld [vmem:[%s4412_s4 + $0x140] ss:$16 sps:$4 sm:$0xff]   ;;  %v3395_v0 = vld [vmem:[%s4412_s4 + $0x124] ss:$16 sps:$4 sm:$0xff]   ;;  %v3421_v15 = vld [vmem:[%s4412_s4 + $0x2cc] ss:$16 sps:$4 sm:$0xff]  }
 0x1aa   : > { %2146 = vmatpush1.bf16.msra.mxu0 %v3350_v30  ;;  %v3400_v34 = vld [vmem:[%s4412_s4 + $0x120] ss:$16 sps:$4 sm:$0xff]   ;;  %v3401_v36 = vld [vmem:[%s4412_s4 + $0x104] ss:$16 sps:$4 sm:$0xff]   ;;  %v3416_v16 = vld [vmem:[%s4412_s4 + $0x1c8] ss:$16 sps:$4 sm:$0xff]  }
 0x1ab   : > { %2147 = vmatprep.subr.bf16.mxu0 %v3352_v32  ;;  %v3406_v7 = vld [vmem:[%s4412_s4 + $0x100] ss:$16 sps:$4 sm:$0xff]   ;;  %v3419_v17 = vld [vmem:[%s4412_s4 + $0x2c8] ss:$16 sps:$4 sm:$0xff]   ;;  %v3424_v18 = vld [vmem:[%s4412_s4 + $0x1ac] ss:$16 sps:$4 sm:$0xff]  }
 0x1ac   : > { %2189 = vmatpush1.bf16.msra.mxu1 %v3351_v31  ;;  %v3427_v19 = vld [vmem:[%s4412_s4 + $0x2ac] ss:$16 sps:$4 sm:$0xff]   ;;  %v3422_v20 = vld [vmem:[%s4412_s4 + $0x1a8] ss:$16 sps:$4 sm:$0xff]  }
 0x1ad   : > { %2190 = vmatprep.subr.bf16.mxu1 %v3354_v33  ;;  %v3425_v21 = vld [vmem:[%s4412_s4 + $0x2a8] ss:$16 sps:$4 sm:$0xff]   ;;  %v3430_v22 = vld [vmem:[%s4412_s4 + $0x18c] ss:$16 sps:$4 sm:$0xff]  }
 0x1ae   : > { %2148 = vmatpush1.bf16.msra.mxu0 %v3356_v35  ;;  %v3428_v23 = vld [vmem:[%s4412_s4 + $0x188] ss:$16 sps:$4 sm:$0xff]   ;;  %v3436_v25 = vld [vmem:[%s4412_s4 + $0x16c] ss:$16 sps:$4 sm:$0xff]  }
 0x1af   : > { %2149 = vmatprep.subr.bf16.mxu0 %v3358_v38  ;;  %v3431_v24 = vld [vmem:[%s4412_s4 + $0x288] ss:$16 sps:$4 sm:$0xff]   ;;  %v3439_v26 = vld [vmem:[%s4412_s4 + $0x26c] ss:$16 sps:$4 sm:$0xff]  }
 0x1b0   : > { %2191 = vmatpush1.bf16.msra.mxu1 %v3357_v37  ;;  %v3434_v27 = vld [vmem:[%s4412_s4 + $0x168] ss:$16 sps:$4 sm:$0xff]   ;;  %v3442_v29 = vld [vmem:[%s4412_s4 + $0x14c] ss:$16 sps:$4 sm:$0xff]  }
 0x1b1   : > { %2219 = vmatprep.subr.bf16.mxu1 %v3363_v39  ;;  %v3437_v28 = vld [vmem:[%s4412_s4 + $0x268] ss:$16 sps:$4 sm:$0xff]   ;;  %v3445_v30 = vld [vmem:[%s4412_s4 + $0x24c] ss:$16 sps:$4 sm:$0xff]  }
 0x1b2   : > { %2150 = vmatpush2.bf16.msra.mxu0 %v3364_v43  ;;  %v3440_v31 = vld [vmem:[%s4412_s4 + $0x148] ss:$16 sps:$4 sm:$0xff]   ;;  %v3448_v33 = vld [vmem:[%s4412_s4 + $0x12c] ss:$16 sps:$4 sm:$0xff]  }
 0x1b3   : > { %2209 = vmatmul.mubr.bf16.vlgmr.msra.gmra.mxu1 %v4153_v41  ;;  %2151 = vmatprep.subr.bf16.mxu0 %v3365_v44  ;;  %v3443_v32 = vld [vmem:[%s4412_s4 + $0x248] ss:$16 sps:$4 sm:$0xff]   ;;  %v3451_v35 = vld [vmem:[%s4412_s4 + $0x22c] ss:$16 sps:$4 sm:$0xff]  }
 0x1b4   : > { %2220 = vmatpush1.bf16.msra.mxu1 %v3361_v42  ;;  %2251 = vmatprep.mubr.bf16.mxu1 %v3409_v57  ;;  %v3446_v37 = vld [vmem:[%s4412_s4 + $0x128] ss:$16 sps:$4 sm:$0xff]   ;;  %v3454_v39 = vld [vmem:[%s4412_s4 + $0x10c] ss:$16 sps:$4 sm:$0xff]  }
 0x1b5   : > { %2221 = vmatprep.subr.bf16.mxu1 %v3369_v45  ;;  %v3449_v38 = vld [vmem:[%s4412_s4 + $0x228] ss:$16 sps:$4 sm:$0xff]   ;;  %v3457_v42 = vld [vmem:[%s4412_s4 + $0x20c] ss:$16 sps:$4 sm:$0xff]  }
 0x1b6   : > { %2152 = vmatpush2.bf16.msra.mxu0 %v3370_v47  ;;  %v3452_v43 = vld [vmem:[%s4412_s4 + $0x108] ss:$16 sps:$4 sm:$0xff]  }
 0x1b7   : > { %2153 = vmatprep.subr.bf16.mxu0 %v3371_v48  ;;  %v3455_v44 = vld [vmem:[%s4412_s4 + $0x208] ss:$16 sps:$4 sm:$0xff]   ;;  %v2313_v48 = vld [vmem:[%s3613_s17] sm:$0xff] }
 0x1b8   : > { %2222 = vmatpush1.bf16.msra.mxu1 %v3367_v46 }
 0x1b9   : > { %2223 = vmatprep.subr.bf16.mxu1 %v3375_v49  ;;  %v2337_v49 = vld [vmem:[%s3637_s13] sm:$0xff] }
 0x1ba   : > { %2154 = vmatpush2.bf16.msra.mxu0 %v3376_v51 }
 0x1bb   : > { %2155 = vmatprep.subr.bf16.mxu0 %v3377_v52 }
 0x1bc   : > { %2224 = vmatpush1.bf16.msra.mxu1 %v3373_v50 }
 0x1bd   : > { %2225 = vmatprep.subr.bf16.mxu1 %v3381_v53 }
 0x1be   : > { %2156 = vmatpush2.bf16.msra.mxu0 %v3382_v55  ;;  %v2338_v55 = vld [vmem:[%s3637_s13 + $0x8] sm:$0xff] }
 0x1bf   : > { %2157 = vmatprep.subr.bf16.mxu0 %v3383_v56 }
 0x1c0   : > { %2226 = vmatpush1.bf16.msra.mxu1 %v3379_v54  ;;  %v2314_v54 = vld [vmem:[%s3613_s17 + $0x8] sm:$0xff] }
 0x1c1   : > { %2227 = vmatprep.subr.bf16.mxu1 %v3387_v40  ;;  %v2317_v40 = vld [vmem:[%s3613_s17 + $0x20] sm:$0xff] }
 0x1c2   : > { %2158 = vmatpush2.bf16.msra.mxu0 %v3388_v59  ;;  %v2341_v59 = vld [vmem:[%s3637_s13 + $0x20] sm:$0xff] }
 0x1c3   : > { %2159 = vmatprep.subr.bf16.mxu0 %v3389_v60 }
 0x1c4   : > { %2228 = vmatpush1.bf16.msra.mxu1 %v3385_v58 }
 0x1c5   : > { %2229 = vmatprep.subr.bf16.mxu1 %v3393_v61 }
 0x1c6   : > { %2160 = vmatpush2.bf16.msra.mxu0 %v3394_v63 }
 0x1c7   : > { %2161 = vmatprep.subr.bf16.mxu0 %v3395_v0 }
 0x1c8   : > { %2230 = vmatpush1.bf16.msra.mxu1 %v3391_v62 }
 0x1c9   : > { %2231 = vmatprep.subr.bf16.mxu1 %v3399_v1 }
 0x1ca   : > { %2162 = vmatpush2.bf16.msra.mxu0 %v3400_v34  ;;  %v2342_v34 = vld [vmem:[%s3637_s13 + $0x28] sm:$0xff] }
 0x1cb   : > { %2163 = vmatprep.subr.bf16.mxu0 %v3401_v36 }
 0x1cc   : > { %2232 = vmatpush1.bf16.msra.mxu1 %v3397_v3  ;;  %v2318_v3 = vld [vmem:[%s3613_s17 + $0x28] sm:$0xff] }
 0x1cd   : > { %2233 = vmatprep.subr.bf16.mxu1 %v3405_v4 }
 0x1ce   : > { %2164 = vmatpush2.bf16.msra.mxu0 %v3406_v7 }
 0x1cf   : > { %2262 = vmatprep.subr.bf16.mxu0 %v3415_v9 }
 0x1d0   : > { %2234 = vmatpush1.bf16.msra.mxu1 %v3403_v6 }
 0x1d1   : > { %2235 = vmatprep.subr.bf16.mxu1 %v3412_v8  ;;  %2166 = vmatmul.mubr.bf16.vlgmr.msra.gmra.mxu0 %v4254_v10  ;;  %v2310_v8 = vld [vmem:[#allocation3 + $0x28] sm:$0xff] }
 0x1d2   : > { %2263 = vmatpush1.bf16.msra.mxu0 %v3413_v13  ;;  %2294 = vmatprep.mubr.bf16.mxu0 %v3505_v2  ;;  %v3433_v2 = vld [vmem:[%s4412_s4 + $0x28c] ss:$16 sps:$4 sm:$0xff]   ;;  %v2309_v13 = vld [vmem:[#allocation3 + $0x20] sm:$0xff] }
 0x1d3   : > { %2264 = vmatprep.subr.bf16.mxu0 %v3421_v15 }
 0x1d4   : > { %2236 = vmatpush2.bf16.msra.mxu1 %v3410_v12  ;;  %v2306_v12 = vld [vmem:[#allocation3 + $0x8] sm:$0xff] }
 0x1d5   : > { %2237 = vmatprep.subr.bf16.mxu1 %v3418_v14 }
 0x1d6   : > { %2265 = vmatpush1.bf16.msra.mxu0 %v3419_v17 }
 0x1d7   : > { %2266 = vmatprep.subr.bf16.mxu0 %v3427_v19 }
 0x1d8   : > { %2238 = vmatpush2.bf16.msra.mxu1 %v3416_v16 }
 0x1d9   : > { %2239 = vmatprep.subr.bf16.mxu1 %v3424_v18  ;;  %v2305_v18 = vld [vmem:[#allocation3] sm:$0xff] }
 0x1da   : > { %2267 = vmatpush1.bf16.msra.mxu0 %v3425_v21 }
 0x1db   : > { %2268 = vmatprep.subr.bf16.mxu0 %v3433_v2 }
 0x1dc   : > { %2240 = vmatpush2.bf16.msra.mxu1 %v3422_v20  ;;  %v2382_v20 = vld [vmem:[#allocation4 + $0x28] sm:$0xff] }
 0x1dd   : > { %2241 = vmatprep.subr.bf16.mxu1 %v3430_v22 }
 0x1de   : > { %2269 = vmatpush1.bf16.msra.mxu0 %v3431_v24  ;;  %v2378_v24 = vld [vmem:[#allocation4 + $0x8] sm:$0xff] }
 0x1df   : > { %2270 = vmatprep.subr.bf16.mxu0 %v3439_v26 }
 0x1e0   : > { %2242 = vmatpush2.bf16.msra.mxu1 %v3428_v23 }
 0x1e1   : > { %2243 = vmatprep.subr.bf16.mxu1 %v3436_v25 }
 0x1e2   : > { %2271 = vmatpush1.bf16.msra.mxu0 %v3437_v28  ;;  %v2381_v28 = vld [vmem:[#allocation4 + $0x20] sm:$0xff] }
 0x1e3   : > { %2272 = vmatprep.subr.bf16.mxu0 %v3445_v30 }
 0x1e4   : > { %2244 = vmatpush2.bf16.msra.mxu1 %v3434_v27 }
 0x1e5   : > { %2245 = vmatprep.subr.bf16.mxu1 %v3442_v29 }
 0x1e6   : > { %2273 = vmatpush1.bf16.msra.mxu0 %v3443_v32 }
 0x1e7   : > { %2274 = vmatprep.subr.bf16.mxu0 %v3451_v35 }
 0x1e8   : > { %2246 = vmatpush2.bf16.msra.mxu1 %v3440_v31 }
 0x1e9   : > { %2247 = vmatprep.subr.bf16.mxu1 %v3448_v33  ;;  %v2377_v33 = vld [vmem:[#allocation4] sm:$0xff] }
 0x1ea   : > { %2275 = vmatpush1.bf16.msra.mxu0 %v3449_v38 }
 0x1eb   : > { %2276 = vmatprep.subr.bf16.mxu0 %v3457_v42 }
 0x1ec   : > { %2248 = vmatpush2.bf16.msra.mxu1 %v3446_v37 }
 0x1ed   : > { %2249 = vmatprep.subr.bf16.mxu1 %v3454_v39 }
 0x1ee   : > { %2277 = vmatpush1.bf16.msra.mxu0 %v3455_v44 }
 0x1f0   : > { %2250 = vmatpush2.bf16.msra.mxu1 %v3452_v43 }
 0x1f1   : > { %2295 = vmatmul.mubr.bf16.vlgmr.msra.gmra.mxu0 %v4153_v41 }
 0x1f3   : > { %2252 = vmatmul.mubr.bf16.vlgmr.msra.gmra.mxu1 %v4254_v10 }
 0x273   : > { %v2210_v45 = vpop.f32.mrf.mxu1 }
 0x275   : > { %v2212_v46 = vpop.f32.mrf.mxu1 }
 0x277   : > { %v2214_v56 = vpop.f32.mrf.mxu1 }
 0x279   : > { %v2216_v1 = vpop.f32.mrf.mxu1 }
 0x291   : > { %v2167_v47 = vpop.f32.mrf.mxu0 }
 0x292   : > { %v2211_v50 = vadd.f32 %v2210_v45, %v2167_v47 }
 0x293   : > { %v2169_v51 = vpop.f32.mrf.mxu0 }
 0x294   : > { %v2321_v52 = vadd.f32 %v2313_v48, %v2211_v50  ;;  %v2345_v53 = vadd.f32 %v2337_v49, %v2211_v50  ;;  %v2213_v57 = vadd.f32 %v2212_v46, %v2169_v51  ;;  %v2361_v15 = vmul.f32 16.0, %v2211_v50 }
 0x295   : > { %v2171_v41 = vpop.f32.mrf.mxu0  ;;  %v2385_v19 = vmul.f32 2.0, %v2211_v50  ;;  %v2409_v42 = vmul.f32 %v2211_v50, %v2211_v50 }
 0x296   : > { %2329 = vst [vmem:[%s3613_s17] sm:$0xff] %v2321_v52  ;;  %2353 = vst [vmem:[%s3637_s13] sm:$0xff] %v2345_v53  ;;  %v2215_v58 = vadd.f32 %v2214_v56, %v2171_v41  ;;  %v2322_v60 = vadd.f32 %v2314_v54, %v2213_v57  ;;  %v2346_v61 = vadd.f32 %v2338_v55, %v2213_v57  ;;  %v2386_v9 = vmul.f32 2.0, %v2213_v57  ;;  %v2315_v56 = vld [vmem:[%s3613_s17 + $0x10] sm:$0xff] }
 0x297   : > { %v2173_v63 = vpop.f32.mrf.mxu0  ;;  %v2362_v21 = vmul.f32 16.0, %v2213_v57  ;;  %v2369_v26 = vadd.f32 %v2361_v15, %v2305_v18  ;;  %v2410_v27 = vmul.f32 %v2213_v57, %v2213_v57  ;;  %v2393_v31 = vmul.f32 %v2385_v19, %v2305_v18  ;;  %v2339_v57 = vld [vmem:[%s3637_s13 + $0x10] sm:$0xff] }
 0x298   : > { %v2325_v62 = vadd.f32 %v2317_v40, %v2215_v58  ;;  %2330 = vst [vmem:[%s3613_s17 + $0x8] sm:$0xff] %v2322_v60  ;;  %2354 = vst [vmem:[%s3637_s13 + $0x8] sm:$0xff] %v2346_v61  ;;  %v2349_v0 = vadd.f32 %v2341_v59, %v2215_v58  ;;  %v2217_v36 = vadd.f32 %v2216_v1, %v2173_v63  ;;  %v2365_v10 = vmul.f32 16.0, %v2215_v58  ;;  %v2316_v1 = vld [vmem:[%s3613_s17 + $0x18] sm:$0xff]  ;;  %v2379_v19 = vld [vmem:[#allocation4 + $0x10] sm:$0xff] }
 0x299   : > { %v2389_v14 = vmul.f32 2.0, %v2215_v58  ;;  %v2394_v22 = vmul.f32 %v2386_v9, %v2306_v12  ;;  %v2413_v32 = vmul.f32 %v2215_v58, %v2215_v58  ;;  %v2370_v35 = vadd.f32 %v2362_v21, %v2306_v12 }
 0x29a   : > { %2333 = vst [vmem:[%s3613_s17 + $0x20] sm:$0xff] %v2325_v62  ;;  %2357 = vst [vmem:[%s3637_s13 + $0x20] sm:$0xff] %v2349_v0  ;;  %v2326_v4 = vadd.f32 %v2318_v3, %v2217_v36  ;;  %v2350_v6 = vadd.f32 %v2342_v34, %v2217_v36  ;;  %v2390_v7 = vmul.f32 2.0, %v2217_v36  ;;  %v2366_v16 = vmul.f32 16.0, %v2217_v36  ;;  %v2307_v62 = vld [vmem:[#allocation3 + $0x10] sm:$0xff]  ;;  %v2340_v3 = vld [vmem:[%s3637_s13 + $0x18] sm:$0xff] }
 0x29b   : > { %v2373_v2 = vadd.f32 %v2365_v10, %v2309_v13  ;;  %v2414_v23 = vmul.f32 %v2217_v36, %v2217_v36  ;;  %v2397_v25 = vmul.f32 %v2389_v14, %v2309_v13  ;;  %v2402_v37 = vadd.f32 %v2394_v22, %v2378_v24  ;;  %v2343_v14 = vld [vmem:[%s3637_s13 + $0x30] sm:$0xff] }
 0x29c   : > { %2334 = vst [vmem:[%s3613_s17 + $0x28] sm:$0xff] %v2326_v4  ;;  %2358 = vst [vmem:[%s3637_s13 + $0x28] sm:$0xff] %v2350_v6  ;;  %v2398_v17 = vmul.f32 %v2390_v7, %v2310_v8  ;;  %v2374_v29 = vadd.f32 %v2366_v16, %v2310_v8  ;;  %v2418_v44 = vmul.f32 16.0, %v2410_v27  ;;  %v2401_v47 = vadd.f32 %v2393_v31, %v2377_v33  ;;  %v2319_v8 = vld [vmem:[%s3613_s17 + $0x30] sm:$0xff] }
 0x29d   : > { %v2434_v38 = vadd.f32 %v2373_v2, %v2369_v26  ;;  %v2422_v39 = vmul.f32 16.0, %v2414_v23  ;;  %v2405_v43 = vadd.f32 %v2397_v25, %v2381_v28  ;;  %v2421_v48 = vmul.f32 16.0, %v2413_v32  ;;  %v2311_v22 = vld [vmem:[#allocation3 + $0x30] sm:$0xff]  ;;  %v2308_v26 = vld [vmem:[#allocation3 + $0x18] sm:$0xff] }
 0x29e   : > { %v2406_v30 = vadd.f32 %v2398_v17, %v2382_v20  ;;  %v2441_v46 = vadd.f32 %v2374_v29, %v2370_v35  ;;  %v2426_v49 = vadd.f32 %v2418_v44, %v2402_v37  ;;  %v2417_v52 = vmul.f32 16.0, %v2409_v42  ;;  %v2383_v33 = vld [vmem:[#allocation4 + $0x30] sm:$0xff]  ;;  %v2320_v37 = vld [vmem:[%s3613_s17 + $0x38] sm:$0xff] }
 0x29f   : > { %v2435_v51 = vrot.slane %v2434_v38, 4  ;;  %v2429_v53 = vadd.f32 %v2421_v48, %v2405_v43 }
 0x2a0   : > { %v2430_v45 = vadd.f32 %v2422_v39, %v2406_v30  ;;  %v2442_v41 = vrot.slane %v2441_v46, 4  ;;  %v2425_v58 = vadd.f32 %v2417_v52, %v2401_v47 }
 0x2a1   : > { %v4368_v61 = vadd.f32 %v2435_v51, %v2434_v38  ;;  %v2344_v38 = vld [vmem:[%s3637_s13 + $0x38] sm:$0xff] }
 0x2a2   : > { %v2505_v40 = vadd.f32 %v2430_v45, %v2426_v49  ;;  %v2498_v34 = vadd.f32 %v2429_v53, %v2425_v58  ;;  %v4373_v9 = vadd.f32 %v2442_v41, %v2441_v46  ;;  %v2380_v49 = vld [vmem:[#allocation4 + $0x18] sm:$0xff] }
 0x2a3   : > { %v2437_v18 = vrot.slane %v4368_v61, 2  ;;  %v2312_v53 = vld [vmem:[#allocation3 + $0x38] sm:$0xff] }
 0x2a4   : > { %v2506_v10 = vrot.slane %v2505_v40, 4  ;;  %v2499_v25 = vrot.slane %v2498_v34, 4  ;;  %v2444_v30 = vrot.slane %v4373_v9, 2 }
 0x2a6   : > { %v2507_v31 = vadd.f32 %v2506_v10, %v2505_v40 }
 0x2b1   : > { %v2296_v55 = vpop.f32.mrf.mxu0 }
 0x2b3   : > { %v2253_v54 = vpop.f32.mrf.mxu1  ;;  %v2298_v60 = vpop.f32.mrf.mxu0 }
 0x2b4   : > { %v2297_v50 = vadd.f32 %v2296_v55, %v2253_v54 }
 0x2b5   : > { %v2255_v59 = vpop.f32.mrf.mxu1  ;;  %v2300_v7 = vpop.f32.mrf.mxu0 }
 0x2b6   : > { %v2323_v63 = vadd.f32 %v2315_v56, %v2297_v50  ;;  %v2347_v0 = vadd.f32 %v2339_v57, %v2297_v50  ;;  %v2387_v36 = vmul.f32 2.0, %v2297_v50  ;;  %v2299_v4 = vadd.f32 %v2298_v60, %v2255_v59 }
 0x2b7   : > { %v2257_v6 = vpop.f32.mrf.mxu1  ;;  %v2363_v12 = vmul.f32 16.0, %v2297_v50  ;;  %v2411_v20 = vmul.f32 %v2297_v50, %v2297_v50  ;;  %v2302_v24 = vpop.f32.mrf.mxu0  ;;  %v2500_v50 = vadd.f32 %v2499_v25, %v2498_v34  ;;  %v2438_v34 = vadd.f32 %v2437_v18, %v4368_v61 }
 0x2b8   : > { %2331 = vst [vmem:[%s3613_s17 + $0x10] sm:$0xff] %v2323_v63  ;;  %2355 = vst [vmem:[%s3637_s13 + $0x10] sm:$0xff] %v2347_v0  ;;  %v2301_v13 = vadd.f32 %v2300_v7, %v2257_v6  ;;  %v2395_v15 = vmul.f32 %v2387_v36, %v2307_v62  ;;  %v2324_v16 = vadd.f32 %v2316_v1, %v2299_v4  ;;  %v2388_v21 = vmul.f32 2.0, %v2299_v4 }
 0x2b9   : > { %v2348_v17 = vadd.f32 %v2340_v3, %v2299_v4  ;;  %v2259_v23 = vpop.f32.mrf.mxu1  ;;  %v2371_v32 = vadd.f32 %v2363_v12, %v2307_v62  ;;  %v2419_v45 = vmul.f32 16.0, %v2411_v20  ;;  %v2364_v46 = vmul.f32 16.0, %v2299_v4  ;;  %v2384_v62 = vld [vmem:[#allocation4 + $0x38] sm:$0xff] }
 0x2ba   : > { %v2327_v2 = vadd.f32 %v2319_v8, %v2301_v13  ;;  %2332 = vst [vmem:[%s3613_s17 + $0x18] sm:$0xff] %v2324_v16  ;;  %v2351_v27 = vadd.f32 %v2343_v14, %v2301_v13  ;;  %v2367_v28 = vmul.f32 16.0, %v2301_v13  ;;  %v2391_v29 = vmul.f32 2.0, %v2301_v13 }
 0x2bb   : > { %2356 = vst [vmem:[%s3637_s13 + $0x18] sm:$0xff] %v2348_v17  ;;  %v2415_v35 = vmul.f32 %v2301_v13, %v2301_v13  ;;  %v2403_v39 = vadd.f32 %v2395_v15, %v2379_v19  ;;  %v2303_v44 = vadd.f32 %v2302_v24, %v2259_v23  ;;  %v2396_v47 = vmul.f32 %v2388_v21, %v2308_v26 }
 0x2bc   : > { %2335 = vst [vmem:[%s3613_s17 + $0x30] sm:$0xff] %v2327_v2  ;;  %2359 = vst [vmem:[%s3637_s13 + $0x30] sm:$0xff] %v2351_v27  ;;  %v2375_v42 = vadd.f32 %v2367_v28, %v2311_v22  ;;  %v2399_v43 = vmul.f32 %v2391_v29, %v2311_v22  ;;  %v2412_v56 = vmul.f32 %v2299_v4, %v2299_v4  ;;  %v2508_v6 = vrot.slane %v2507_v31, 2 }
 0x2bd   : > { %v2423_v48 = vmul.f32 16.0, %v2415_v35  ;;  %v2328_v54 = vadd.f32 %v2320_v37, %v2303_v44  ;;  %v2352_v55 = vadd.f32 %v2344_v38, %v2303_v44  ;;  %v2368_v57 = vmul.f32 16.0, %v2303_v44 }
 0x2be   : > { %v2407_v51 = vadd.f32 %v2399_v43, %v2383_v33  ;;  %v2448_v52 = vadd.f32 %v2375_v42, %v2371_v32  ;;  %v2392_v41 = vmul.f32 2.0, %v2303_v44  ;;  %v2416_v40 = vmul.f32 %v2303_v44, %v2303_v44 }
 0x2bf   : > { %v2427_v58 = vadd.f32 %v2419_v45, %v2403_v39  ;;  %2336 = vst [vmem:[%s3613_s17 + $0x38] sm:$0xff] %v2328_v54  ;;  %2360 = vst [vmem:[%s3637_s13 + $0x38] sm:$0xff] %v2352_v55  ;;  %v2372_v63 = vadd.f32 %v2364_v46, %v2308_v26  ;;  %v2404_v0 = vadd.f32 %v2396_v47, %v2380_v49  ;;  %v2420_v4 = vmul.f32 16.0, %v2412_v56 }
 0x2c0   : > { %v2431_v59 = vadd.f32 %v2423_v48, %v2407_v51  ;;  %v2449_v60 = vrot.slane %v2448_v52, 4  ;;  %v2376_v1 = vadd.f32 %v2368_v57, %v2312_v53  ;;  %v2400_v3 = vmul.f32 %v2392_v41, %v2312_v53 }
 0x2c1   : > { %v2445_v36 = vadd.f32 %v2444_v30, %v4373_v9  ;;  %v2424_v12 = vmul.f32 16.0, %v2416_v40  ;;  %v2501_v16 = vrot.slane %v2500_v50, 2  ;;  %v2428_v17 = vadd.f32 %v2420_v4, %v2404_v0 }
 0x2c2   : > { %v2450_v7 = vadd.f32 %v2449_v60, %v2448_v52  ;;  %v2512_v8 = vadd.f32 %v2431_v59, %v2427_v58  ;;  %v2408_v10 = vadd.f32 %v2400_v3, %v2384_v62  ;;  %v2455_v13 = vadd.f32 %v2376_v1, %v2372_v63  ;;  %v2433_v60 = vld [vmem:[%s3649_s21] sm:$0xf] }
 0x2c3   : > { %v2446_v21 = vrot.slane %v2445_v36, 1  ;;  %v3507_v22 = vmov 1966171168   ;;  %v2509_v23 = vadd.f32 %v2508_v6, %v2507_v31  ;;  %v2439_v27 = vrot.slane %v2438_v34, 1 }
 0x2c4   : > { %v2451_v14 = vrot.slane %v2450_v7, 2  ;;  %v2513_v15 = vrot.slane %v2512_v8, 4  ;;  %v2432_v19 = vadd.f32 %v2424_v12, %v2408_v10  ;;  %v2456_v20 = vrot.slane %v2455_v13, 4 }
 0x2c5   : > { %v2469_v2 = vunpack.c.l.s4 %v3507_v22  ;;  %v2502_v29 = vadd.f32 %v2501_v16, %v2500_v50  ;;  %v2447_v61 = vadd.f32 %v2446_v21, %v2445_v36  ;;  %v2472_v33 = vshrl.u32 %v1245_v5, 7  ;;  %v2497_v36 = vld [vmem:[%s3654_s24] sm:$0xf] }
 0x2c6   : > { %v2514_v9 = vadd.f32 %v2513_v15, %v2512_v8  ;;  %v2452_v24 = vadd.f32 %v2451_v14, %v2450_v7  ;;  %v2457_v25 = vadd.f32 %v2456_v20, %v2455_v13  ;;  %v2519_v26 = vadd.f32 %v2432_v19, %v2428_v17 }
 0x2c7   : > { %v2470_v18 = vunpack.c.0.s8 %v2469_v2  ;;  %v2510_v35 = vrot.slane %v2509_v23, 1  ;;  %v2440_v43 = vadd.f32 %v2439_v27, %v2438_v34  ;;  %v2503_v31 = vrot.slane %v2502_v29, 1 }
 0x2c8   : > { %v2515_v28 = vrot.slane %v2514_v9, 2  ;;  %v2458_v30 = vrot.slane %v2457_v25, 2  ;;  %v2520_v32 = vrot.slane %v2519_v26, 4  ;;  %v2453_v37 = vrot.slane %v2452_v24, 1 }
 0x2c9   : > { %v2466_v46 = vcombine.low %v2440_v43, %v2447_v61  ;;  %v2473_v47 = vsub.s32 %v2470_v18, %v2472_v33  ;;  %v2511_v48 = vadd.f32 %v2510_v35, %v2509_v23  ;;  %v2504_v54 = vadd.f32 %v2503_v31, %v2502_v29 }
 0x2ca   : > { %v2516_v38 = vadd.f32 %v2515_v28, %v2514_v9  ;;  %v2459_v39 = vadd.f32 %v2458_v30, %v2457_v25  ;;  %v2521_v42 = vadd.f32 %v2520_v32, %v2519_v26  ;;  %v2454_v49 = vadd.f32 %v2453_v37, %v2452_v24 }
 0x2cb   : > { %v2474_v56 = vrot.slane %v2466_v46, %v2473_v47  ;;  %v2530_v57 = vcombine.low %v2504_v54, %v2511_v48 }
 0x2cc   : > { %v2460_v44 = vrot.slane %v2459_v39, 1  ;;  %v2522_v45 = vrot.slane %v2521_v42, 2  ;;  %v2517_v51 = vrot.slane %v2516_v38, 1 }
 0x2cd   : > { %v2538_v62 = vrot.slane %v2530_v57, %v2473_v47 }
 0x2ce   : > { %v2461_v52 = vadd.f32 %v2460_v44, %v2459_v39  ;;  %v2523_v53 = vadd.f32 %v2522_v45, %v2521_v42  ;;  %v2518_v41 = vadd.f32 %v2517_v51, %v2516_v38 }
 0x2d0   : > { %v2467_v5 = vcombine.low %v2454_v49, %v2461_v52  ;;  %v2524_v55 = vrot.slane %v2523_v53, 1 }
 0x2d2   : > { %v2481_v40 = vrot.slane %v2467_v5, %v2473_v47  ;;  %v2525_v50 = vadd.f32 %v2524_v55, %v2523_v53 }
 0x2d4   : > { %v2482_v58 = vcombine.low %v2474_v56, %v2481_v40  ;;  %v2531_v59 = vcombine.low %v2518_v41, %v2525_v50 }
 0x2d6   : > { %v2489_v63 = vrot.slane %v2482_v58, %v2473_v47  ;;  %v2545_v0 = vrot.slane %v2531_v59, %v2473_v47 }
 0x2d8   : > { %v2491_v1 = vadd.f32 %v2489_v63, %v2433_v60  ;;  %v2546_v3 = vcombine.low %v2538_v62, %v2545_v0 }
 0x2da   : > { %2496 = vst.msk [vmem:[%s3649_s21] sm:$0xf] %vm3616_vm0, %v2491_v1  ;;  %v2553_v6 = vrot.slane %v2546_v3, %v2473_v47 }
 0x2dc   : > { %v2555_v7 = vadd.f32 %v2553_v6, %v2497_v36 }
 0x2de   : > { %2556 = vst.msk [vmem:[%s3654_s24] sm:$0xf] %vm3616_vm0, %v2555_v7 }
 0x2df PF: > { %s25_s12 = sadd.s32 1, %s3498_s12   ;;  %s4434_s10 = smov %s3494_s11 }
 0x2e0   : > { %p22_p11 = scmp.ge.s32.totalorder %s25_s12, 4   ;;  %s4435_s11 = smov %s4437_s0 }
 0x2e2   :  { %24 = sbr.rel (!%p22_p11) target bundleno = 19 (0x13), region = 147 }

// kernel: dgcnn_propagation.7
= control target key start
LH: loop header
LB: loop body
LE: loop exit
PB: predicated region body
PF: predicated region fallthrough
CT: control target
= control target key end

     0   :  { %9 = vsyncpa [#allocation3], 0  ;;  %s902_s0 = inlined_call_operand.vmem [shape: f32[2,16,384], index: 0, kind: input, shape index: {}]   ;;  %s903_s1 = inlined_call_operand.vmem [shape: f32[2,16,384], index: 1, kind: input, shape index: {}]   ;;  %s904_s2 = inlined_call_operand.vmem [shape: f32[2,1,384], index: 2, kind: input, shape index: {}]   ;;  %s905_s3 = inlined_call_operand.vmem [shape: f32[2,1,384], index: 3, kind: input, shape index: {}]   ;;  %s906_s4 = inlined_call_operand.hbm [shape: f32[2,16,384], index: 4, kind: output, shape index: {}]  }
   0x1   :  { %11 = vsyncpa [#allocation3 + $0x1], 0  ;;  %s731_s15 = smov 0   ;;  %s733_s16 = smov 0  }
   0x2   :  { %s735_s17 = smov 0   ;;  %s737_s18 = smov 0  }
   0x3   :  { %s739_s19 = smov 0   ;;  %s741_s20 = smov 0  }
   0x4 LB: > { %s552_s21 = sadd.s32 4294967295, %s700_s20   ;;  %s553_s22 = sadd.s32 4294967294, %s700_s20   ;;  %s700_s20 = sphi %s741_s20, %s17_s20   ;;  %s696_s19 = sphi %s739_s19, %s917_s19   ;;  %s692_s18 = sphi %s737_s18, %s916_s18   ;;  %s688_s17 = sphi %s735_s17, %s915_s17   ;;  %s684_s16 = sphi %s733_s16, %s914_s16   ;;  %s680_s15 = sphi %s731_s15, %s913_s15  }
   0x5   : > { %s29_s23 = sadd.s32 1, %s696_s19  ;;  %s146_s24 = sadd.s32 1, %s688_s17 }
   0x6   : > { %p31_p0 = scmp.ge.s32.totalorder %s29_s23, 2  ;;  %p156_p1 = scmp.ne.s32.totalorder %s688_s17, %s684_s16 }
   0x7   : > { %p157_p2 = scmp.eq.s32.totalorder %s552_s21, 1  ;;  %p162_p3 = scmp.ne.s32.totalorder %s684_s16, %s680_s15 }
   0x8   : > { %s919_s23 = smov (%p31_p0, %s29_s23), 0  ;;  %p163_p5 = scmp.eq.s32.totalorder %s553_s22, 1 }
   0x9   : > { %p771_p4 = por %p157_p2, %p156_p1  ;;  %s141_s26 = ssub.s32 %s696_s19, %s919_s23 }
   0xa   : > { %p556_p6 = scmp.ge.s32.totalorder %s700_s20, 1  ;;  %p144_p7 = scmp.eq.s32.totalorder %s141_s26, 0 }
   0xb   : > { %p778_p8 = por %p163_p5, %p162_p3  ;;  %p223_p9 = scmp.lt.s32.totalorder %s700_s20, 3 }
   0xc   : > { %s784_s28 = scalar_select %p144_p7, %s688_s17, %s146_s24  }
   0xd   : > { %p224_p10 = pnand %p556_p6, %p223_p9 }
   0xe   : > { %p273_p11 = scmp.lt.s32.totalorder (!%p224_p10), %s692_s18, 1  ;;  %s269_s26 = sand.u32 (!%p224_p10), 1, %s684_s16  }
   0xf   : > { %227 = sbr.rel (%p224_p10) target bundleno = 59 (0x3b), region = 36  ;;  %s857_s9 = scalar_lea.sflag (!%p224_p10), [#allocation3], %s269_s26 }
  0x10   : > { %s565_s6 = smul.u32 (!%p224_p10), 768, %s692_s18 }
  0x14   : > { %v319_v0 = vlaneseq  ;;  %s274_s29 = scalar_select %p273_p11, %s692_s18, 1  ;;  %v702_v9 = vmov 0  }
  0x16   : > { %v320_v1 = vshrl.u32 %v319_v0, 7  ;;  %s563_s30 = smul.u32 48, %s274_s29 }
  0x17   : > { %s564_s5 = smul.u32 3, %s274_s29 }
  0x18   : > { %s791_s8 = scalar_lea.vmem %s902_s0, %s563_s30  ;;  %s796_s11 = scalar_lea.vmem %s903_s1, %s563_s30  ;;  %v321_v2 = vsub.s32 0, %v320_v1  ;;  %v325_v3 = vsub.s32 1, %v320_v1  ;;  %v329_v4 = vsub.s32 2, %v320_v1 }
  0x19   : > { %s297_s14 = scalar_lea.vmem %s904_s2, %s564_s5  ;;  %s301_s24 = scalar_lea.vmem %s905_s3, %s564_s5  ;;  %v306_v7 = vld [vmem:[%s791_s8] sm:$0xff]  ;;  %v307_v12 = vld [vmem:[%s791_s8 + $0x8] sm:$0xff]  ;;  %v308_v15 = vld [vmem:[%s791_s8 + $0x10] sm:$0xff] }
  0x1a   : > { %v303_v5 = vld [vmem:[%s297_s14] sm:$0x7]  ;;  %v313_v13 = vld [vmem:[%s796_s11 + $0x8] sm:$0xff]  ;;  %s812_s29 = smul.u32 48, %s269_s26  ;;  %v314_v18 = vld [vmem:[%s796_s11 + $0x10] sm:$0xff] }
  0x1b   : > { %v304_v6 = vld [vmem:[%s301_s24] sm:$0x7]  ;;  %vm305_vm0 = vcmp.ge.f32.partialorder %v303_v5, 0.0  ;;  %v344_v11 = vrot.slane %v303_v5, %v321_v2  ;;  %v348_v14 = vrot.slane %v303_v5, %v325_v3  ;;  %v352_v20 = vrot.slane %v303_v5, %v329_v4  ;;  %v309_v21 = vld [vmem:[%s791_s8 + $0x18] sm:$0xff]  ;;  %v311_v30 = vld [vmem:[%s791_s8 + $0x28] sm:$0xff] }
  0x1c   : > { %v312_v8 = vld [vmem:[%s796_s11] sm:$0xff]  ;;  %v318_v10 = vsel %vm305_vm0, 1, %v702_v9  ;;  %v315_v22 = vld [vmem:[%s796_s11 + $0x18] sm:$0xff]  ;;  %v366_v23 = vrot.slane %v304_v6, %v321_v2  ;;  %v370_v24 = vrot.slane %v304_v6, %v325_v3  ;;  %v374_v28 = vrot.slane %v304_v6, %v329_v4  ;;  %v317_v31 = vld [vmem:[%s796_s11 + $0x28] sm:$0xff]  ;;  %s838_s30 = scalar_lea.vmem [#allocation2], %s812_s29 }
  0x1d   : > { %v322_v16 = vrot.slane %v318_v10, %v321_v2  ;;  %v326_v17 = vrot.slane %v318_v10, %v325_v3  ;;  %v330_v19 = vrot.slane %v318_v10, %v329_v4  ;;  %v310_v25 = vld [vmem:[%s791_s8 + $0x20] sm:$0xff]  ;;  %s425_s5 = sshll.u32 %s838_s30, 4  ;;  %s851_s8 = scalar_lea.hbm %s906_s4, %s565_s6  ;;  %s844_s5 = int_to_ptr.vmem [resolvable:$true] %s425_s5 }
  0x1e   : > { %v316_v29 = vld [vmem:[%s796_s11 + $0x20] sm:$0xff]  ;;  %s624_s10 = scalar_lea.vmem %s844_s5, 768  ;;  %s703_s11 = smov [#allocation2]  }
  0x1f   : > { %vm331_vm1 = vcmp.eq.s32.totalorder %v322_v16, 1  ;;  %vm818_vm2 = vcmp.eq.s32.totalorder %v326_v17, 1  ;;  %vm822_vm3 = vcmp.eq.s32.totalorder %v330_v19, 1  ;;  %p625_p12 = scmp.ne.s32.totalorder %s844_s5, %s624_s10  ;;  %s628_s12 = sshll.u32 %s703_s11, 4  ;;  %s629_s12 = int_to_ptr.vmem [resolvable:$false] %s628_s12 }
  0x20   : > { %v334_v32 = vsel %vm331_vm1, %v306_v7, %v312_v8  ;;  %v335_v33 = vsel %vm818_vm2, %v307_v12, %v313_v13  ;;  %v336_v34 = vsel %vm822_vm3, %v308_v15, %v314_v18  ;;  %v337_v35 = vsel %vm331_vm1, %v309_v21, %v315_v22  ;;  %s630_s13 = scalar_lea.vmem %s629_s12, 1536  ;;  %p631_p1 = scmp.lt.s32.totalorder %s844_s5, %s629_s12 }
  0x21   : > { %v356_v36 = vmul.f32 %v344_v11, %v334_v32  ;;  %v357_v37 = vmul.f32 %v348_v14, %v335_v33  ;;  %v358_v38 = vmul.f32 %v352_v20, %v336_v34  ;;  %v359_v39 = vmul.f32 %v344_v11, %v337_v35  ;;  %p626_p13 = pnand %p625_p12, %p771_p4  ;;  %p632_p2 = scmp.lt.s32.totalorder %s630_s13, %s624_s10 }
  0x22   : > { %v338_v40 = vsel %vm818_vm2, %v310_v25, %v316_v29  ;;  %v339_v41 = vsel %vm822_vm3, %v311_v30, %v317_v31 }
  0x23   : > { %v378_v42 = vadd.f32 %v366_v23, %v356_v36  ;;  %v379_v43 = vadd.f32 %v370_v24, %v357_v37  ;;  %v380_v44 = vadd.f32 %v374_v28, %v358_v38  ;;  %v381_v45 = vadd.f32 %v366_v23, %v359_v39  ;;  %p627_p0 = pneg %p626_p13  ;;  %p633_p3 = por %p632_p2, %p631_p1 }
  0x24   : > { %v360_v46 = vmul.f32 %v348_v14, %v338_v40  ;;  %v361_v47 = vmul.f32 %v352_v20, %v339_v41 }
  0x25   : > { %vm384_vm4 = vcmp.gt.f32.partialorder %v378_v42, 0.0  ;;  %v390_v48 = vmul.f32 0.2, %v378_v42  ;;  %vm385_vm5 = vcmp.gt.f32.partialorder %v379_v43, 0.0  ;;  %v391_v49 = vmul.f32 0.2, %v379_v43  ;;  %p634_p5 = pnand %p633_p3, %p627_p0 }
  0x26   : > { %vm386_vm6 = vcmp.gt.f32.partialorder %v380_v44, 0.0  ;;  %v392_v50 = vmul.f32 0.2, %v380_v44  ;;  %vm387_vm7 = vcmp.gt.f32.partialorder %v381_v45, 0.0  ;;  %v393_v51 = vmul.f32 0.2, %v381_v45 }
  0x27   : > { %v396_v52 = vsel %vm384_vm4, %v378_v42, %v390_v48  ;;  %v397_v53 = vsel %vm385_vm5, %v379_v43, %v391_v49  ;;  %v382_v54 = vadd.f32 %v370_v24, %v360_v46  ;;  %v383_v55 = vadd.f32 %v374_v28, %v361_v47 }
  0x28   : > { %402 = vst [vmem:[%s838_s30] sm:$0xff] %v396_v52  ;;  %403 = vst [vmem:[%s838_s30 + $0x8] sm:$0xff] %v397_v53  ;;  %v398_v56 = vsel %vm386_vm6, %v380_v44, %v392_v50  ;;  %v399_v57 = vsel %vm387_vm7, %v381_v45, %v393_v51 }
  0x29   : > { %404 = vst [vmem:[%s838_s30 + $0x10] sm:$0xff] %v398_v56  ;;  %405 = vst [vmem:[%s838_s30 + $0x18] sm:$0xff] %v399_v57  ;;  %vm388_vm8 = vcmp.gt.f32.partialorder %v382_v54, 0.0  ;;  %v394_v58 = vmul.f32 0.2, %v382_v54  ;;  %vm389_vm9 = vcmp.gt.f32.partialorder %v383_v55, 0.0 }
  0x2a   : > { %v395_v59 = vmul.f32 0.2, %v383_v55 }
  0x2b   : > { %v400_v60 = vsel %vm388_vm8, %v382_v54, %v394_v58 }
  0x2c   : > { %v401_v61 = vsel %vm389_vm9, %v383_v55, %v395_v59  ;;  %406 = vst [vmem:[%s838_s30 + $0x20] sm:$0xff] %v400_v60 }
  0x2d   : > { %407 = vst [vmem:[%s838_s30 + $0x28] sm:$0xff] %v401_v61 }
  0x2e   : > { %637 = shalt.err (!%p634_p5)
}
  0x2f   : > { %s638_s14 = scalar_lea.hbm %s851_s8, 768  ;;  %s642_s24 = scalar_lea.hbm %s906_s4, 1536 }
  0x30   : > { %p639_p6 = scmp.ne.s32.totalorder %s851_s8, %s638_s14  ;;  %p643_p10 = scmp.lt.s32.totalorder %s851_s8, %s906_s4 }
  0x31   : > { %p644_p11 = scmp.lt.s32.totalorder %s642_s24, %s638_s14 }
  0x32   : > { %p640_p7 = pnand %p639_p6, %p771_p4 }
  0x33   : > { %p645_p12 = por %p644_p11, %p643_p10 }
  0x34   : > { %p641_p9 = pneg %p640_p7 }
  0x36   : > { %p646_p13 = pnand %p645_p12, %p641_p9 }
  0x38   : > { %649 = shalt.err (!%p646_p13)
}
  0x39   : > { %s704_s30 = smov 384   ;;  %s705_s6 = smov 24  }
  0x3a   : > { %566 = dma.vmem_to_hbm [thread:$0]  (%p771_p4), %s844_s5, 768, %s851_s8, %s857_s9, %s704_s30, %s704_s30, %s705_s6  }
  0x3b PF: > { %p572_p0 = scmp.ge.s32.totalorder %s700_s20, 2  ;;  %s440_s18 = sand.u32 1, %s680_s15  }
  0x3c   : > { %s441_s7 = scalar_lea.sflag [#allocation3], %s440_s18 }
  0x3d   : > { %p569_p1 = pnand %p572_p0, %p778_p8 }
  0x3f   : > { %p570_p2 = pneg %p569_p1 }
  0x41   : > { %675 = dma.done.wait (%p570_p2), %s441_s7, 768  }
  0x42   : > { %677 = vsyncadd (%p570_p2), %s441_s7, 4294966528  ;;  %s17_s20 = sadd.s32 1, %s700_s20   ;;  %s913_s15 = smov %s684_s16 }
  0x43   : > { %p14_p3 = scmp.ge.s32.totalorder %s17_s20, 4   ;;  %s914_s16 = smov %s688_s17 }
  0x44   : > { %s915_s17 = smov %s784_s28  ;;  %s916_s18 = smov %s696_s19 }
  0x45   : > { %s917_s19 = smov %s919_s23  ;;  %16 = sbr.rel (!%p14_p3) target bundleno = 4 (0x4), region = 80 }
  0x4a   :  { %446 = vsyncpa [#allocation3], 1 }
  0x4b   :  { %448 = vsyncpa [#allocation3 + $0x1], 1 }

// kernel: dgcnn_propagation.6
= control target key start
LH: loop header
LB: loop body
LE: loop exit
PB: predicated region body
PF: predicated region fallthrough
CT: control target
= control target key end

     0   :  { %s4421_s0 = inlined_call_operand.vmem [shape: s32[512], index: 0, kind: input, shape index: {}]   ;;  %s4422_s1 = inlined_call_operand.vmem [shape: bf16[2,16,512], index: 1, kind: input, shape index: {}, may-alias: {1,2}]   ;;  %s4423_s2 = inlined_call_operand.vmem [shape: bf16[2,16,512], index: 2, kind: input, shape index: {}, may-alias: {1,2}]   ;;  %s4424_s3 = inlined_call_operand.vmem [shape: bf16[512,384], index: 3, kind: input, shape index: {}]   ;;  %s4425_s4 = inlined_call_operand.vmem [shape: bf16[512,384], index: 4, kind: input, shape index: {}]   ;;  %s4426_s5 = inlined_call_operand.vmem [shape: f32[2,16,384], index: 5, kind: output, shape index: {0}]   ;;  %s4427_s6 = inlined_call_operand.vmem [shape: f32[2,16,384], index: 6, kind: output, shape index: {1}]   ;;  %s4428_s7 = inlined_call_operand.vmem [shape: f32[2,1,384], index: 7, kind: output, shape index: {2}]   ;;  %s4429_s8 = inlined_call_operand.vmem [shape: f32[2,1,384], index: 8, kind: output, shape index: {3}]  }
   0x1   :  { %4431 = sst [smem:[#allocation9_spill]] %s4422_s1  ;;  %s14_s29 = sshll.u32 %s4421_s0, 4  ;;  %s15_s29 = int_to_ptr.vmem [resolvable:$true] %s14_s29 }
   0x2   :  { %4432 = sst [smem:[#allocation10_spill]] %s4423_s2  ;;  %s3485_s30 = scalar_lea.vmem %s15_s29, 64 }
   0x3   :  { %4433 = sst [smem:[#allocation11_spill]] %s4424_s3  ;;  %p3486_p0 = scmp.ne.s32.totalorder %s15_s29, %s3485_s30 }
   0x4   :  { %4434 = sst [smem:[#allocation12_spill]] %s4426_s5  ;;  %p3490_p1 = scmp.lt.s32.totalorder %s15_s29, %s15_s29 }
   0x5   :  { %4435 = sst [smem:[#allocation13_spill]] %s4427_s6  ;;  %p3491_p2 = scmp.lt.s32.totalorder %s3485_s30, %s3485_s30 }
   0x6   :  { %4436 = sst [smem:[#allocation14_spill]] %s4428_s7 }
   0x7   :  { %4437 = sst [smem:[#allocation15_spill]] %s4429_s8  ;;  %p3492_p3 = por %p3491_p2, %p3490_p1 }
   0x9   :  { %p3493_p4 = pnand %p3492_p3, %p3486_p0 }
   0xb   :  { %3496 = shalt.err (!%p3493_p4)  }
   0xc   :  { %s3531_s9 = smov [#allocation6]  }
   0xd   :  { %17 = dma.vmem_to_smem %s15_s29, 64, %s3531_s9, [#allocation5] }
   0xe   :  { %3513 = dma.done.wait [#allocation5], 64 }
   0xf   :  { %3514 = vsyncadd [#allocation5], 4294967232 }
  0x10   :  { %19 = sfence }
  0x11   :  { %s3582_s10 = smov 0   ;;  %s3584_s11 = smov 0  }
  0x12   :  { %s3586_s12 = smov 0  }
  0x13 LB: > { %4438 = sst [smem:[#allocation8_spill]] %s3517_s10  ;;  %s37_s0 = sadd.s32 1, %s3521_s11  ;;  %s3525_s12 = sphi %s3586_s12, %s25_s12   ;;  %s3521_s11 = sphi %s3584_s11, %s4454_s11   ;;  %s3517_s10 = sphi %s3582_s10, %s4453_s10  }
  0x14   : > { %p2860_p5 = scmp.ge.s32.totalorder %s3525_s12, 1  ;;  %p39_p6 = scmp.ge.s32.totalorder %s37_s0, 2 }
  0x15   : > { %p285_p7 = scmp.lt.s32.totalorder %s3525_s12, 3 }
  0x16   : > { %s4456_s0 = smov (%p39_p6, %s37_s0), 0 }
  0x17   : > { %p286_p8 = pnand %p2860_p5, %p285_p7 }
  0x18   : > { %s4439_s3 = sld [smem:[#allocation11_spill]] (!%p286_p8)  ;;  %p350_p9 = scmp.lt.s32.totalorder (!%p286_p8), %s3517_s10, 1 }
  0x19   : > { %289 = sbr.rel (%p286_p8) target bundleno = 734 (0x2de), region = 36  ;;  %s4440_s2 = sld [smem:[#allocation10_spill]] (!%p286_p8) }
  0x1a   : > { %s4441_s5 = sld [smem:[#allocation12_spill]] (!%p286_p8) }
  0x1b   : > { %s4442_s6 = sld [smem:[#allocation13_spill]] (!%p286_p8) }
  0x1c   : > { %s4445_s7 = sld [smem:[#allocation14_spill]] (!%p286_p8) }
  0x1d   : > { %s4446_s8 = sld [smem:[#allocation15_spill]] (!%p286_p8) }
  0x1e   : > { %v3217_v0 = vld [vmem:[%s4439_s3 + $0xac] ss:$12 sps:$4 sm:$0xff]   ;;  %v3221_v2 = vld [vmem:[%s4439_s3 + $0xa8] ss:$12 sps:$4 sm:$0xff]   ;;  %s3616_s21 = scalar_select %p350_p9, %s3517_s10, 1  ;;  %v1239_v8 = vlaneseq  ;;  %v3532_v19 = vmov 0.0  }
  0x1f   : > { %v3219_v1 = vld [vmem:[%s4439_s3 + $0x22c] ss:$12 sps:$4 sm:$0xff]   ;;  %1065 = vmatprep.subr.bf16.mxu0 %v3217_v0  ;;  %v3222_v3 = vld [vmem:[%s4439_s3 + $0x228] ss:$12 sps:$4 sm:$0xff]   ;;  %v3227_v6 = vld [vmem:[%s4439_s3 + $0x90] ss:$12 sps:$4 sm:$0xff]  }
  0x20   : > { %1108 = vmatprep.subr.bf16.mxu1 %v3219_v1  ;;  %v3223_v4 = vld [vmem:[%s4439_s3 + $0x94] ss:$12 sps:$4 sm:$0xff]   ;;  %1066 = vmatpush1.bf16.msra.mxu0 %v3221_v2  ;;  %s3089_s28 = sshll.u32 %s3616_s21, 5  ;;  %v3228_v7 = vld [vmem:[%s4439_s3 + $0x210] ss:$12 sps:$4 sm:$0xff]   ;;  %s3180_s17 = smul.u32 48, %s3616_s21 }
  0x21   : > { %1109 = vmatpush1.bf16.msra.mxu1 %v3222_v3  ;;  %v3225_v5 = vld [vmem:[%s4439_s3 + $0x214] ss:$12 sps:$4 sm:$0xff]   ;;  %1067 = vmatprep.subr.bf16.mxu0 %v3223_v4  ;;  %s3636_s14 = scalar_lea.vmem %s4440_s2, %s3089_s28  ;;  %v3229_v9 = vld [vmem:[%s4439_s3 + $0x7c] ss:$12 sps:$4 sm:$0xff]   ;;  %v3233_v11 = vld [vmem:[%s4439_s3 + $0x78] ss:$12 sps:$4 sm:$0xff]  }
  0x22   : > { %1110 = vmatprep.subr.bf16.mxu1 %v3225_v5  ;;  %v3231_v10 = vld [vmem:[%s4439_s3 + $0x1fc] ss:$12 sps:$4 sm:$0xff]   ;;  %v3234_v12 = vld [vmem:[%s4439_s3 + $0x1f8] ss:$12 sps:$4 sm:$0xff]   ;;  %s3657_s30 = scalar_lea.vmem %s4441_s5, %s3180_s17  ;;  %s3662_s15 = scalar_lea.vmem %s4442_s6, %s3180_s17  ;;  %vm3669_vm0 = vcmp.lt.s32.totalorder %v1239_v8, 384 }
  0x23   : > { %v3235_v13 = vld [vmem:[%s4439_s3 + $0x64] ss:$12 sps:$4 sm:$0xff]   ;;  %s3181_s19 = smul.u32 3, %s3616_s21  ;;  %v3239_v16 = vld [vmem:[%s4439_s3 + $0x60] ss:$12 sps:$4 sm:$0xff]   ;;  %s4447_s1 = sld [smem:[#allocation9_spill]] }
  0x24   : > { %1068 = vmatpush1.bf16.msra.mxu0 %v3227_v6  ;;  %v3237_v14 = vld [vmem:[%s4439_s3 + $0x1e4] ss:$12 sps:$4 sm:$0xff]   ;;  %v3240_v17 = vld [vmem:[%s4439_s3 + $0x1e0] ss:$12 sps:$4 sm:$0xff]   ;;  %v3245_v21 = vld [vmem:[%s4439_s3 + $0x48] ss:$12 sps:$4 sm:$0xff]  }
  0x25   : > { %1111 = vmatpush1.bf16.msra.mxu1 %v3228_v7  ;;  %1069 = vmatprep.subr.bf16.mxu0 %v3229_v9  ;;  %s3679_s17 = scalar_lea.vmem %s4445_s7, %s3181_s19  ;;  %s3684_s27 = scalar_lea.vmem %s4446_s8, %s3181_s19  ;;  %v3241_v18 = vld [vmem:[%s4439_s3 + $0x4c] ss:$12 sps:$4 sm:$0xff]   ;;  %v3246_v22 = vld [vmem:[%s4439_s3 + $0x1c8] ss:$12 sps:$4 sm:$0xff]   ;;  %v3251_v25 = vld [vmem:[%s4439_s3 + $0x30] ss:$12 sps:$4 sm:$0xff]  }
  0x26   : > { %1112 = vmatprep.subr.bf16.mxu1 %v3231_v10  ;;  %1243 = vst.msk [vmem:[%s3679_s17] sm:$0x7] %vm3669_vm0, %v3532_v19  ;;  %1244 = vst.msk [vmem:[%s3684_s27] sm:$0x7] %vm3669_vm0, %v3532_v19  ;;  %v3243_v20 = vld [vmem:[%s4439_s3 + $0x1cc] ss:$12 sps:$4 sm:$0xff]  }
  0x27   : > { %v3247_v23 = vld [vmem:[%s4439_s3 + $0x34] ss:$12 sps:$4 sm:$0xff]   ;;  %v3252_v26 = vld [vmem:[%s4439_s3 + $0x1b0] ss:$12 sps:$4 sm:$0xff]   ;;  %v3257_v29 = vld [vmem:[%s4439_s3 + $0x18] ss:$12 sps:$4 sm:$0xff]  }
  0x28   : > { %1070 = vmatpush1.bf16.msra.mxu0 %v3233_v11  ;;  %v3249_v24 = vld [vmem:[%s4439_s3 + $0x1b4] ss:$12 sps:$4 sm:$0xff]   ;;  %v3253_v27 = vld [vmem:[%s4439_s3 + $0x1c] ss:$12 sps:$4 sm:$0xff]   ;;  %v3258_v30 = vld [vmem:[%s4439_s3 + $0x198] ss:$12 sps:$4 sm:$0xff]  }
  0x29   : > { %1113 = vmatpush1.bf16.msra.mxu1 %v3234_v12  ;;  %1071 = vmatprep.subr.bf16.mxu0 %v3235_v13  ;;  %v3255_v28 = vld [vmem:[%s4439_s3 + $0x19c] ss:$12 sps:$4 sm:$0xff]   ;;  %v3259_v31 = vld [vmem:[%s4439_s3 + $0x4] ss:$12 sps:$4 sm:$0xff]   ;;  %v3263_v33 = vld [vmem:[%s4439_s3] ss:$12 sps:$4 sm:$0xff]   ;;  %s3787_s13 = scalar_lea.vmem %s4447_s1, %s3089_s28 }
  0x2a   : > { %1114 = vmatprep.subr.bf16.mxu1 %v3237_v14  ;;  %v3261_v32 = vld [vmem:[%s4439_s3 + $0x184] ss:$12 sps:$4 sm:$0xff]   ;;  %v3264_v34 = vld [vmem:[%s4439_s3 + $0x180] ss:$12 sps:$4 sm:$0xff]   ;;  %v3269_v37 = vld [vmem:[%s4439_s3 + $0x168] ss:$12 sps:$4 sm:$0xff]  }
  0x2b   : > { %v3265_v35 = vld [vmem:[%s4439_s3 + $0x16c] ss:$12 sps:$4 sm:$0xff]   ;;  %v3270_v38 = vld [vmem:[%s4439_s3 + $0x2e8] ss:$12 sps:$4 sm:$0xff]   ;;  %v3275_v41 = vld [vmem:[%s4439_s3 + $0x150] ss:$12 sps:$4 sm:$0xff]  }
  0x2c   : > { %1072 = vmatpush1.bf16.msra.mxu0 %v3239_v16  ;;  %v3267_v36 = vld [vmem:[%s4439_s3 + $0x2ec] ss:$12 sps:$4 sm:$0xff]   ;;  %v3271_v39 = vld [vmem:[%s4439_s3 + $0x154] ss:$12 sps:$4 sm:$0xff]   ;;  %v3276_v42 = vld [vmem:[%s4439_s3 + $0x2d0] ss:$12 sps:$4 sm:$0xff]  }
  0x2d   : > { %1115 = vmatpush1.bf16.msra.mxu1 %v3240_v17  ;;  %1073 = vmatprep.subr.bf16.mxu0 %v3241_v18  ;;  %v3273_v40 = vld [vmem:[%s4439_s3 + $0x2d4] ss:$12 sps:$4 sm:$0xff]   ;;  %v3277_v43 = vld [vmem:[%s4439_s3 + $0x13c] ss:$12 sps:$4 sm:$0xff]   ;;  %v3281_v45 = vld [vmem:[%s4439_s3 + $0x138] ss:$12 sps:$4 sm:$0xff]  }
  0x2e   : > { %1116 = vmatprep.subr.bf16.mxu1 %v3243_v20  ;;  %v3279_v44 = vld [vmem:[%s4439_s3 + $0x2bc] ss:$12 sps:$4 sm:$0xff]   ;;  %v3282_v46 = vld [vmem:[%s4439_s3 + $0x2b8] ss:$12 sps:$4 sm:$0xff]   ;;  %v3287_v49 = vld [vmem:[%s4439_s3 + $0x120] ss:$12 sps:$4 sm:$0xff]  }
  0x2f   : > { %v3283_v47 = vld [vmem:[%s4439_s3 + $0x124] ss:$12 sps:$4 sm:$0xff]   ;;  %v3288_v50 = vld [vmem:[%s4439_s3 + $0x2a0] ss:$12 sps:$4 sm:$0xff]   ;;  %v3293_v55 = vld [vmem:[%s4439_s3 + $0x108] ss:$12 sps:$4 sm:$0xff]  }
  0x30   : > { %1074 = vmatpush1.bf16.msra.mxu0 %v3245_v21  ;;  %v3285_v48 = vld [vmem:[%s4439_s3 + $0x2a4] ss:$12 sps:$4 sm:$0xff]   ;;  %v3289_v51 = vld [vmem:[%s4439_s3 + $0x10c] ss:$12 sps:$4 sm:$0xff]   ;;  %v3294_v56 = vld [vmem:[%s4439_s3 + $0x288] ss:$12 sps:$4 sm:$0xff]  }
  0x31   : > { %1117 = vmatpush1.bf16.msra.mxu1 %v3246_v22  ;;  %1075 = vmatprep.subr.bf16.mxu0 %v3247_v23  ;;  %v3315_v52 = vld [vmem:[%s3787_s13 + $0x4] ss:$16 sps:$4 sm:$0xff]   ;;  %v3291_v53 = vld [vmem:[%s4439_s3 + $0x28c] ss:$12 sps:$4 sm:$0xff]   ;;  %v3299_v59 = vld [vmem:[%s4439_s3 + $0xf0] ss:$12 sps:$4 sm:$0xff]  }
  0x32   : > { %1118 = vmatprep.subr.bf16.mxu1 %v3249_v24  ;;  %v3318_v54 = vld [vmem:[%s3787_s13 + $0xc] ss:$16 sps:$4 sm:$0xff]   ;;  %1097 = vmatprep.mubr.bf16.mxu0 %v3315_v52  ;;  %v3295_v57 = vld [vmem:[%s4439_s3 + $0xf4] ss:$12 sps:$4 sm:$0xff]   ;;  %v3305_v63 = vld [vmem:[%s4439_s3 + $0xd8] ss:$12 sps:$4 sm:$0xff]  }
  0x33   : > { %1140 = vmatprep.mubr.bf16.mxu1 %v3318_v54  ;;  %v3297_v58 = vld [vmem:[%s4439_s3 + $0x274] ss:$12 sps:$4 sm:$0xff]   ;;  %v3300_v60 = vld [vmem:[%s4439_s3 + $0x270] ss:$12 sps:$4 sm:$0xff]   ;;  %v3306_v0 = vld [vmem:[%s4439_s3 + $0x258] ss:$12 sps:$4 sm:$0xff]  }
  0x34   : > { %1076 = vmatpush1.bf16.msra.mxu0 %v3251_v25  ;;  %v3301_v61 = vld [vmem:[%s4439_s3 + $0xdc] ss:$12 sps:$4 sm:$0xff]   ;;  %v3307_v1 = vld [vmem:[%s4439_s3 + $0xc4] ss:$12 sps:$4 sm:$0xff]   ;;  %v3311_v3 = vld [vmem:[%s4439_s3 + $0xc0] ss:$12 sps:$4 sm:$0xff]  }
  0x35   : > { %1119 = vmatpush1.bf16.msra.mxu1 %v3252_v26  ;;  %1077 = vmatprep.subr.bf16.mxu0 %v3253_v27  ;;  %v3303_v62 = vld [vmem:[%s4439_s3 + $0x25c] ss:$12 sps:$4 sm:$0xff]   ;;  %v3309_v2 = vld [vmem:[%s4439_s3 + $0x244] ss:$12 sps:$4 sm:$0xff]   ;;  %v3312_v4 = vld [vmem:[%s4439_s3 + $0x240] ss:$12 sps:$4 sm:$0xff]  }
  0x36   : > { %1120 = vmatprep.subr.bf16.mxu1 %v3255_v28  ;;  %v3319_v5 = vld [vmem:[%s4439_s3 + $0x170] ss:$12 sps:$4 sm:$0xff]   ;;  %v3855_v7 = vld [vmem:[%s3787_s13 + $0x8] ss:$16 sps:$4 sm:$0xff]   ;;  %v3327_v17 = vld [vmem:[%s4439_s3 + $0x140] ss:$12 sps:$4 sm:$0xff]  }
  0x37   : > { %v3852_v6 = vld [vmem:[%s3787_s13] ss:$16 sps:$4 sm:$0xff]   ;;  %v3323_v12 = vld [vmem:[%s4439_s3 + $0x158] ss:$12 sps:$4 sm:$0xff]   ;;  %v3331_v21 = vld [vmem:[%s4439_s3 + $0x128] ss:$12 sps:$4 sm:$0xff]  }
  0x38   : > { %1078 = vmatpush1.bf16.msra.mxu0 %v3257_v29  ;;  %v3320_v9 = vld [vmem:[%s4439_s3 + $0x2f0] ss:$12 sps:$4 sm:$0xff]   ;;  %v3324_v13 = vld [vmem:[%s4439_s3 + $0x2d8] ss:$12 sps:$4 sm:$0xff]   ;;  %v3328_v18 = vld [vmem:[%s4439_s3 + $0x2c0] ss:$12 sps:$4 sm:$0xff]  }
  0x39   : > { %1121 = vmatpush1.bf16.msra.mxu1 %v3258_v30  ;;  %1079 = vmatprep.subr.bf16.mxu0 %v3259_v31  ;;  %v3321_v10 = vld [vmem:[%s4439_s3 + $0xb0] ss:$12 sps:$4 sm:$0xff]   ;;  %v3325_v14 = vld [vmem:[%s4439_s3 + $0x98] ss:$12 sps:$4 sm:$0xff]   ;;  %v3329_v19 = vld [vmem:[%s4439_s3 + $0x80] ss:$12 sps:$4 sm:$0xff]  }
  0x3a   : > { %1122 = vmatprep.subr.bf16.mxu1 %v3261_v32  ;;  %v3322_v11 = vld [vmem:[%s4439_s3 + $0x230] ss:$12 sps:$4 sm:$0xff]   ;;  %v3326_v16 = vld [vmem:[%s4439_s3 + $0x218] ss:$12 sps:$4 sm:$0xff]   ;;  %v3330_v20 = vld [vmem:[%s4439_s3 + $0x200] ss:$12 sps:$4 sm:$0xff]  }
  0x3b   : > { %v3332_v22 = vld [vmem:[%s4439_s3 + $0x2a8] ss:$12 sps:$4 sm:$0xff]   ;;  %v3335_v25 = vld [vmem:[%s4439_s3 + $0x110] ss:$12 sps:$4 sm:$0xff]   ;;  %v3339_v29 = vld [vmem:[%s4439_s3 + $0xf8] ss:$12 sps:$4 sm:$0xff]  }
  0x3c   : > { %1080 = vmatpush1.bf16.msra.mxu0 %v3263_v33  ;;  %v3333_v23 = vld [vmem:[%s4439_s3 + $0x68] ss:$12 sps:$4 sm:$0xff]   ;;  %v3336_v26 = vld [vmem:[%s4439_s3 + $0x290] ss:$12 sps:$4 sm:$0xff]   ;;  %v3340_v30 = vld [vmem:[%s4439_s3 + $0x278] ss:$12 sps:$4 sm:$0xff]  }
  0x3d   : > { %1123 = vmatpush1.bf16.msra.mxu1 %v3264_v34  ;;  %1081 = vmatprep.subr.bf16.mxu0 %v3265_v35  ;;  %v3334_v24 = vld [vmem:[%s4439_s3 + $0x1e8] ss:$12 sps:$4 sm:$0xff]   ;;  %v3337_v27 = vld [vmem:[%s4439_s3 + $0x50] ss:$12 sps:$4 sm:$0xff]   ;;  %v3341_v31 = vld [vmem:[%s4439_s3 + $0x38] ss:$12 sps:$4 sm:$0xff]  }
  0x3e   : > { %1124 = vmatprep.subr.bf16.mxu1 %v3267_v36  ;;  %v3338_v28 = vld [vmem:[%s4439_s3 + $0x1d0] ss:$12 sps:$4 sm:$0xff]   ;;  %v3342_v32 = vld [vmem:[%s4439_s3 + $0x1b8] ss:$12 sps:$4 sm:$0xff]   ;;  %v3343_v33 = vld [vmem:[%s4439_s3 + $0xe0] ss:$12 sps:$4 sm:$0xff]  }
  0x3f   : > { %v3344_v34 = vld [vmem:[%s4439_s3 + $0x260] ss:$12 sps:$4 sm:$0xff]   ;;  %s3955_s28 = smov 0  }
  0x40   : > { %1082 = vmatpush2.bf16.msra.mxu0 %v3269_v37  ;;  %v3345_v35 = vld [vmem:[%s4439_s3 + $0x20] ss:$12 sps:$4 sm:$0xff]   ;;  %v3347_v37 = vld [vmem:[%s4439_s3 + $0xc8] ss:$12 sps:$4 sm:$0xff]  }
  0x41   : > { %1125 = vmatpush2.bf16.msra.mxu1 %v3270_v38  ;;  %1083 = vmatprep.subr.bf16.mxu0 %v3271_v39  ;;  %v3346_v36 = vld [vmem:[%s4439_s3 + $0x1a0] ss:$12 sps:$4 sm:$0xff]   ;;  %v3348_v38 = vld [vmem:[%s4439_s3 + $0x248] ss:$12 sps:$4 sm:$0xff]  }
  0x42   : > { %1126 = vmatprep.subr.bf16.mxu1 %v3273_v40  ;;  %v3349_v39 = vld [vmem:[%s4439_s3 + $0x8] ss:$12 sps:$4 sm:$0xff]  }
  0x43   : > { %v3350_v40 = vld [vmem:[%s4439_s3 + $0x188] ss:$12 sps:$4 sm:$0xff]  }
  0x44   : > { %1084 = vmatpush2.bf16.msra.mxu0 %v3275_v41 }
  0x45   : > { %1127 = vmatpush2.bf16.msra.mxu1 %v3276_v42  ;;  %1085 = vmatprep.subr.bf16.mxu0 %v3277_v43 }
  0x46   : > { %1128 = vmatprep.subr.bf16.mxu1 %v3279_v44 }
  0x48   : > { %1086 = vmatpush2.bf16.msra.mxu0 %v3281_v45 }
  0x49   : > { %1129 = vmatpush2.bf16.msra.mxu1 %v3282_v46  ;;  %1087 = vmatprep.subr.bf16.mxu0 %v3283_v47 }
  0x4a   : > { %1130 = vmatprep.subr.bf16.mxu1 %v3285_v48 }
  0x4c   : > { %1088 = vmatpush2.bf16.msra.mxu0 %v3287_v49 }
  0x4d   : > { %1131 = vmatpush2.bf16.msra.mxu1 %v3288_v50  ;;  %1089 = vmatprep.subr.bf16.mxu0 %v3289_v51 }
  0x4e   : > { %1132 = vmatprep.subr.bf16.mxu1 %v3291_v53 }
  0x50   : > { %1090 = vmatpush2.bf16.msra.mxu0 %v3293_v55 }
  0x51   : > { %1133 = vmatpush2.bf16.msra.mxu1 %v3294_v56  ;;  %1091 = vmatprep.subr.bf16.mxu0 %v3295_v57 }
  0x52   : > { %1134 = vmatprep.subr.bf16.mxu1 %v3297_v58 }
  0x54   : > { %1092 = vmatpush2.bf16.msra.mxu0 %v3299_v59 }
  0x55   : > { %1135 = vmatpush2.bf16.msra.mxu1 %v3300_v60  ;;  %1093 = vmatprep.subr.bf16.mxu0 %v3301_v61 }
  0x56   : > { %1136 = vmatprep.subr.bf16.mxu1 %v3303_v62 }
  0x58   : > { %1094 = vmatpush2.bf16.msra.mxu0 %v3305_v63 }
  0x59   : > { %1137 = vmatpush2.bf16.msra.mxu1 %v3306_v0  ;;  %1095 = vmatprep.subr.bf16.mxu0 %v3307_v1 }
  0x5a   : > { %1138 = vmatprep.subr.bf16.mxu1 %v3309_v2 }
  0x5c   : > { %1096 = vmatpush2.bf16.msra.mxu0 %v3311_v3 }
  0x5d   : > { %1139 = vmatpush2.bf16.msra.mxu1 %v3312_v4  ;;  %3092 = vmatprep.subr.bf16.mxu0 %v3319_v5 }
  0x5e   : > { %3114 = vmatprep.subr.bf16.mxu1 %v3320_v9 }
  0x5f   : > { %1098 = vmatmul.mubr.bf16.vlgmr.msra.gmra.mxu0 %v3852_v6 }
  0x60   : > { %1141 = vmatmul.mubr.bf16.vlgmr.msra.gmra.mxu1 %v3855_v7  ;;  %3093 = vmatpush3.bf16.msra.mxu0 %v3321_v10 }
  0x61   : > { %3115 = vmatpush3.bf16.msra.mxu1 %v3322_v11  ;;  %3094 = vmatprep.subr.bf16.mxu0 %v3323_v12 }
  0x62   : > { %3116 = vmatprep.subr.bf16.mxu1 %v3324_v13  ;;  %1183 = vmatprep.mubr.bf16.mxu0 %v3315_v52 }
  0x63   : > { %1224 = vmatprep.mubr.bf16.mxu1 %v3318_v54 }
  0x64   : > { %3095 = vmatpush3.bf16.msra.mxu0 %v3325_v14 }
  0x65   : > { %3117 = vmatpush3.bf16.msra.mxu1 %v3326_v16  ;;  %3096 = vmatprep.subr.bf16.mxu0 %v3327_v17 }
  0x66   : > { %3118 = vmatprep.subr.bf16.mxu1 %v3328_v18 }
  0x68   : > { %3097 = vmatpush3.bf16.msra.mxu0 %v3329_v19 }
  0x69   : > { %3119 = vmatpush3.bf16.msra.mxu1 %v3330_v20  ;;  %3098 = vmatprep.subr.bf16.mxu0 %v3331_v21 }
  0x6a   : > { %3120 = vmatprep.subr.bf16.mxu1 %v3332_v22 }
  0x6c   : > { %3099 = vmatpush3.bf16.msra.mxu0 %v3333_v23 }
  0x6d   : > { %3121 = vmatpush3.bf16.msra.mxu1 %v3334_v24  ;;  %3100 = vmatprep.subr.bf16.mxu0 %v3335_v25 }
  0x6e   : > { %3122 = vmatprep.subr.bf16.mxu1 %v3336_v26 }
  0x70   : > { %3101 = vmatpush3.bf16.msra.mxu0 %v3337_v27 }
  0x71   : > { %3123 = vmatpush3.bf16.msra.mxu1 %v3338_v28  ;;  %3102 = vmatprep.subr.bf16.mxu0 %v3339_v29 }
  0x72   : > { %3124 = vmatprep.subr.bf16.mxu1 %v3340_v30 }
  0x74   : > { %3103 = vmatpush3.bf16.msra.mxu0 %v3341_v31 }
  0x75   : > { %3125 = vmatpush3.bf16.msra.mxu1 %v3342_v32  ;;  %3104 = vmatprep.subr.bf16.mxu0 %v3343_v33 }
  0x76   : > { %3126 = vmatprep.subr.bf16.mxu1 %v3344_v34 }
  0x78   : > { %3105 = vmatpush3.bf16.msra.mxu0 %v3345_v35 }
  0x79   : > { %3127 = vmatpush3.bf16.msra.mxu1 %v3346_v36  ;;  %3106 = vmatprep.subr.bf16.mxu0 %v3347_v37 }
  0x7a   : > { %3128 = vmatprep.subr.bf16.mxu1 %v3348_v38 }
  0x7c   : > { %3107 = vmatpush3.bf16.msra.mxu0 %v3349_v39 }
  0x7d   : > { %3129 = vmatpush3.bf16.msra.mxu1 %v3350_v40 }
  0x7f   : > { %1184 = vmatmul.mubr.bf16.vlgmr.msra.gmra.mxu0 %v3852_v6 }
  0x80   : > { %1225 = vmatmul.mubr.bf16.vlgmr.msra.gmra.mxu1 %v3855_v7 }
 0x11f   : > { %v1099_v41 = vpop.f32.mrf.mxu0 }
 0x120   : > { %v1142_v42 = vpop.f32.mrf.mxu1 }
 0x121   : > { %v1143_v43 = vadd.f32 %v1142_v42, %v1099_v41  ;;  %v1101_v44 = vpop.f32.mrf.mxu0 }
 0x122   : > { %v1144_v45 = vpop.f32.mrf.mxu1 }
 0x123   : > { %1233 = vst [vmem:[#allocation2] sm:$0xff] %v1143_v43  ;;  %v1145_v46 = vadd.f32 %v1144_v45, %v1101_v44  ;;  %v1103_v47 = vpop.f32.mrf.mxu0 }
 0x124   : > { %v1146_v48 = vpop.f32.mrf.mxu1 }
 0x125   : > { %1234 = vst [vmem:[#allocation2 + $0x8] sm:$0xff] %v1145_v46  ;;  %v1147_v49 = vadd.f32 %v1146_v48, %v1103_v47  ;;  %v1105_v50 = vpop.f32.mrf.mxu0 }
 0x126   : > { %v1148_v51 = vpop.f32.mrf.mxu1 }
 0x127   : > { %1236 = vst [vmem:[#allocation2 + $0x18] sm:$0xff] %v1147_v49  ;;  %v1149_v52 = vadd.f32 %v1148_v51, %v1105_v50 }
 0x129   : > { %1237 = vst [vmem:[#allocation2 + $0x20] sm:$0xff] %v1149_v52 }
 0x13f   : > { %v3108_v53 = vpop.f32.mrf.mxu0 }
 0x140   : > { %v3130_v54 = vpop.f32.mrf.mxu1 }
 0x141   : > { %v3109_v55 = vpop.f32.mrf.mxu0 }
 0x142   : > { %v3131_v56 = vpop.f32.mrf.mxu1  ;;  %v3110_v57 = vadd.f32 %v3109_v55, %v3108_v53 }
 0x143   : > { %v3132_v58 = vadd.f32 %v3131_v56, %v3130_v54  ;;  %v3111_v59 = vpop.f32.mrf.mxu0 }
 0x144   : > { %v3133_v60 = vpop.f32.mrf.mxu1 }
 0x145   : > { %v1227_v61 = vadd.f32 %v3132_v58, %v3110_v57  ;;  %v3112_v62 = vpop.f32.mrf.mxu0 }
 0x146   : > { %v3134_v63 = vpop.f32.mrf.mxu1  ;;  %v3113_v0 = vadd.f32 %v3112_v62, %v3111_v59 }
 0x147   : > { %1235 = vst [vmem:[#allocation2 + $0x10] sm:$0xff] %v1227_v61  ;;  %v3135_v1 = vadd.f32 %v3134_v63, %v3133_v60 }
 0x149   : > { %v1230_v2 = vadd.f32 %v3135_v1, %v3113_v0 }
 0x14b   : > { %1238 = vst [vmem:[#allocation2 + $0x28] sm:$0xff] %v1230_v2 }
 0x14c LB: >> { %s4448_s10 = sld [smem:[#allocation8_spill]]  ;;  %s2969_s13 = sshll.u32 %s3529_s28, 4  ;;  %s3529_s28 = sphi %s3955_s28, %s1254_s28  }
 0x152   : >> { %s4449_s24 = sshll.u32 %s4448_s10, 8 }
 0x153   : >> { %s3964_s26 = sadd.s32 %s4449_s24, %s2969_s13 }
 0x154   : >> { %s1257_s9 = sld [smem:[#allocation6 + %s3964_s26]]  ;;  %s1268_s16 = sadd.s32 1, %s3964_s26 }
 0x155   : >> { %s1269_s18 = sld [smem:[#allocation6 + %s1268_s16]]  ;;  %s1284_s19 = sadd.s32 2, %s3964_s26 }
 0x156   : >> { %s3970_s20 = sld [smem:[#allocation6 + %s1284_s19]]  ;;  %s1300_s22 = sadd.s32 3, %s3964_s26 }
 0x157   : >> { %s3973_s23 = sld [smem:[#allocation6 + %s1300_s22]]  ;;  %s1316_s21 = sadd.s32 4, %s3964_s26 }
 0x158   : >> { %s3976_s13 = sld [smem:[#allocation6 + %s1316_s21]]  ;;  %s1332_s24 = sadd.s32 5, %s3964_s26 }
 0x159   : >> { %s3979_s25 = sld [smem:[#allocation6 + %s1332_s24]] }
 0x15a   : >> { %s1258_s29 = sshra.s32 %s1257_s9, 3  ;;  %s1261_s2 = sand.u32 7, %s1257_s9 }
 0x15b   : >> { %s2970_s3 = smul.u32 24, %s1258_s29  ;;  %s1270_s16 = sshra.s32 %s1269_s18, 3 }
 0x15c   : >> { %s1273_s19 = sand.u32 7, %s1269_s18  ;;  %s2971_s5 = smul.u32 24, %s1270_s16 }
 0x15d   : >> { %s1264_s6 = sadd.s32 %s2970_s3, %s1261_s2  ;;  %s1286_s7 = sshra.s32 %s3970_s20, 3 }
 0x15e   : >> { %s1276_s22 = sadd.s32 %s2971_s5, %s1273_s19  ;;  %s1265_s8 = scalar_lea.vmem [#allocation2], %s1264_s6 }
 0x15f   : >> { %v3983_v3 = vld [vmem:[%s1265_s8] ss:$8 sm:$0x7]  ;;  %s1289_s21 = sand.u32 7, %s3970_s20  ;;  %s1277_s10 = scalar_lea.vmem [#allocation2], %s1276_s22 }
 0x160   : >> { %v3986_v4 = vld [vmem:[%s1277_s10] ss:$8 sm:$0x7]  ;;  %s2972_s24 = smul.u32 24, %s1286_s7  ;;  %s1302_s1 = sshra.s32 %s3973_s23, 3  ;;  %v1267_v5 = vmul.f32 %v3983_v3, %v3983_v3 }
 0x161   : >> { %v1279_v6 = vmax.f32 %v3983_v3, %v3986_v4  ;;  %s1305_s2 = sand.u32 7, %s3973_s23  ;;  %s2973_s3 = smul.u32 24, %s1302_s1  ;;  %v1281_v7 = vadd.f32 %v3986_v4, %v3983_v3  ;;  %v1282_v9 = vmul.f32 %v3986_v4, %v3986_v4 }
 0x162   : >> { %s1292_s5 = sadd.s32 %s2972_s24, %s1289_s21  ;;  %s1318_s6 = sshra.s32 %s3976_s13, 3 }
 0x163   : >> { %s1308_s7 = sadd.s32 %s2973_s3, %s1305_s2  ;;  %v1283_v10 = vadd.f32 %v1282_v9, %v1267_v5  ;;  %s1293_s8 = scalar_lea.vmem [#allocation2], %s1292_s5 }
 0x164   : >> { %v1294_v11 = vld [vmem:[%s1293_s8] ss:$8 sm:$0x7]  ;;  %s1321_s10 = sand.u32 7, %s3976_s13  ;;  %s1309_s29 = scalar_lea.vmem [#allocation2], %s1308_s7 }
 0x165   : >> { %v1295_v12 = vmax.f32 %v1279_v6, %v1294_v11  ;;  %v1310_v13 = vld [vmem:[%s1309_s29] ss:$8 sm:$0x7]  ;;  %s2974_s9 = smul.u32 24, %s1318_s6  ;;  %s1334_s1 = sshra.s32 %s3979_s25, 3  ;;  %v1297_v14 = vadd.f32 %v1294_v11, %v1281_v7  ;;  %v1298_v16 = vmul.f32 %v1294_v11, %v1294_v11 }
 0x166   : >> { %s1337_s18 = sand.u32 7, %s3979_s25  ;;  %s2975_s20 = smul.u32 24, %s1334_s1  ;;  %v1314_v17 = vmul.f32 %v1310_v13, %v1310_v13  ;;  %v1296_v18 = vmin.f32 %v1310_v13, %v1294_v11 }
 0x167   : >> { %v1311_v19 = vmax.f32 %v1295_v12, %v1310_v13  ;;  %s1324_s23 = sadd.s32 %s2974_s9, %s1321_s10  ;;  %s4450_s16 = sadd.s32 6, %s3964_s26  ;;  %v1313_v20 = vadd.f32 %v1310_v13, %v1297_v14  ;;  %v1299_v21 = vadd.f32 %v1298_v16, %v1283_v10 }
 0x168   : >> { %s4004_s19 = sld [smem:[#allocation6 + %s4450_s16]]  ;;  %s1340_s13 = sadd.s32 %s2975_s20, %s1337_s18 }
 0x169   : >> { %s1325_s22 = scalar_lea.vmem [#allocation2], %s1324_s23  ;;  %s1364_s21 = sadd.s32 7, %s3964_s26  ;;  %v1315_v23 = vadd.f32 %v1314_v17, %v1299_v21 }
 0x16a   : >> { %v1326_v22 = vld [vmem:[%s1325_s22] ss:$8 sm:$0x7]  ;;  %s1341_s25 = scalar_lea.vmem [#allocation2], %s1340_s13  ;;  %s4007_s24 = sld [smem:[#allocation6 + %s1364_s21]] }
 0x16b   : >> { %v1342_v24 = vld [vmem:[%s1341_s25] ss:$8 sm:$0x7]  ;;  %s1380_s2 = sadd.s32 8, %s3964_s26  ;;  %v1330_v25 = vmul.f32 %v1326_v22, %v1326_v22  ;;  %v1312_v26 = vmin.f32 %v1296_v18, %v1326_v22  ;;  %v1327_v27 = vmax.f32 %v1311_v19, %v1326_v22  ;;  %s1396_s5 = sadd.s32 9, %s3964_s26  ;;  %v1329_v28 = vadd.f32 %v1326_v22, %v1313_v20 }
 0x16c   : >> { %s4010_s3 = sld [smem:[#allocation6 + %s1380_s2]]  ;;  %s1412_s7 = sadd.s32 10, %s3964_s26  ;;  %v1346_v30 = vmul.f32 %v1342_v24, %v1342_v24 }
 0x16d   : >> { %s4013_s6 = sld [smem:[#allocation6 + %s1396_s5]]  ;;  %v1331_v29 = vadd.f32 %v1330_v25, %v1315_v23  ;;  %v1328_v31 = vmin.f32 %v1312_v26, %v1342_v24  ;;  %v1343_v32 = vmax.f32 %v1327_v27, %v1342_v24  ;;  %s1428_s1 = sadd.s32 11, %s3964_s26  ;;  %v1345_v33 = vadd.f32 %v1342_v24, %v1329_v28 }
 0x16e   : >> { %s1350_s8 = sshra.s32 %s4004_s19, 3  ;;  %s1353_s10 = sand.u32 7, %s4004_s19  ;;  %v1280_v27 = vmin.f32 %v3983_v3, %v3986_v4 }
 0x16f   : >> { %s2976_s29 = smul.u32 24, %s1350_s8  ;;  %s4018_s9 = sld [smem:[#allocation6 + %s1412_s7]]  ;;  %v1347_v34 = vadd.f32 %v1346_v30, %v1331_v29 }
 0x170   : >> { %s1444_s18 = sadd.s32 12, %s3964_s26  ;;  %s1366_s23 = sshra.s32 %s4007_s24, 3 }
 0x171   : >> { %s1356_s20 = sadd.s32 %s2976_s29, %s1353_s10  ;;  %s1369_s16 = sand.u32 7, %s4007_s24 }
 0x172   : >> { %s1357_s13 = scalar_lea.vmem [#allocation2], %s1356_s20  ;;  %s2977_s19 = smul.u32 24, %s1366_s23 }
 0x173   : >> { %v1358_v35 = vld [vmem:[%s1357_s13] ss:$8 sm:$0x7]  ;;  %s1382_s22 = sshra.s32 %s4010_s3, 3  ;;  %s1385_s21 = sand.u32 7, %s4010_s3 }
 0x174   : >> { %v1344_v36 = vmin.f32 %v1328_v31, %v1358_v35  ;;  %v1359_v37 = vmax.f32 %v1343_v32, %v1358_v35  ;;  %s2978_s25 = smul.u32 24, %s1382_s22  ;;  %v1361_v38 = vadd.f32 %v1358_v35, %v1345_v33  ;;  %v1362_v39 = vmul.f32 %v1358_v35, %v1358_v35  ;;  %s1372_s2 = sadd.s32 %s2977_s19, %s1369_s16 }
 0x175   : >> { %s1398_s5 = sshra.s32 %s4013_s6, 3  ;;  %s1373_s8 = scalar_lea.vmem [#allocation2], %s1372_s2 }
 0x176   : >> { %s1388_s7 = sadd.s32 %s2978_s25, %s1385_s21  ;;  %v1363_v40 = vadd.f32 %v1362_v39, %v1347_v34  ;;  %v1374_v41 = vld [vmem:[%s1373_s8] ss:$8 sm:$0x7]  ;;  %s1401_s24 = sand.u32 7, %s4013_s6 }
 0x177   : >> { %v1360_v42 = vmin.f32 %v1344_v36, %v1374_v41  ;;  %v1375_v43 = vmax.f32 %v1359_v37, %v1374_v41  ;;  %s1389_s10 = scalar_lea.vmem [#allocation2], %s1388_s7  ;;  %s2979_s29 = smul.u32 24, %s1398_s5  ;;  %v1377_v45 = vadd.f32 %v1374_v41, %v1361_v38  ;;  %v1378_v46 = vmul.f32 %v1374_v41, %v1374_v41 }
 0x178   : >> { %v1390_v44 = vld [vmem:[%s1389_s10] ss:$8 sm:$0x7]  ;;  %s1414_s3 = sshra.s32 %s4018_s9, 3  ;;  %s1417_s20 = sand.u32 7, %s4018_s9 }
 0x179   : >> { %s2980_s23 = smul.u32 24, %s1414_s3  ;;  %v1394_v47 = vmul.f32 %v1390_v44, %v1390_v44  ;;  %v1376_v48 = vmin.f32 %v1360_v42, %v1390_v44  ;;  %v1391_v49 = vmax.f32 %v1375_v43, %v1390_v44  ;;  %s1404_s16 = sadd.s32 %s2979_s29, %s1401_s24  ;;  %v1393_v50 = vadd.f32 %v1390_v44, %v1377_v45 }
 0x17a   : >> { %s4032_s13 = sld [smem:[#allocation6 + %s1428_s1]]  ;;  %v1379_v51 = vadd.f32 %v1378_v46, %v1363_v40  ;;  %s1405_s19 = scalar_lea.vmem [#allocation2], %s1404_s16 }
 0x17b   : >> { %s1420_s6 = sadd.s32 %s2980_s23, %s1417_s20  ;;  %v1406_v52 = vld [vmem:[%s1405_s19] ss:$8 sm:$0x7]  ;;  %s4036_s9 = sld [smem:[#allocation6 + %s1444_s18]] }
 0x17c   : >> { %v1395_v53 = vadd.f32 %v1394_v47, %v1379_v51  ;;  %s1421_s22 = scalar_lea.vmem [#allocation2], %s1420_s6  ;;  %s1460_s21 = sadd.s32 13, %s3964_s26  ;;  %v1410_v55 = vmul.f32 %v1406_v52, %v1406_v52  ;;  %v1392_v56 = vmin.f32 %v1376_v48, %v1406_v52  ;;  %v1407_v57 = vmax.f32 %v1391_v49, %v1406_v52 }
 0x17d   : >> { %v1422_v54 = vld [vmem:[%s1421_s22] ss:$8 sm:$0x7]  ;;  %s1476_s25 = sadd.s32 14, %s3964_s26  ;;  %s4040_s1 = sld [smem:[#allocation6 + %s1460_s21]]  ;;  %v1409_v58 = vadd.f32 %v1406_v52, %v1393_v50 }
 0x17e   : >> { %s1492_s2 = sadd.s32 15, %s3964_s26  ;;  %s4043_s5 = sld [smem:[#allocation6 + %s1476_s25]]  ;;  %v1411_v59 = vadd.f32 %v1410_v55, %v1395_v53  ;;  %v1426_v60 = vmul.f32 %v1422_v54, %v1422_v54  ;;  %v1408_v61 = vmin.f32 %v1392_v56, %v1422_v54  ;;  %v1423_v62 = vmax.f32 %v1407_v57, %v1422_v54 }
 0x17f   : >> { %s4451_s7 = sshra.s32 %s3529_s28, 3  ;;  %s4051_s29 = sld [smem:[#allocation6 + %s1492_s2]]  ;;  %v1425_v63 = vadd.f32 %v1422_v54, %v1409_v58 }
 0x180   : >> { %s4047_s18 = smul.u32 24, %s4451_s7  ;;  %s1430_s8 = sshra.s32 %s4032_s13, 3  ;;  %v1427_v0 = vadd.f32 %v1426_v60, %v1411_v59 }
 0x181   : >> { %s1433_s24 = sand.u32 7, %s4032_s13  ;;  %s2981_s10 = smul.u32 24, %s1430_s8 }
 0x182   : >> { %s1446_s3 = sshra.s32 %s4036_s9, 3  ;;  %s1449_s20 = sand.u32 7, %s4036_s9 }
 0x183   : >> { %s1436_s26 = sadd.s32 %s2981_s10, %s1433_s24  ;;  %s2982_s23 = smul.u32 24, %s1446_s3 }
 0x184   : >> { %s1462_s16 = sshra.s32 %s4040_s1, 3  ;;  %s1437_s6 = scalar_lea.vmem [#allocation2], %s1436_s26 }
 0x185   : >> { %v1438_v1 = vld [vmem:[%s1437_s6] ss:$8 sm:$0x7]  ;;  %s1452_s13 = sadd.s32 %s2982_s23, %s1449_s20  ;;  %s1465_s19 = sand.u32 7, %s4040_s1 }
 0x186   : >> { %v1424_v2 = vmin.f32 %v1408_v61, %v1438_v1  ;;  %v1439_v5 = vmax.f32 %v1423_v62, %v1438_v1  ;;  %s2983_s22 = smul.u32 24, %s1462_s16  ;;  %v1441_v6 = vadd.f32 %v1438_v1, %v1425_v63  ;;  %v1442_v7 = vmul.f32 %v1438_v1, %v1438_v1  ;;  %s1453_s21 = scalar_lea.vmem [#allocation2], %s1452_s13 }
 0x187   : >> { %v1454_v9 = vld [vmem:[%s1453_s21] ss:$8 sm:$0x7]  ;;  %s1478_s9 = sshra.s32 %s4043_s5, 3  ;;  %s1481_s25 = sand.u32 7, %s4043_s5 }
 0x188   : >> { %v1440_v10 = vmin.f32 %v1424_v2, %v1454_v9  ;;  %v1455_v11 = vmax.f32 %v1439_v5, %v1454_v9  ;;  %s1468_s2 = sadd.s32 %s2983_s22, %s1465_s19  ;;  %s2984_s7 = smul.u32 24, %s1478_s9  ;;  %v1457_v12 = vadd.f32 %v1454_v9, %v1441_v6  ;;  %v1443_v13 = vadd.f32 %v1442_v7, %v1427_v0 }
 0x189   : >> { %s1494_s1 = sshra.s32 %s4051_s29, 3  ;;  %v1458_v14 = vmul.f32 %v1454_v9, %v1454_v9  ;;  %s1469_s8 = scalar_lea.vmem [#allocation2], %s1468_s2 }
 0x18a   : >> { %v1470_v16 = vld [vmem:[%s1469_s8] ss:$8 sm:$0x7]  ;;  %s1484_s24 = sadd.s32 %s2984_s7, %s1481_s25  ;;  %s1497_s10 = sand.u32 7, %s4051_s29 }
 0x18b   : >> { %v1456_v17 = vmin.f32 %v1440_v10, %v1470_v16  ;;  %v1471_v18 = vmax.f32 %v1455_v11, %v1470_v16  ;;  %s2985_s3 = smul.u32 24, %s1494_s1  ;;  %v1473_v19 = vadd.f32 %v1470_v16, %v1457_v12  ;;  %v1459_v20 = vadd.f32 %v1458_v14, %v1443_v13  ;;  %s1485_s5 = scalar_lea.vmem [#allocation2], %s1484_s24 }
 0x18c   : >> { %v1486_v21 = vld [vmem:[%s1485_s5] ss:$8 sm:$0x7]  ;;  %s4452_s20 = sand.u32 7, %s3529_s28  ;;  %v1474_v22 = vmul.f32 %v1470_v16, %v1470_v16  ;;  %s1254_s28 = sadd.s32 1, %s3529_s28  }
 0x18d   : >> { %s1518_s26 = sadd.s32 %s4047_s18, %s4452_s20  ;;  %v1472_v23 = vmin.f32 %v1456_v17, %v1486_v21  ;;  %v1487_v24 = vmax.f32 %v1471_v18, %v1486_v21  ;;  %s1500_s23 = sadd.s32 %s2985_s3, %s1497_s10  ;;  %v1489_v25 = vadd.f32 %v1486_v21, %v1473_v19  ;;  %v1490_v26 = vmul.f32 %v1486_v21, %v1486_v21 }
 0x18e   : >> { %v1475_v28 = vadd.f32 %v1474_v22, %v1459_v20  ;;  %s1501_s29 = scalar_lea.vmem [#allocation2], %s1500_s23  ;;  %s1519_s16 = scalar_lea.vmem %s3657_s30, %s1518_s26 }
 0x18f   : >> { %v1502_v29 = vld [vmem:[%s1501_s29] ss:$8 sm:$0x7]  ;;  %s1522_s6 = scalar_lea.vmem %s3662_s15, %s1518_s26  ;;  %s1525_s18 = scalar_lea.vmem [#allocation3], %s1518_s26 }
 0x190   : >> { %v1488_v30 = vmin.f32 %v1472_v23, %v1502_v29  ;;  %v1503_v31 = vmax.f32 %v1487_v24, %v1502_v29  ;;  %v1505_v32 = vadd.f32 %v1502_v29, %v1489_v25  ;;  %v1491_v33 = vadd.f32 %v1490_v26, %v1475_v28  ;;  %s1528_s13 = scalar_lea.vmem [#allocation4], %s1518_s26  ;;  %p1251_p10 = scmp.ge.s32.totalorder %s1254_s28, 16  }
 0x191   : >> { %v1506_v34 = vmul.f32 %v1502_v29, %v1502_v29  ;;  %v3351_v3 = vld [vmem:[%s4425_s4 + $0xac] ss:$12 sps:$4 sm:$0xff] (%p1251_p10)   ;;  %v3355_v37 = vld [vmem:[%s4425_s4 + $0xa8] ss:$12 sps:$4 sm:$0xff] (%p1251_p10)   ;;  %v3361_v41 = vld [vmem:[%s4425_s4 + $0x90] ss:$12 sps:$4 sm:$0xff] (%p1251_p10)  }
 0x192   : >> { %1520 = vst.msk [vmem:[%s1519_s16] ss:$8 sm:$0x7] %vm3669_vm0, %v1503_v31  ;;  %v1504_v35 = vmin.f32 %v1488_v30, %v1280_v27  ;;  %1526 = vst.msk [vmem:[%s1525_s18] ss:$8 sm:$0x7] %vm3669_vm0, %v1505_v32  ;;  %2195 = vmatprep.subr.bf16.mxu0 (%p1251_p10), %v3351_v3 }
 0x193   : >> { %v1507_v36 = vadd.f32 %v1506_v34, %v1491_v33  ;;  %1253 = sbr.rel (!%p1251_p10) target bundleno = 332 (0x14c), region = 136  ;;  %v3353_v4 = vld [vmem:[%s4425_s4 + $0x22c] ss:$12 sps:$4 sm:$0xff] (%p1251_p10)   ;;  %v3356_v38 = vld [vmem:[%s4425_s4 + $0x228] ss:$12 sps:$4 sm:$0xff] (%p1251_p10)   ;;  %2196 = vmatpush1.bf16.msra.mxu0 (%p1251_p10), %v3355_v37 }
 0x194   : >> { %1523 = vst.msk [vmem:[%s1522_s6] ss:$8 sm:$0x7] %vm3669_vm0, %v1504_v35  ;;  %2238 = vmatprep.subr.bf16.mxu1 (%p1251_p10), %v3353_v4  ;;  %v3357_v39 = vld [vmem:[%s4425_s4 + $0x94] ss:$12 sps:$4 sm:$0xff] (%p1251_p10)  }
 0x195   : >> { %1529 = vst.msk [vmem:[%s1528_s13] ss:$8 sm:$0x7] %vm3669_vm0, %v1507_v36  ;;  %2239 = vmatpush1.bf16.msra.mxu1 (%p1251_p10), %v3356_v38  ;;  %v3359_v40 = vld [vmem:[%s4425_s4 + $0x214] ss:$12 sps:$4 sm:$0xff] (%p1251_p10)   ;;  %2197 = vmatprep.subr.bf16.mxu0 (%p1251_p10), %v3357_v39 }
 0x196   : > { %v3362_v42 = vld [vmem:[%s4425_s4 + $0x210] ss:$12 sps:$4 sm:$0xff] (%p1251_p10)   ;;  %2240 = vmatprep.subr.bf16.mxu1 (%p1251_p10), %v3359_v40  ;;  %v3367_v45 = vld [vmem:[%s4425_s4 + $0x78] ss:$12 sps:$4 sm:$0xff] (%p1251_p10)   ;;  %v3373_v49 = vld [vmem:[%s4425_s4 + $0x60] ss:$12 sps:$4 sm:$0xff] (%p1251_p10)  }
 0x197   : > { %v3363_v43 = vld [vmem:[%s4425_s4 + $0x7c] ss:$12 sps:$4 sm:$0xff] (%p1251_p10)   ;;  %v3368_v46 = vld [vmem:[%s4425_s4 + $0x1f8] ss:$12 sps:$4 sm:$0xff] (%p1251_p10)   ;;  %2198 = vmatpush1.bf16.msra.mxu0 (%p1251_p10), %v3361_v41  ;;  %v3374_v50 = vld [vmem:[%s4425_s4 + $0x1e0] ss:$12 sps:$4 sm:$0xff] (%p1251_p10)  }
 0x198   : > { %v3365_v44 = vld [vmem:[%s4425_s4 + $0x1fc] ss:$12 sps:$4 sm:$0xff]   ;;  %v3369_v47 = vld [vmem:[%s4425_s4 + $0x64] ss:$12 sps:$4 sm:$0xff]   ;;  %2199 = vmatprep.subr.bf16.mxu0 %v3363_v43  ;;  %v3375_v51 = vld [vmem:[%s4425_s4 + $0x4c] ss:$12 sps:$4 sm:$0xff]  }
 0x199   : > { %2241 = vmatpush1.bf16.msra.mxu1 %v3362_v42  ;;  %v3371_v48 = vld [vmem:[%s4425_s4 + $0x1e4] ss:$12 sps:$4 sm:$0xff]   ;;  %v3377_v52 = vld [vmem:[%s4425_s4 + $0x1cc] ss:$12 sps:$4 sm:$0xff]   ;;  %v3379_v53 = vld [vmem:[%s4425_s4 + $0x48] ss:$12 sps:$4 sm:$0xff]  }
 0x19a   : > { %2242 = vmatprep.subr.bf16.mxu1 %v3365_v44  ;;  %v3380_v54 = vld [vmem:[%s4425_s4 + $0x1c8] ss:$12 sps:$4 sm:$0xff]   ;;  %v3385_v57 = vld [vmem:[%s4425_s4 + $0x30] ss:$12 sps:$4 sm:$0xff]   ;;  %v3391_v61 = vld [vmem:[%s4425_s4 + $0x18] ss:$12 sps:$4 sm:$0xff]  }
 0x19b   : > { %2200 = vmatpush1.bf16.msra.mxu0 %v3367_v45  ;;  %v3381_v55 = vld [vmem:[%s4425_s4 + $0x34] ss:$12 sps:$4 sm:$0xff]   ;;  %v3386_v58 = vld [vmem:[%s4425_s4 + $0x1b0] ss:$12 sps:$4 sm:$0xff]   ;;  %v3392_v62 = vld [vmem:[%s4425_s4 + $0x198] ss:$12 sps:$4 sm:$0xff]  }
 0x19c   : > { %2201 = vmatprep.subr.bf16.mxu0 %v3369_v47  ;;  %v3383_v56 = vld [vmem:[%s4425_s4 + $0x1b4] ss:$12 sps:$4 sm:$0xff]   ;;  %v3387_v59 = vld [vmem:[%s4425_s4 + $0x1c] ss:$12 sps:$4 sm:$0xff]   ;;  %v3393_v63 = vld [vmem:[%s4425_s4 + $0x4] ss:$12 sps:$4 sm:$0xff]  }
 0x19d   : > { %2243 = vmatpush1.bf16.msra.mxu1 %v3368_v46  ;;  %v3389_v60 = vld [vmem:[%s4425_s4 + $0x19c] ss:$12 sps:$4 sm:$0xff]   ;;  %v3395_v0 = vld [vmem:[%s4425_s4 + $0x184] ss:$12 sps:$4 sm:$0xff]   ;;  %v3397_v1 = vld [vmem:[%s4425_s4] ss:$12 sps:$4 sm:$0xff]  }
 0x19e   : > { %2244 = vmatprep.subr.bf16.mxu1 %v3371_v48  ;;  %v3398_v2 = vld [vmem:[%s4425_s4 + $0x180] ss:$12 sps:$4 sm:$0xff]   ;;  %v3403_v7 = vld [vmem:[%s4425_s4 + $0x168] ss:$12 sps:$4 sm:$0xff]   ;;  %v3409_v12 = vld [vmem:[%s4425_s4 + $0x150] ss:$12 sps:$4 sm:$0xff]  }
 0x19f   : > { %2202 = vmatpush1.bf16.msra.mxu0 %v3373_v49  ;;  %v3399_v5 = vld [vmem:[%s4425_s4 + $0x16c] ss:$12 sps:$4 sm:$0xff]   ;;  %v3404_v9 = vld [vmem:[%s4425_s4 + $0x2e8] ss:$12 sps:$4 sm:$0xff]   ;;  %v3410_v13 = vld [vmem:[%s4425_s4 + $0x2d0] ss:$12 sps:$4 sm:$0xff]  }
 0x1a0   : > { %2203 = vmatprep.subr.bf16.mxu0 %v3375_v51  ;;  %v3401_v6 = vld [vmem:[%s4425_s4 + $0x2ec] ss:$12 sps:$4 sm:$0xff]   ;;  %v3405_v10 = vld [vmem:[%s4425_s4 + $0x154] ss:$12 sps:$4 sm:$0xff]   ;;  %v3411_v14 = vld [vmem:[%s4425_s4 + $0x13c] ss:$12 sps:$4 sm:$0xff]  }
 0x1a1   : > { %2245 = vmatpush1.bf16.msra.mxu1 %v3374_v50  ;;  %v3407_v11 = vld [vmem:[%s4425_s4 + $0x2d4] ss:$12 sps:$4 sm:$0xff]   ;;  %v3413_v16 = vld [vmem:[%s4425_s4 + $0x2bc] ss:$12 sps:$4 sm:$0xff]   ;;  %v3415_v17 = vld [vmem:[%s4425_s4 + $0x138] ss:$12 sps:$4 sm:$0xff]  }
 0x1a2   : > { %2246 = vmatprep.subr.bf16.mxu1 %v3377_v52  ;;  %v3416_v18 = vld [vmem:[%s4425_s4 + $0x2b8] ss:$12 sps:$4 sm:$0xff]   ;;  %v3421_v21 = vld [vmem:[%s4425_s4 + $0x120] ss:$12 sps:$4 sm:$0xff]   ;;  %v3427_v27 = vld [vmem:[%s4425_s4 + $0x108] ss:$12 sps:$4 sm:$0xff]  }
 0x1a3   : > { %2204 = vmatpush1.bf16.msra.mxu0 %v3379_v53  ;;  %v3417_v19 = vld [vmem:[%s4425_s4 + $0x124] ss:$12 sps:$4 sm:$0xff]   ;;  %v3422_v22 = vld [vmem:[%s4425_s4 + $0x2a0] ss:$12 sps:$4 sm:$0xff]   ;;  %v3428_v28 = vld [vmem:[%s4425_s4 + $0x288] ss:$12 sps:$4 sm:$0xff]  }
 0x1a4   : > { %2205 = vmatprep.subr.bf16.mxu0 %v3381_v55  ;;  %v3419_v20 = vld [vmem:[%s4425_s4 + $0x2a4] ss:$12 sps:$4 sm:$0xff]   ;;  %v3423_v23 = vld [vmem:[%s4425_s4 + $0x10c] ss:$12 sps:$4 sm:$0xff]   ;;  %v3429_v29 = vld [vmem:[%s4425_s4 + $0xf4] ss:$12 sps:$4 sm:$0xff]  }
 0x1a5   : > { %2247 = vmatpush1.bf16.msra.mxu1 %v3380_v54  ;;  %v3449_v24 = vld [vmem:[%s3636_s14 + $0x4] ss:$16 sps:$4 sm:$0xff]   ;;  %v3425_v25 = vld [vmem:[%s4425_s4 + $0x28c] ss:$12 sps:$4 sm:$0xff]   ;;  %v3433_v31 = vld [vmem:[%s4425_s4 + $0xf0] ss:$12 sps:$4 sm:$0xff]  }
 0x1a6   : > { %2248 = vmatprep.subr.bf16.mxu1 %v3383_v56  ;;  %v3452_v26 = vld [vmem:[%s3636_s14 + $0xc] ss:$16 sps:$4 sm:$0xff]   ;;  %2227 = vmatprep.mubr.bf16.mxu0 %v3449_v24  ;;  %v3431_v30 = vld [vmem:[%s4425_s4 + $0x274] ss:$12 sps:$4 sm:$0xff]   ;;  %v3439_v35 = vld [vmem:[%s4425_s4 + $0xd8] ss:$12 sps:$4 sm:$0xff]  }
 0x1a7   : > { %2206 = vmatpush1.bf16.msra.mxu0 %v3385_v57  ;;  %2270 = vmatprep.mubr.bf16.mxu1 %v3452_v26  ;;  %v3434_v32 = vld [vmem:[%s4425_s4 + $0x270] ss:$12 sps:$4 sm:$0xff]   ;;  %v3440_v36 = vld [vmem:[%s4425_s4 + $0x258] ss:$12 sps:$4 sm:$0xff]   ;;  %v3445_v37 = vld [vmem:[%s4425_s4 + $0xc0] ss:$12 sps:$4 sm:$0xff]  }
 0x1a8   : > { %2207 = vmatprep.subr.bf16.mxu0 %v3387_v59  ;;  %v3435_v33 = vld [vmem:[%s4425_s4 + $0xdc] ss:$12 sps:$4 sm:$0xff]   ;;  %v3441_v3 = vld [vmem:[%s4425_s4 + $0xc4] ss:$12 sps:$4 sm:$0xff]   ;;  %v3446_v38 = vld [vmem:[%s4425_s4 + $0x240] ss:$12 sps:$4 sm:$0xff]  }
 0x1a9   : > { %2249 = vmatpush1.bf16.msra.mxu1 %v3386_v58  ;;  %v3437_v34 = vld [vmem:[%s4425_s4 + $0x25c] ss:$12 sps:$4 sm:$0xff]   ;;  %v3443_v4 = vld [vmem:[%s4425_s4 + $0x244] ss:$12 sps:$4 sm:$0xff]   ;;  %v3461_v49 = vld [vmem:[%s4425_s4 + $0x140] ss:$12 sps:$4 sm:$0xff]  }
 0x1aa   : > { %2250 = vmatprep.subr.bf16.mxu1 %v3389_v60  ;;  %v3453_v39 = vld [vmem:[%s4425_s4 + $0x170] ss:$12 sps:$4 sm:$0xff]   ;;  %v4280_v41 = vld [vmem:[%s3636_s14 + $0x8] ss:$16 sps:$4 sm:$0xff]   ;;  %v3462_v50 = vld [vmem:[%s4425_s4 + $0x2c0] ss:$12 sps:$4 sm:$0xff]  }
 0x1ab   : > { %2208 = vmatpush1.bf16.msra.mxu0 %v3391_v61  ;;  %v4277_v40 = vld [vmem:[%s3636_s14] ss:$16 sps:$4 sm:$0xff]   ;;  %v3457_v45 = vld [vmem:[%s4425_s4 + $0x158] ss:$12 sps:$4 sm:$0xff]   ;;  %v3465_v53 = vld [vmem:[%s4425_s4 + $0x128] ss:$12 sps:$4 sm:$0xff]  }
 0x1ac   : > { %2209 = vmatprep.subr.bf16.mxu0 %v3393_v63  ;;  %v3454_v42 = vld [vmem:[%s4425_s4 + $0x2f0] ss:$12 sps:$4 sm:$0xff]   ;;  %v3458_v46 = vld [vmem:[%s4425_s4 + $0x2d8] ss:$12 sps:$4 sm:$0xff]   ;;  %v3463_v51 = vld [vmem:[%s4425_s4 + $0x80] ss:$12 sps:$4 sm:$0xff]  }
 0x1ad   : > { %2251 = vmatpush1.bf16.msra.mxu1 %v3392_v62  ;;  %v3455_v43 = vld [vmem:[%s4425_s4 + $0xb0] ss:$12 sps:$4 sm:$0xff]   ;;  %v3459_v47 = vld [vmem:[%s4425_s4 + $0x98] ss:$12 sps:$4 sm:$0xff]   ;;  %v3464_v52 = vld [vmem:[%s4425_s4 + $0x200] ss:$12 sps:$4 sm:$0xff]  }
 0x1ae   : > { %2252 = vmatprep.subr.bf16.mxu1 %v3395_v0  ;;  %v3456_v44 = vld [vmem:[%s4425_s4 + $0x230] ss:$12 sps:$4 sm:$0xff]   ;;  %v3460_v48 = vld [vmem:[%s4425_s4 + $0x218] ss:$12 sps:$4 sm:$0xff]   ;;  %v3466_v54 = vld [vmem:[%s4425_s4 + $0x2a8] ss:$12 sps:$4 sm:$0xff]  }
 0x1af   : > { %2210 = vmatpush1.bf16.msra.mxu0 %v3397_v1  ;;  %v3467_v55 = vld [vmem:[%s4425_s4 + $0x68] ss:$12 sps:$4 sm:$0xff]   ;;  %v3469_v57 = vld [vmem:[%s4425_s4 + $0x110] ss:$12 sps:$4 sm:$0xff]   ;;  %v3473_v61 = vld [vmem:[%s4425_s4 + $0xf8] ss:$12 sps:$4 sm:$0xff]  }
 0x1b0   : > { %2211 = vmatprep.subr.bf16.mxu0 %v3399_v5  ;;  %v3468_v56 = vld [vmem:[%s4425_s4 + $0x1e8] ss:$12 sps:$4 sm:$0xff]   ;;  %v3470_v58 = vld [vmem:[%s4425_s4 + $0x290] ss:$12 sps:$4 sm:$0xff]   ;;  %v3474_v62 = vld [vmem:[%s4425_s4 + $0x278] ss:$12 sps:$4 sm:$0xff]  }
 0x1b1   : > { %2253 = vmatpush1.bf16.msra.mxu1 %v3398_v2  ;;  %v3471_v59 = vld [vmem:[%s4425_s4 + $0x50] ss:$12 sps:$4 sm:$0xff]   ;;  %v3475_v63 = vld [vmem:[%s4425_s4 + $0x38] ss:$12 sps:$4 sm:$0xff]   ;;  %v3477_v1 = vld [vmem:[%s4425_s4 + $0xe0] ss:$12 sps:$4 sm:$0xff]  }
 0x1b2   : > { %2254 = vmatprep.subr.bf16.mxu1 %v3401_v6  ;;  %v3472_v60 = vld [vmem:[%s4425_s4 + $0x1d0] ss:$12 sps:$4 sm:$0xff]   ;;  %v3476_v0 = vld [vmem:[%s4425_s4 + $0x1b8] ss:$12 sps:$4 sm:$0xff]   ;;  %v3478_v2 = vld [vmem:[%s4425_s4 + $0x260] ss:$12 sps:$4 sm:$0xff]  }
 0x1b3   : > { %2212 = vmatpush2.bf16.msra.mxu0 %v3403_v7  ;;  %v3479_v5 = vld [vmem:[%s4425_s4 + $0x20] ss:$12 sps:$4 sm:$0xff]   ;;  %v3481_v7 = vld [vmem:[%s4425_s4 + $0xc8] ss:$12 sps:$4 sm:$0xff]  }
 0x1b4   : > { %2213 = vmatprep.subr.bf16.mxu0 %v3405_v10  ;;  %v3480_v6 = vld [vmem:[%s4425_s4 + $0x1a0] ss:$12 sps:$4 sm:$0xff]   ;;  %v3483_v10 = vld [vmem:[%s4425_s4 + $0x8] ss:$12 sps:$4 sm:$0xff]  }
 0x1b5   : > { %2255 = vmatpush2.bf16.msra.mxu1 %v3404_v9  ;;  %v3482_v9 = vld [vmem:[%s4425_s4 + $0x248] ss:$12 sps:$4 sm:$0xff]  }
 0x1b6   : > { %2256 = vmatprep.subr.bf16.mxu1 %v3407_v11  ;;  %v3484_v11 = vld [vmem:[%s4425_s4 + $0x188] ss:$12 sps:$4 sm:$0xff]  }
 0x1b7   : > { %2214 = vmatpush2.bf16.msra.mxu0 %v3409_v12 }
 0x1b8   : > { %2215 = vmatprep.subr.bf16.mxu0 %v3411_v14  ;;  %v2369_v14 = vld [vmem:[%s3657_s30] sm:$0xff] }
 0x1b9   : > { %2257 = vmatpush2.bf16.msra.mxu1 %v3410_v13 }
 0x1ba   : > { %2258 = vmatprep.subr.bf16.mxu1 %v3413_v16  ;;  %v2387_v16 = vld [vmem:[%s3662_s15] sm:$0xff] }
 0x1bb   : > { %2216 = vmatpush2.bf16.msra.mxu0 %v3415_v17 }
 0x1bc   : > { %2217 = vmatprep.subr.bf16.mxu0 %v3417_v19 }
 0x1bd   : > { %2259 = vmatpush2.bf16.msra.mxu1 %v3416_v18 }
 0x1be   : > { %2260 = vmatprep.subr.bf16.mxu1 %v3419_v20 }
 0x1bf   : > { %2218 = vmatpush2.bf16.msra.mxu0 %v3421_v21 }
 0x1c0   : > { %2219 = vmatprep.subr.bf16.mxu0 %v3423_v23  ;;  %v2388_v23 = vld [vmem:[%s3662_s15 + $0x8] sm:$0xff] }
 0x1c1   : > { %2261 = vmatpush2.bf16.msra.mxu1 %v3422_v22  ;;  %v2370_v22 = vld [vmem:[%s3657_s30 + $0x8] sm:$0xff] }
 0x1c2   : > { %2262 = vmatprep.subr.bf16.mxu1 %v3425_v25 }
 0x1c3   : > { %2220 = vmatpush2.bf16.msra.mxu0 %v3427_v27  ;;  %v2372_v27 = vld [vmem:[%s3657_s30 + $0x18] sm:$0xff] }
 0x1c4   : > { %2221 = vmatprep.subr.bf16.mxu0 %v3429_v29  ;;  %v2390_v29 = vld [vmem:[%s3662_s15 + $0x18] sm:$0xff] }
 0x1c5   : > { %2263 = vmatpush2.bf16.msra.mxu1 %v3428_v28 }
 0x1c6   : > { %2264 = vmatprep.subr.bf16.mxu1 %v3431_v30 }
 0x1c7   : > { %2222 = vmatpush2.bf16.msra.mxu0 %v3433_v31 }
 0x1c8   : > { %2223 = vmatprep.subr.bf16.mxu0 %v3435_v33 }
 0x1c9   : > { %2265 = vmatpush2.bf16.msra.mxu1 %v3434_v32 }
 0x1ca   : > { %2266 = vmatprep.subr.bf16.mxu1 %v3437_v34 }
 0x1cb   : > { %2224 = vmatpush2.bf16.msra.mxu0 %v3439_v35 }
 0x1cc   : > { %2225 = vmatprep.subr.bf16.mxu0 %v3441_v3  ;;  %v2391_v3 = vld [vmem:[%s3662_s15 + $0x20] sm:$0xff] }
 0x1cd   : > { %2267 = vmatpush2.bf16.msra.mxu1 %v3440_v36  ;;  %v2373_v36 = vld [vmem:[%s3657_s30 + $0x20] sm:$0xff] }
 0x1ce   : > { %2268 = vmatprep.subr.bf16.mxu1 %v3443_v4 }
 0x1cf   : > { %2226 = vmatpush2.bf16.msra.mxu0 %v3445_v37 }
 0x1d0   : > { %3136 = vmatprep.subr.bf16.mxu0 %v3453_v39 }
 0x1d1   : > { %2269 = vmatpush2.bf16.msra.mxu1 %v3446_v38 }
 0x1d2   : > { %3158 = vmatprep.subr.bf16.mxu1 %v3454_v42  ;;  %2228 = vmatmul.mubr.bf16.vlgmr.msra.gmra.mxu0 %v4277_v40 }
 0x1d3   : > { %3137 = vmatpush3.bf16.msra.mxu0 %v3455_v43  ;;  %2313 = vmatprep.mubr.bf16.mxu0 %v3449_v24 }
 0x1d4   : > { %2271 = vmatmul.mubr.bf16.vlgmr.msra.gmra.mxu1 %v4280_v41  ;;  %3138 = vmatprep.subr.bf16.mxu0 %v3457_v45  ;;  %v2366_v45 = vld [vmem:[#allocation3 + $0x18] sm:$0xff] }
 0x1d5   : > { %3159 = vmatpush3.bf16.msra.mxu1 %v3456_v44  ;;  %2354 = vmatprep.mubr.bf16.mxu1 %v3452_v26  ;;  %v2364_v44 = vld [vmem:[#allocation3 + $0x8] sm:$0xff] }
 0x1d6   : > { %3160 = vmatprep.subr.bf16.mxu1 %v3458_v46  ;;  %v2363_v46 = vld [vmem:[#allocation3] sm:$0xff] }
 0x1d7   : > { %3139 = vmatpush3.bf16.msra.mxu0 %v3459_v47 }
 0x1d8   : > { %3140 = vmatprep.subr.bf16.mxu0 %v3461_v49 }
 0x1d9   : > { %3161 = vmatpush3.bf16.msra.mxu1 %v3460_v48 }
 0x1da   : > { %3162 = vmatprep.subr.bf16.mxu1 %v3462_v50  ;;  %v2421_v50 = vld [vmem:[#allocation4 + $0x20] sm:$0xff] }
 0x1db   : > { %3141 = vmatpush3.bf16.msra.mxu0 %v3463_v51 }
 0x1dc   : > { %3142 = vmatprep.subr.bf16.mxu0 %v3465_v53 }
 0x1dd   : > { %3163 = vmatpush3.bf16.msra.mxu1 %v3464_v52 }
 0x1de   : > { %3164 = vmatprep.subr.bf16.mxu1 %v3466_v54 }
 0x1df   : > { %3143 = vmatpush3.bf16.msra.mxu0 %v3467_v55 }
 0x1e0   : > { %3144 = vmatprep.subr.bf16.mxu0 %v3469_v57 }
 0x1e1   : > { %3165 = vmatpush3.bf16.msra.mxu1 %v3468_v56 }
 0x1e2   : > { %3166 = vmatprep.subr.bf16.mxu1 %v3470_v58  ;;  %v2418_v58 = vld [vmem:[#allocation4 + $0x8] sm:$0xff] }
 0x1e3   : > { %3145 = vmatpush3.bf16.msra.mxu0 %v3471_v59  ;;  %v2420_v59 = vld [vmem:[#allocation4 + $0x18] sm:$0xff] }
 0x1e4   : > { %3146 = vmatprep.subr.bf16.mxu0 %v3473_v61 }
 0x1e5   : > { %3167 = vmatpush3.bf16.msra.mxu1 %v3472_v60  ;;  %v2417_v60 = vld [vmem:[#allocation4] sm:$0xff] }
 0x1e6   : > { %3168 = vmatprep.subr.bf16.mxu1 %v3474_v62 }
 0x1e7   : > { %3147 = vmatpush3.bf16.msra.mxu0 %v3475_v63 }
 0x1e8   : > { %3148 = vmatprep.subr.bf16.mxu0 %v3477_v1 }
 0x1e9   : > { %3169 = vmatpush3.bf16.msra.mxu1 %v3476_v0 }
 0x1ea   : > { %3170 = vmatprep.subr.bf16.mxu1 %v3478_v2 }
 0x1eb   : > { %3149 = vmatpush3.bf16.msra.mxu0 %v3479_v5 }
 0x1ec   : > { %3150 = vmatprep.subr.bf16.mxu0 %v3481_v7 }
 0x1ed   : > { %3171 = vmatpush3.bf16.msra.mxu1 %v3480_v6 }
 0x1ee   : > { %3172 = vmatprep.subr.bf16.mxu1 %v3482_v9 }
 0x1ef   : > { %3151 = vmatpush3.bf16.msra.mxu0 %v3483_v10 }
 0x1f1   : > { %3173 = vmatpush3.bf16.msra.mxu1 %v3484_v11 }
 0x1f2   : > { %2314 = vmatmul.mubr.bf16.vlgmr.msra.gmra.mxu0 %v4277_v40  ;;  %v2367_v40 = vld [vmem:[#allocation3 + $0x20] sm:$0xff] }
 0x1f4   : > { %2355 = vmatmul.mubr.bf16.vlgmr.msra.gmra.mxu1 %v4280_v41 }
 0x292   : > { %v2229_v12 = vpop.f32.mrf.mxu0 }
 0x294   : > { %v2272_v13 = vpop.f32.mrf.mxu1  ;;  %v2231_v18 = vpop.f32.mrf.mxu0 }
 0x295   : > { %v2273_v17 = vadd.f32 %v2272_v13, %v2229_v12 }
 0x296   : > { %v2274_v19 = vpop.f32.mrf.mxu1  ;;  %v2233_v25 = vpop.f32.mrf.mxu0 }
 0x297   : > { %v2375_v20 = vadd.f32 %v2369_v14, %v2273_v17  ;;  %v2393_v21 = vadd.f32 %v2387_v16, %v2273_v17  ;;  %v2275_v24 = vadd.f32 %v2274_v19, %v2231_v18  ;;  %v2423_v43 = vmul.f32 2.0, %v2273_v17 }
 0x298   : > { %v2276_v26 = vpop.f32.mrf.mxu1  ;;  %v2235_v33 = vpop.f32.mrf.mxu0  ;;  %v2405_v55 = vmul.f32 16.0, %v2273_v17  ;;  %v2441_v57 = vmul.f32 %v2273_v17, %v2273_v17 }
 0x299   : > { %2381 = vst [vmem:[%s3657_s30] sm:$0xff] %v2375_v20  ;;  %2399 = vst [vmem:[%s3662_s15] sm:$0xff] %v2393_v21  ;;  %v2277_v28 = vadd.f32 %v2276_v26, %v2233_v25  ;;  %v2376_v30 = vadd.f32 %v2370_v22, %v2275_v24  ;;  %v2394_v31 = vadd.f32 %v2388_v23, %v2275_v24  ;;  %v2424_v41 = vmul.f32 2.0, %v2275_v24 }
 0x29a   : > { %v2278_v34 = vpop.f32.mrf.mxu1  ;;  %v2406_v51 = vmul.f32 16.0, %v2275_v24  ;;  %v2429_v56 = vmul.f32 %v2423_v43, %v2363_v46  ;;  %v2442_v61 = vmul.f32 %v2275_v24, %v2275_v24  ;;  %v2411_v9 = vadd.f32 %v2405_v55, %v2363_v46  ;;  %v2419_v55 = vld [vmem:[#allocation4 + $0x10] sm:$0xff] }
 0x29b   : > { %v2378_v32 = vadd.f32 %v2372_v27, %v2277_v28  ;;  %2382 = vst [vmem:[%s3657_s30 + $0x8] sm:$0xff] %v2376_v30  ;;  %2400 = vst [vmem:[%s3662_s15 + $0x8] sm:$0xff] %v2394_v31  ;;  %v2396_v35 = vadd.f32 %v2390_v29, %v2277_v28  ;;  %v2279_v4 = vadd.f32 %v2278_v34, %v2235_v33  ;;  %v2426_v42 = vmul.f32 2.0, %v2277_v28  ;;  %v2371_v31 = vld [vmem:[%s3657_s30 + $0x10] sm:$0xff] }
 0x29c   : > { %v2408_v49 = vmul.f32 16.0, %v2277_v28  ;;  %v2430_v52 = vmul.f32 %v2424_v41, %v2364_v44  ;;  %v2444_v62 = vmul.f32 %v2277_v28, %v2277_v28  ;;  %v2412_v2 = vadd.f32 %v2406_v51, %v2364_v44 }
 0x29d   : > { %2384 = vst [vmem:[%s3657_s30 + $0x18] sm:$0xff] %v2378_v32  ;;  %2402 = vst [vmem:[%s3662_s15 + $0x18] sm:$0xff] %v2396_v35  ;;  %v2379_v37 = vadd.f32 %v2373_v36, %v2279_v4  ;;  %v2397_v38 = vadd.f32 %v2391_v3, %v2279_v4  ;;  %v2427_v39 = vmul.f32 2.0, %v2279_v4  ;;  %v2409_v47 = vmul.f32 16.0, %v2279_v4  ;;  %v2389_v32 = vld [vmem:[%s3662_s15 + $0x10] sm:$0xff] }
 0x29e   : > { %v2432_v53 = vmul.f32 %v2426_v42, %v2366_v45  ;;  %v2445_v54 = vmul.f32 %v2279_v4, %v2279_v4  ;;  %v2414_v1 = vadd.f32 %v2408_v49, %v2366_v45  ;;  %v2436_v5 = vadd.f32 %v2430_v52, %v2418_v58  ;;  %v2392_v49 = vld [vmem:[%s3662_s15 + $0x28] sm:$0xff] }
 0x29f   : > { %2385 = vst [vmem:[%s3657_s30 + $0x20] sm:$0xff] %v2379_v37  ;;  %2403 = vst [vmem:[%s3662_s15 + $0x20] sm:$0xff] %v2397_v38  ;;  %v2433_v48 = vmul.f32 %v2427_v39, %v2367_v40  ;;  %v2415_v63 = vadd.f32 %v2409_v47, %v2367_v40  ;;  %v2435_v10 = vadd.f32 %v2429_v56, %v2417_v60  ;;  %v2447_v11 = vmul.f32 16.0, %v2441_v57  ;;  %v2365_v40 = vld [vmem:[#allocation3 + $0x10] sm:$0xff]  ;;  %v2368_v57 = vld [vmem:[#allocation3 + $0x28] sm:$0xff] }
 0x2a0   : > { %v2438_v6 = vadd.f32 %v2432_v53, %v2420_v59  ;;  %v2451_v7 = vmul.f32 16.0, %v2445_v54  ;;  %v2448_v12 = vmul.f32 16.0, %v2442_v61  ;;  %v2450_v13 = vmul.f32 16.0, %v2444_v62 }
 0x2a1   : > { %v2439_v0 = vadd.f32 %v2433_v48, %v2421_v50  ;;  %v2467_v16 = vadd.f32 %v2415_v63, %v2412_v2  ;;  %v2460_v17 = vadd.f32 %v2414_v1, %v2411_v9  ;;  %v2453_v22 = vadd.f32 %v2447_v11, %v2435_v10  ;;  %v2374_v48 = vld [vmem:[%s3657_s30 + $0x28] sm:$0xff] }
 0x2a2   : > { %v2454_v18 = vadd.f32 %v2448_v12, %v2436_v5  ;;  %v2456_v19 = vadd.f32 %v2450_v13, %v2438_v6 }
 0x2a3   : > { %v2457_v14 = vadd.f32 %v2451_v7, %v2439_v0  ;;  %v2468_v23 = vrot.slane %v2467_v16, 4  ;;  %v2461_v25 = vrot.slane %v2460_v17, 4  ;;  %v2422_v0 = vld [vmem:[#allocation4 + $0x28] sm:$0xff] }
 0x2a4   : > { %v2515_v28 = vadd.f32 %v2456_v19, %v2453_v22 }
 0x2a5   : > { %v2522_v24 = vadd.f32 %v2457_v14, %v2454_v18  ;;  %v2469_v35 = vadd.f32 %v2468_v23, %v2467_v16  ;;  %v2462_v4 = vadd.f32 %v2461_v25, %v2460_v17  ;;  %v3533_v17 = vmov 1966171168  }
 0x2a6   : > { %v2516_v39 = vrot.slane %v2515_v28, 4  ;;  %v2486_v18 = vunpack.c.l.s4 %v3533_v17 }
 0x2a7   : > { %v2523_v36 = vrot.slane %v2522_v24, 4  ;;  %v2470_v46 = vrot.slane %v2469_v35, 2  ;;  %v2463_v53 = vrot.slane %v2462_v4, 2 }
 0x2a8   : > { %v2517_v54 = vadd.f32 %v2516_v39, %v2515_v28  ;;  %v2489_v28 = vshrl.u32 %v1239_v8, 7 }
 0x2a9   : > { %v2524_v47 = vadd.f32 %v2523_v36, %v2522_v24  ;;  %v2471_v62 = vadd.f32 %v2470_v46, %v2469_v35  ;;  %v2464_v9 = vadd.f32 %v2463_v53, %v2462_v4 }
 0x2aa   : > { %v2518_v10 = vrot.slane %v2517_v54, 2 }
 0x2ab   : > { %v2525_v63 = vrot.slane %v2524_v47, 2  ;;  %v2472_v16 = vrot.slane %v2471_v62, 1  ;;  %v2465_v23 = vrot.slane %v2464_v9, 1 }
 0x2ac   : > { %v2519_v24 = vadd.f32 %v2518_v10, %v2517_v54  ;;  %v2514_v54 = vld [vmem:[%s3684_s27] sm:$0x7] }
 0x2ad   : > { %v2526_v19 = vadd.f32 %v2525_v63, %v2524_v47 }
 0x2b2   : > { %v3152_v20 = vpop.f32.mrf.mxu0 }
 0x2b4   : > { %v3174_v21 = vpop.f32.mrf.mxu1  ;;  %v3153_v26 = vpop.f32.mrf.mxu0 }
 0x2b5   : > { %v3154_v29 = vadd.f32 %v3153_v26, %v3152_v20 }
 0x2b6   : > { %v3175_v27 = vpop.f32.mrf.mxu1  ;;  %v3155_v33 = vpop.f32.mrf.mxu0 }
 0x2b7   : > { %v3176_v30 = vadd.f32 %v3175_v27, %v3174_v21  ;;  %v2487_v27 = vunpack.c.0.s8 %v2486_v18 }
 0x2b8   : > { %v3177_v34 = vpop.f32.mrf.mxu1  ;;  %v3156_v37 = vpop.f32.mrf.mxu0 }
 0x2b9   : > { %v2357_v3 = vadd.f32 %v3176_v30, %v3154_v29  ;;  %v3157_v44 = vadd.f32 %v3156_v37, %v3155_v33  ;;  %v2473_v29 = vadd.f32 %v2472_v16, %v2471_v62  ;;  %v2527_v30 = vrot.slane %v2526_v19, 1 }
 0x2ba   : > { %v3178_v38 = vpop.f32.mrf.mxu1  ;;  %v2466_v33 = vadd.f32 %v2465_v23, %v2464_v9 }
 0x2bb   : > { %v2377_v41 = vadd.f32 %v2371_v31, %v2357_v3  ;;  %v2395_v42 = vadd.f32 %v2389_v32, %v2357_v3  ;;  %v2425_v43 = vmul.f32 2.0, %v2357_v3  ;;  %v3179_v45 = vadd.f32 %v3178_v38, %v3177_v34 }
 0x2bc   : > { %v2407_v50 = vmul.f32 16.0, %v2357_v3  ;;  %v2443_v56 = vmul.f32 %v2357_v3, %v2357_v3  ;;  %v2520_v34 = vrot.slane %v2519_v24, 1  ;;  %v2490_v3 = vsub.s32 %v2487_v27, %v2489_v28 }
 0x2bd   : > { %2383 = vst [vmem:[%s3657_s30 + $0x10] sm:$0xff] %v2377_v41  ;;  %2401 = vst [vmem:[%s3662_s15 + $0x10] sm:$0xff] %v2395_v42  ;;  %v2431_v51 = vmul.f32 %v2425_v43, %v2365_v40  ;;  %v2360_v52 = vadd.f32 %v3179_v45, %v3157_v44  ;;  %v2484_v4 = vcombine.low %v2466_v33, %v2473_v29 }
 0x2be   : > { %v2413_v2 = vadd.f32 %v2407_v50, %v2365_v40  ;;  %v2449_v11 = vmul.f32 16.0, %v2443_v56  ;;  %v2528_v37 = vadd.f32 %v2527_v30, %v2526_v19  ;;  %v2521_v40 = vadd.f32 %v2520_v34, %v2519_v24 }
 0x2bf   : > { %v2380_v58 = vadd.f32 %v2374_v48, %v2360_v52  ;;  %v2398_v59 = vadd.f32 %v2392_v49, %v2360_v52  ;;  %v2410_v60 = vmul.f32 16.0, %v2360_v52  ;;  %v2428_v61 = vmul.f32 2.0, %v2360_v52  ;;  %v2459_v48 = vld [vmem:[%s3679_s17] sm:$0x7] }
 0x2c0   : > { %v2446_v1 = vmul.f32 %v2360_v52, %v2360_v52  ;;  %v2437_v5 = vadd.f32 %v2431_v51, %v2419_v55  ;;  %v2491_v8 = vrot.slane %v2484_v4, %v2490_v3  ;;  %v2539_v43 = vcombine.low %v2521_v40, %v2528_v37 }
 0x2c1   : > { %2386 = vst [vmem:[%s3657_s30 + $0x28] sm:$0xff] %v2380_v58  ;;  %2404 = vst [vmem:[%s3662_s15 + $0x28] sm:$0xff] %v2398_v59  ;;  %v2416_v6 = vadd.f32 %v2410_v60, %v2368_v57  ;;  %v2434_v7 = vmul.f32 %v2428_v61, %v2368_v57 }
 0x2c2   : > { %v2452_v13 = vmul.f32 16.0, %v2446_v1  ;;  %v2455_v20 = vadd.f32 %v2449_v11, %v2437_v5  ;;  %v2546_v49 = vrot.slane %v2539_v43, %v2490_v3 }
 0x2c3   : > { %v2440_v12 = vadd.f32 %v2434_v7, %v2422_v0  ;;  %v2474_v14 = vadd.f32 %v2416_v6, %v2413_v2 }
 0x2c5   : > { %v2458_v21 = vadd.f32 %v2452_v13, %v2440_v12  ;;  %v2475_v22 = vrot.slane %v2474_v14, 4 }
 0x2c7   : > { %v2476_v25 = vadd.f32 %v2475_v22, %v2474_v14  ;;  %v2529_v26 = vadd.f32 %v2458_v21, %v2455_v20 }
 0x2c9   : > { %v2477_v31 = vrot.slane %v2476_v25, 2  ;;  %v2530_v32 = vrot.slane %v2529_v26, 4 }
 0x2cb   : > { %v2478_v35 = vadd.f32 %v2477_v31, %v2476_v25  ;;  %v2531_v36 = vadd.f32 %v2530_v32, %v2529_v26 }
 0x2cd   : > { %v2479_v38 = vrot.slane %v2478_v35, 1  ;;  %v2532_v39 = vrot.slane %v2531_v36, 2 }
 0x2cf   : > { %v2480_v41 = vadd.f32 %v2479_v38, %v2478_v35  ;;  %v2533_v42 = vadd.f32 %v2532_v39, %v2531_v36 }
 0x2d1   : > { %v2498_v44 = vrot.slane %v2480_v41, %v2490_v3  ;;  %v2534_v45 = vrot.slane %v2533_v42, 1 }
 0x2d3   : > { %v2499_v46 = vcombine.low %v2491_v8, %v2498_v44  ;;  %v2535_v47 = vadd.f32 %v2534_v45, %v2533_v42 }
 0x2d5   : > { %v2506_v50 = vrot.slane %v2499_v46, %v2490_v3  ;;  %v2553_v51 = vrot.slane %v2535_v47, %v2490_v3 }
 0x2d7   : > { %v2508_v52 = vadd.f32 %v2506_v50, %v2459_v48  ;;  %v2554_v53 = vcombine.low %v2546_v49, %v2553_v51 }
 0x2d9   : > { %2513 = vst.msk [vmem:[%s3679_s17] sm:$0x7] %vm3669_vm0, %v2508_v52  ;;  %v2561_v55 = vrot.slane %v2554_v53, %v2490_v3 }
 0x2db   : > { %v2563_v56 = vadd.f32 %v2561_v55, %v2514_v54 }
 0x2dd   : > { %2564 = vst.msk [vmem:[%s3684_s27] sm:$0x7] %vm3669_vm0, %v2563_v56 }
 0x2de PF: > { %s25_s12 = sadd.s32 1, %s3525_s12   ;;  %s4453_s10 = smov %s3521_s11 }
 0x2df   : > { %p22_p11 = scmp.ge.s32.totalorder %s25_s12, 4   ;;  %s4454_s11 = smov %s4456_s0 }
 0x2e1   :  { %24 = sbr.rel (!%p22_p11) target bundleno = 19 (0x13), region = 147 }

</bundles_post_ra>
